<compile_context>
chip_gen: v7x
topology: tpu7x:2x2x1
jax: 0.10.0
libtpu: 0.0.40
codegen_flags: <defaults>
</compile_context>

<pallas_src>
import jax
import jax.numpy as jnp
from jax.experimental import pallas as pl
from jax.experimental.pallas import tpu as pltpu

NEG_SLOPE = 0.05  # nn.LeakyReLU(0.05)


def _ceil_div(a, b):
    return -(-a // b)


def _sizes(width):
    h0 = (width + 2 - 3) // 2 + 1   # conv0: k3, stride 2, pad 1
    p1 = _ceil_div(h0, 2)           # pool after conv1 (ceil_mode)
    p2 = _ceil_div(p1, 2)           # pool after conv2
    p3 = _ceil_div(p2, 2)           # pool after conv3
    return h0, p1, p2, p3


def _tile_bytes(shape, itemsize):
    """Approximate VMEM footprint of a buffer after (8,128) tile padding."""
    if len(shape) == 1:
        shape = (1,) + tuple(shape)
    lead = 1
    for d in shape[:-2]:
        lead *= int(d)
    sub = _ceil_div(int(shape[-2]), 8) * 8
    lane = _ceil_div(int(shape[-1]), 128) * 128
    return lead * sub * lane * itemsize


# ---------------------------------------------------------------------------
# Fused whole-network kernel (nb batch samples per grid step).
# ---------------------------------------------------------------------------
def _cnnu_kernel(x_ref, w0_ref, wst_ref, bst_ref, fw1_ref, fw2_ref,
                 o_ref,
                 xp0, xp1, xp2, xp3, t1, t2, t3, im):
    nb, h, w, cin0 = x_ref.shape
    h0 = xp1.shape[1] - 2
    s1 = xp2.shape[1] - 2
    s2 = xp3.shape[1] - 2
    s3 = t3.shape[1] // 2

    def zero_border(xp):
        """Zero only the 1-pixel pad border; the interior is overwritten below."""
        _, H, W, C = xp.shape
        zrow = jnp.zeros((nb, 1, W, C), jnp.float32)
        zcol = jnp.zeros((nb, H, 1, C), jnp.float32)
        xp[:, pl.ds(0, 1), :, :] = zrow
        xp[:, pl.ds(H - 1, 1), :, :] = zrow
        xp[:, :, pl.ds(0, 1), :] = zcol
        xp[:, :, pl.ds(W - 1, 1), :] = zcol

    def bias(i):
        return bst_ref[pl.ds(i, 1), :]                       # (1, 32) f32

    def conv(xp_ref, wgt, b_row, oh, ow, stride, cin):
        """3x3 conv (pad already in xp_ref) + bias + LeakyReLU, one im2col GEMM."""
        cout = wgt.shape[-1]
        m = nb * oh * ow
        for kh in range(3):
            for kw in range(3):
                if stride == 1:
                    patch = xp_ref[:, pl.ds(kh, oh), pl.ds(kw, ow), :]
                else:
                    patch = xp_ref[:, pl.ds(kh, oh, stride=stride),
                                   pl.ds(kw, ow, stride=stride), :]
                tap = kh * 3 + kw
                im[pl.ds(0, m), pl.ds(tap * cin, cin)] = patch.reshape(m, cin)
        mat = im[pl.ds(0, m), pl.ds(0, 9 * cin)].astype(jnp.bfloat16)
        acc = jnp.dot(mat, wgt, preferred_element_type=jnp.float32) + b_row
        acc = jnp.maximum(acc, NEG_SLOPE * acc)              # LeakyReLU(0.05)
        return acc.reshape(nb, oh, ow, cout)

    def pool(t_ref, oh, ow):
        """MaxPool2d(2,2,ceil_mode=True) on data already stored in t_ref."""
        ph, pw = _ceil_div(oh, 2), _ceil_div(ow, 2)
        C = t_ref.shape[-1]
        if 2 * ph != oh:                                     # ceil-mode pad row
            t_ref[:, pl.ds(oh, 1), :, :] = jnp.full((nb, 1, 2 * pw, C),
                                                    -jnp.inf, jnp.float32)
        if 2 * pw != ow:                                     # ceil-mode pad col
            t_ref[:, :, pl.ds(ow, 1), :] = jnp.full((nb, 2 * ph, 1, C),
                                                    -jnp.inf, jnp.float32)
        a = t_ref[:, pl.ds(0, ph, stride=2), pl.ds(0, pw, stride=2), :]
        b_ = t_ref[:, pl.ds(0, ph, stride=2), pl.ds(1, pw, stride=2), :]
        c_ = t_ref[:, pl.ds(1, ph, stride=2), pl.ds(0, pw, stride=2), :]
        d_ = t_ref[:, pl.ds(1, ph, stride=2), pl.ds(1, pw, stride=2), :]
        return jnp.maximum(jnp.maximum(a, b_), jnp.maximum(c_, d_))

    # ---- zero pad borders (cheap: 4 slab stores per buffer) -----------------
    for xp in (xp0, xp1, xp2, xp3):
        zero_border(xp)

    # ---- conv0: Conv(Cin,32,3,s2,p1) + LeakyReLU -> xp1 interior ------------
    xp0[:, pl.ds(1, h), pl.ds(1, w), :] = x_ref[...]
    xp1[:, pl.ds(1, h0), pl.ds(1, h0), :] = conv(xp0, w0_ref[...], bias(0),
                                                 h0, h0, 2, cin0)

    # ---- conv1 + LeakyReLU -> maxpool -> xp2 interior ------------------------
    t1[:, pl.ds(0, h0), pl.ds(0, h0), :] = conv(xp1, wst_ref[0], bias(1),
                                                h0, h0, 1, 32)
    xp2[:, pl.ds(1, s1), pl.ds(1, s1), :] = pool(t1, h0, h0)

    # ---- conv2 + LeakyReLU -> maxpool -> xp3 interior ------------------------
    t2[:, pl.ds(0, s1), pl.ds(0, s1), :] = conv(xp2, wst_ref[1], bias(2),
                                                s1, s1, 1, 32)
    xp3[:, pl.ds(1, s2), pl.ds(1, s2), :] = pool(t2, s1, s1)

    # ---- conv3 + LeakyReLU -> maxpool ----------------------------------------
    t3[:, pl.ds(0, s2), pl.ds(0, s2), :] = conv(xp3, wst_ref[2], bias(3),
                                                s2, s2, 1, 32)
    p3 = pool(t3, s2, s2)                                    # (nb, s3, s3, 32)

    # ---- FC head: Linear(flat,32) -> Linear(32,1) -> ReLU (kept f32) --------
    flat_v = p3.reshape(nb, s3 * s3 * p3.shape[-1])          # NHWC flatten
    hfc = jnp.dot(flat_v, fw1_ref[...],
                  preferred_element_type=jnp.float32) + bias(4)
    yfc = jnp.dot(hfc, fw2_ref[...],
                  preferred_element_type=jnp.float32) + bst_ref[pl.ds(5, 1), pl.ds(0, 1)]
    o_ref[...] = jnp.maximum(yfc, 0.0).reshape(o_ref.shape)


# ---------------------------------------------------------------------------
# Wrapper: one pallas_call for the whole forward pass.
# ---------------------------------------------------------------------------
def cnnu_forward(x_nchw, params, nb_max=8):
    n, c, hgt, wid = x_nchw.shape
    assert hgt == wid, "cnnu kernel assumes square inputs (H == W)"
    h0, s1, s2, s3 = _sizes(wid)
    flat = 32 * s3 * s3
    im_cols = 9 * max(32, c)

    # Batch packing: nb samples per grid step; keep >=2 steps when n >= 2 so
    # the "parallel" grid axis can be sharded across v7x's two TensorCores.
    nb = max(1, min(nb_max, _ceil_div(n, 2)))
    n_pad = _ceil_div(n, nb) * nb
    grid = (n_pad // nb,)

    x = jnp.transpose(x_nchw, (0, 2, 3, 1)).astype(jnp.float32)  # NCHW -> NHWC
    if n_pad != n:
        x = jnp.pad(x, ((0, n_pad - n), (0, 0), (0, 0), (0, 0)))

    # ---- consolidated, pre-laid-out weights (conv weights in bf16) ----------
    w0r = params["w0"].reshape(9 * c, 32).astype(jnp.bfloat16)
    wst = jnp.stack([params["w1"].reshape(9 * 32, 32),
                     params["w2"].reshape(9 * 32, 32),
                     params["w3"].reshape(9 * 32, 32)]).astype(jnp.bfloat16)
    bst = jnp.stack([params["b0"], params["b1"], params["b2"], params["b3"],
                     params["fb1"],
                     jnp.pad(params["fb2"], (0, 31))]).astype(jnp.float32)
    # fw1 rows are in PyTorch NCHW-flatten order (c, y, x); permute to the
    # kernel's NHWC flatten order (y, x, c).  Identity when s3 == 1.
    fw1p = (params["fw1"].reshape(32, s3, s3, 32)
            .transpose(1, 2, 0, 3).reshape(flat, 32).astype(jnp.float32))
    fw2 = params["fw2"].astype(jnp.float32)

    scratch_defs = [
        ((nb, wid + 2, wid + 2, c), jnp.float32),            # xp0 (padded input)
        ((nb, h0 + 2, h0 + 2, 32), jnp.float32),             # xp1
        ((nb, s1 + 2, s1 + 2, 32), jnp.float32),             # xp2
        ((nb, s2 + 2, s2 + 2, 32), jnp.float32),             # xp3
        ((nb, 2 * s1, 2 * s1, 32), jnp.float32),             # t1 (pool staging)
        ((nb, 2 * s2, 2 * s2, 32), jnp.float32),             # t2
        ((nb, 2 * s3, 2 * s3, 32), jnp.float32),             # t3
        ((nb * h0 * h0, im_cols), jnp.float32),              # im2col staging
    ]
    # TODO(synk): strip-tile the im2col staging over output-row strips for very
    # large widths (it grows ~(width/2)^2 * 9*32*4B and would exceed v5e's
    # 16 MiB scoped default / v7x's 64 MiB physical VMEM).
    operand_defs = [
        ((nb, wid, wid, c), 4), ((9 * c, 32), 2), ((3, 288, 32), 2),
        ((6, 32), 4), ((flat, 32), 4), ((32, 1), 4), ((nb, 1, 1), 4),
    ]
    vmem_bytes = (sum(_tile_bytes(s, jnp.dtype(d).itemsize) for s, d in scratch_defs)
                  + 2 * sum(_tile_bytes(s, b) for s, b in operand_defs))
    vmem_limit = int(min(64 * 2 ** 20, max(32 * 2 ** 20, 2 * vmem_bytes)))

    def wspec(shape):
        return pl.BlockSpec(shape, lambda *_: (0,) * len(shape))

    out = pl.pallas_call(
        _cnnu_kernel,
        out_shape=jax.ShapeDtypeStruct((n_pad, 1, 1), jnp.float32),
        grid=grid,
        in_specs=[
            pl.BlockSpec((nb, wid, wid, c), lambda i: (i, 0, 0, 0)),  # x
            wspec((9 * c, 32)),                                       # conv0 w
            wspec((3, 9 * 32, 32)),                                   # conv1-3 w
            wspec((6, 32)),                                           # biases
            wspec((flat, 32)),                                        # fc1 w
            wspec((32, 1)),                                           # fc2 w
        ],
        out_specs=pl.BlockSpec((nb, 1, 1), lambda i: (i, 0, 0)),
        scratch_shapes=[pltpu.VMEM(s, d) for s, d in scratch_defs],
        compiler_params=pltpu.CompilerParams(
            dimension_semantics=("parallel",),
            vmem_limit_bytes=vmem_limit),
    )(x, w0r, wst, bst, fw1p, fw2)
    return out.reshape(n_pad, 1)[:n]


# ---------------------------------------------------------------------------
# Deterministic parameter init (PyTorch-default-style uniform).
# ---------------------------------------------------------------------------
def init_params(key, channels, width):
    _, _, _, s3 = _sizes(width)
    flat = 32 * s3 * s3            # == linear_input_neurons()
    keys = jax.random.split(key, 12)

    def conv_init(kw, kb, c_in, c_out):
        bound = float(c_in * 9) ** -0.5
        w = jax.random.uniform(kw, (3, 3, c_in, c_out), jnp.float32, -bound, bound)
        b = jax.random.uniform(kb, (c_out,), jnp.float32, -bound, bound)
        return w, b

    def lin_init(kw, kb, d_in, d_out):
        bound = float(d_in) ** -0.5
        w = jax.random.uniform(kw, (d_in, d_out), jnp.float32, -bound, bound)
        b = jax.random.uniform(kb, (d_out,), jnp.float32, -bound, bound)
        return w, b

    p = {}
    p["w0"], p["b0"] = conv_init(keys[0], keys[1], channels, 32)
    p["w1"], p["b1"] = conv_init(keys[2], keys[3], 32, 32)
    p["w2"], p["b2"] = conv_init(keys[4], keys[5], 32, 32)
    p["w3"], p["b3"] = conv_init(keys[6], keys[7], 32, 32)
    p["fw1"], p["fb1"] = lin_init(keys[8], keys[9], flat, 32)
    p["fw2"], p["fb2"] = lin_init(keys[10], keys[11], 32, 1)
    return p


# ---------------------------------------------------------------------------
# Pure-JAX reference (matches PyTorch cnnu.forward) for correctness check.
# ---------------------------------------------------------------------------
def _ref_forward(x_nchw, params):
    hi = jax.lax.Precision.HIGHEST

    def conv(x, w_hwio, b, stride):
        y = jax.lax.conv_general_dilated(
            x, w_hwio, window_strides=(stride, stride),
            padding=((1, 1), (1, 1)),
            dimension_numbers=("NCHW", "HWIO", "NCHW"), precision=hi)
        y = y + b.reshape(1, -1, 1, 1)
        return jnp.where(y >= 0.0, y, NEG_SLOPE * y)

    def pool(x):
        n, c, h, w = x.shape
        ph, pw = (-h) % 2, (-w) % 2
        if ph or pw:
            x = jnp.pad(x, ((0, 0), (0, 0), (0, ph), (0, pw)),
                        constant_values=-jnp.inf)
        return jax.lax.reduce_window(x, -jnp.inf, jax.lax.max,
                                     (1, 1, 2, 2), (1, 1, 2, 2), "VALID")

    x = conv(x_nchw, params["w0"], params["b0"], 2)
    x = conv(x, params["w1"], params["b1"], 1); x = pool(x)
    x = conv(x, params["w2"], params["b2"], 1); x = pool(x)
    x = conv(x, params["w3"], params["b3"], 1); x = pool(x)
    x = x.reshape(x.shape[0], -1)                      # PyTorch out.view(N,-1) (NCHW)
    x = jnp.dot(x, params["fw1"], precision=hi) + params["fb1"]
    x = jnp.dot(x, params["fw2"], precision=hi) + params["fb2"]
    return jnp.maximum(x, 0.0)


if __name__ == "__main__":
    batch, channels, width = 2, 4, 16   # opt.channels=4, opt.width=16
    key = jax.random.PRNGKey(0)
    kx, kp = jax.random.split(key)
    x = jax.random.normal(kx, (batch, channels, width, width), jnp.float32)
    params = init_params(kp, channels, width)

    out = jax.jit(cnnu_forward)(x, params)
    out = jax.block_until_ready(out)

    assert out.shape == (batch, 1), out.shape
    assert out.dtype == jnp.float32
    assert bool(jnp.all(out >= 0.0))                      # final ReLU

    ref = _ref_forward(x, params)
    assert bool(jnp.allclose(out, ref, rtol=5e-2, atol=5e-2)), (out, ref)
    print("KERNEL_OK")
</pallas_src>

<mosaic_0001>
module attributes {stable_mosaic.version = 11 : i64} {
  func.func @_cnnu_kernel(%arg0: i32, %arg1: memref<1x16x16x4xf32, #tpu.memory_space<vmem>>, %arg2: memref<36x32xbf16, #tpu.memory_space<vmem>>, %arg3: memref<3x288x32xbf16, #tpu.memory_space<vmem>>, %arg4: memref<6x32xf32, #tpu.memory_space<vmem>>, %arg5: memref<32x32xf32, #tpu.memory_space<vmem>>, %arg6: memref<32x1xf32, #tpu.memory_space<vmem>>, %arg7: memref<1x1x1xf32, #tpu.memory_space<vmem>>, %arg8: memref<1x18x18x4xf32, #tpu.memory_space<vmem>>, %arg9: memref<1x10x10x32xf32, #tpu.memory_space<vmem>>, %arg10: memref<1x6x6x32xf32, #tpu.memory_space<vmem>>, %arg11: memref<1x4x4x32xf32, #tpu.memory_space<vmem>>, %arg12: memref<1x8x8x32xf32, #tpu.memory_space<vmem>>, %arg13: memref<1x4x4x32xf32, #tpu.memory_space<vmem>>, %arg14: memref<1x2x2x32xf32, #tpu.memory_space<vmem>>, %arg15: memref<64x288xf32, #tpu.memory_space<vmem>>) attributes {dimension_semantics = [#tpu.dimension_semantics<parallel>], iteration_bounds = array<i64: 2>, scalar_prefetch = 0 : i64, scratch_operands = 8 : i64, tpu.core_type = #tpu.core_type<tc>, window_params = [{transform_indices = @transform_0, window_bounds = array<i64: 1, 16, 16, 4>}, {pipeline_mode = #tpu.pipeline_mode<synchronous>, transform_indices = @transform_1, window_bounds = array<i64: 36, 32>}, {pipeline_mode = #tpu.pipeline_mode<synchronous>, transform_indices = @transform_2, window_bounds = array<i64: 3, 288, 32>}, {pipeline_mode = #tpu.pipeline_mode<synchronous>, transform_indices = @transform_3, window_bounds = array<i64: 6, 32>}, {pipeline_mode = #tpu.pipeline_mode<synchronous>, transform_indices = @transform_4, window_bounds = array<i64: 32, 32>}, {pipeline_mode = #tpu.pipeline_mode<synchronous>, transform_indices = @transform_5, window_bounds = array<i64: 32, 1>}, {transform_indices = @transform_6, window_bounds = array<i64: 1, 1, 1>}]} {
    %cst = arith.constant 0.000000e+00 : f32
    %0 = vector.broadcast %cst : f32 to vector<1x1x18x4xf32>
    %cst_0 = arith.constant 0.000000e+00 : f32
    %1 = vector.broadcast %cst_0 : f32 to vector<1x18x1x4xf32>
    %c0 = arith.constant 0 : index
    %c0_1 = arith.constant 0 : index
    %c0_2 = arith.constant 0 : index
    %c0_3 = arith.constant 0 : index
    %2 = vector.load %arg8[%c0, %c0_1, %c0_2, %c0_3] : memref<1x18x18x4xf32, #tpu.memory_space<vmem>>, vector<1x1x18x4xf32>
    tpu.vector_store %arg8[%c0, %c0_1, %c0_2, %c0_3], %0 {strides = array<i32>} : memref<1x18x18x4xf32, #tpu.memory_space<vmem>>, vector<1x1x18x4xf32>,
    %c0_4 = arith.constant 0 : index
    %c17 = arith.constant 17 : index
    %c0_5 = arith.constant 0 : index
    %c0_6 = arith.constant 0 : index
    %3 = vector.load %arg8[%c0_4, %c17, %c0_5, %c0_6] : memref<1x18x18x4xf32, #tpu.memory_space<vmem>>, vector<1x1x18x4xf32>
    tpu.vector_store %arg8[%c0_4, %c17, %c0_5, %c0_6], %0 {strides = array<i32>} : memref<1x18x18x4xf32, #tpu.memory_space<vmem>>, vector<1x1x18x4xf32>,
    %c0_7 = arith.constant 0 : index
    %c0_8 = arith.constant 0 : index
    %c0_9 = arith.constant 0 : index
    %c0_10 = arith.constant 0 : index
    %4 = vector.load %arg8[%c0_7, %c0_8, %c0_9, %c0_10] : memref<1x18x18x4xf32, #tpu.memory_space<vmem>>, vector<1x18x1x4xf32>
    tpu.vector_store %arg8[%c0_7, %c0_8, %c0_9, %c0_10], %1 {strides = array<i32>} : memref<1x18x18x4xf32, #tpu.memory_space<vmem>>, vector<1x18x1x4xf32>,
    %c0_11 = arith.constant 0 : index
    %c0_12 = arith.constant 0 : index
    %c17_13 = arith.constant 17 : index
    %c0_14 = arith.constant 0 : index
    %5 = vector.load %arg8[%c0_11, %c0_12, %c17_13, %c0_14] : memref<1x18x18x4xf32, #tpu.memory_space<vmem>>, vector<1x18x1x4xf32>
    tpu.vector_store %arg8[%c0_11, %c0_12, %c17_13, %c0_14], %1 {strides = array<i32>} : memref<1x18x18x4xf32, #tpu.memory_space<vmem>>, vector<1x18x1x4xf32>,
    %cst_15 = arith.constant 0.000000e+00 : f32
    %6 = vector.broadcast %cst_15 : f32 to vector<1x1x10x32xf32>
    %cst_16 = arith.constant 0.000000e+00 : f32
    %7 = vector.broadcast %cst_16 : f32 to vector<1x10x1x32xf32>
    %c0_17 = arith.constant 0 : index
    %c0_18 = arith.constant 0 : index
    %c0_19 = arith.constant 0 : index
    %c0_20 = arith.constant 0 : index
    %8 = vector.load %arg9[%c0_17, %c0_18, %c0_19, %c0_20] : memref<1x10x10x32xf32, #tpu.memory_space<vmem>>, vector<1x1x10x32xf32>
    tpu.vector_store %arg9[%c0_17, %c0_18, %c0_19, %c0_20], %6 {strides = array<i32>} : memref<1x10x10x32xf32, #tpu.memory_space<vmem>>, vector<1x1x10x32xf32>,
    %c0_21 = arith.constant 0 : index
    %c9 = arith.constant 9 : index
    %c0_22 = arith.constant 0 : index
    %c0_23 = arith.constant 0 : index
    %9 = vector.load %arg9[%c0_21, %c9, %c0_22, %c0_23] : memref<1x10x10x32xf32, #tpu.memory_space<vmem>>, vector<1x1x10x32xf32>
    tpu.vector_store %arg9[%c0_21, %c9, %c0_22, %c0_23], %6 {strides = array<i32>} : memref<1x10x10x32xf32, #tpu.memory_space<vmem>>, vector<1x1x10x32xf32>,
    %c0_24 = arith.constant 0 : index
    %c0_25 = arith.constant 0 : index
    %c0_26 = arith.constant 0 : index
    %c0_27 = arith.constant 0 : index
    %10 = vector.load %arg9[%c0_24, %c0_25, %c0_26, %c0_27] : memref<1x10x10x32xf32, #tpu.memory_space<vmem>>, vector<1x10x1x32xf32>
    tpu.vector_store %arg9[%c0_24, %c0_25, %c0_26, %c0_27], %7 {strides = array<i32>} : memref<1x10x10x32xf32, #tpu.memory_space<vmem>>, vector<1x10x1x32xf32>,
    %c0_28 = arith.constant 0 : index
    %c0_29 = arith.constant 0 : index
    %c9_30 = arith.constant 9 : index
    %c0_31 = arith.constant 0 : index
    %11 = vector.load %arg9[%c0_28, %c0_29, %c9_30, %c0_31] : memref<1x10x10x32xf32, #tpu.memory_space<vmem>>, vector<1x10x1x32xf32>
    tpu.vector_store %arg9[%c0_28, %c0_29, %c9_30, %c0_31], %7 {strides = array<i32>} : memref<1x10x10x32xf32, #tpu.memory_space<vmem>>, vector<1x10x1x32xf32>,
    %cst_32 = arith.constant 0.000000e+00 : f32
    %12 = vector.broadcast %cst_32 : f32 to vector<1x1x6x32xf32>
    %cst_33 = arith.constant 0.000000e+00 : f32
    %13 = vector.broadcast %cst_33 : f32 to vector<1x6x1x32xf32>
    %c0_34 = arith.constant 0 : index
    %c0_35 = arith.constant 0 : index
    %c0_36 = arith.constant 0 : index
    %c0_37 = arith.constant 0 : index
    %14 = vector.load %arg10[%c0_34, %c0_35, %c0_36, %c0_37] : memref<1x6x6x32xf32, #tpu.memory_space<vmem>>, vector<1x1x6x32xf32>
    tpu.vector_store %arg10[%c0_34, %c0_35, %c0_36, %c0_37], %12 {strides = array<i32>} : memref<1x6x6x32xf32, #tpu.memory_space<vmem>>, vector<1x1x6x32xf32>,
    %c0_38 = arith.constant 0 : index
    %c5 = arith.constant 5 : index
    %c0_39 = arith.constant 0 : index
    %c0_40 = arith.constant 0 : index
    %15 = vector.load %arg10[%c0_38, %c5, %c0_39, %c0_40] : memref<1x6x6x32xf32, #tpu.memory_space<vmem>>, vector<1x1x6x32xf32>
    tpu.vector_store %arg10[%c0_38, %c5, %c0_39, %c0_40], %12 {strides = array<i32>} : memref<1x6x6x32xf32, #tpu.memory_space<vmem>>, vector<1x1x6x32xf32>,
    %c0_41 = arith.constant 0 : index
    %c0_42 = arith.constant 0 : index
    %c0_43 = arith.constant 0 : index
    %c0_44 = arith.constant 0 : index
    %16 = vector.load %arg10[%c0_41, %c0_42, %c0_43, %c0_44] : memref<1x6x6x32xf32, #tpu.memory_space<vmem>>, vector<1x6x1x32xf32>
    tpu.vector_store %arg10[%c0_41, %c0_42, %c0_43, %c0_44], %13 {strides = array<i32>} : memref<1x6x6x32xf32, #tpu.memory_space<vmem>>, vector<1x6x1x32xf32>,
    %c0_45 = arith.constant 0 : index
    %c0_46 = arith.constant 0 : index
    %c5_47 = arith.constant 5 : index
    %c0_48 = arith.constant 0 : index
    %17 = vector.load %arg10[%c0_45, %c0_46, %c5_47, %c0_48] : memref<1x6x6x32xf32, #tpu.memory_space<vmem>>, vector<1x6x1x32xf32>
    tpu.vector_store %arg10[%c0_45, %c0_46, %c5_47, %c0_48], %13 {strides = array<i32>} : memref<1x6x6x32xf32, #tpu.memory_space<vmem>>, vector<1x6x1x32xf32>,
    %cst_49 = arith.constant 0.000000e+00 : f32
    %18 = vector.broadcast %cst_49 : f32 to vector<1x1x4x32xf32>
    %cst_50 = arith.constant 0.000000e+00 : f32
    %19 = vector.broadcast %cst_50 : f32 to vector<1x4x1x32xf32>
    %c0_51 = arith.constant 0 : index
    %c0_52 = arith.constant 0 : index
    %c0_53 = arith.constant 0 : index
    %c0_54 = arith.constant 0 : index
    %20 = vector.load %arg11[%c0_51, %c0_52, %c0_53, %c0_54] : memref<1x4x4x32xf32, #tpu.memory_space<vmem>>, vector<1x1x4x32xf32>
    tpu.vector_store %arg11[%c0_51, %c0_52, %c0_53, %c0_54], %18 {strides = array<i32>} : memref<1x4x4x32xf32, #tpu.memory_space<vmem>>, vector<1x1x4x32xf32>,
    %c0_55 = arith.constant 0 : index
    %c3 = arith.constant 3 : index
    %c0_56 = arith.constant 0 : index
    %c0_57 = arith.constant 0 : index
    %21 = vector.load %arg11[%c0_55, %c3, %c0_56, %c0_57] : memref<1x4x4x32xf32, #tpu.memory_space<vmem>>, vector<1x1x4x32xf32>
    tpu.vector_store %arg11[%c0_55, %c3, %c0_56, %c0_57], %18 {strides = array<i32>} : memref<1x4x4x32xf32, #tpu.memory_space<vmem>>, vector<1x1x4x32xf32>,
    %c0_58 = arith.constant 0 : index
    %c0_59 = arith.constant 0 : index
    %c0_60 = arith.constant 0 : index
    %c0_61 = arith.constant 0 : index
    %22 = vector.load %arg11[%c0_58, %c0_59, %c0_60, %c0_61] : memref<1x4x4x32xf32, #tpu.memory_space<vmem>>, vector<1x4x1x32xf32>
    tpu.vector_store %arg11[%c0_58, %c0_59, %c0_60, %c0_61], %19 {strides = array<i32>} : memref<1x4x4x32xf32, #tpu.memory_space<vmem>>, vector<1x4x1x32xf32>,
    %c0_62 = arith.constant 0 : index
    %c0_63 = arith.constant 0 : index
    %c3_64 = arith.constant 3 : index
    %c0_65 = arith.constant 0 : index
    %23 = vector.load %arg11[%c0_62, %c0_63, %c3_64, %c0_65] : memref<1x4x4x32xf32, #tpu.memory_space<vmem>>, vector<1x4x1x32xf32>
    tpu.vector_store %arg11[%c0_62, %c0_63, %c3_64, %c0_65], %19 {strides = array<i32>} : memref<1x4x4x32xf32, #tpu.memory_space<vmem>>, vector<1x4x1x32xf32>,
    %c0_66 = arith.constant 0 : index
    %c0_67 = arith.constant 0 : index
    %c0_68 = arith.constant 0 : index
    %c0_69 = arith.constant 0 : index
    %24 = vector.load %arg1[%c0_66, %c0_67, %c0_68, %c0_69] : memref<1x16x16x4xf32, #tpu.memory_space<vmem>>, vector<1x16x16x4xf32>
    %c0_70 = arith.constant 0 : index
    %c1 = arith.constant 1 : index
    %c1_71 = arith.constant 1 : index
    %c0_72 = arith.constant 0 : index
    %25 = vector.load %arg8[%c0_70, %c1, %c1_71, %c0_72] : memref<1x18x18x4xf32, #tpu.memory_space<vmem>>, vector<1x16x16x4xf32>
    tpu.vector_store %arg8[%c0_70, %c1, %c1_71, %c0_72], %24 {strides = array<i32>} : memref<1x18x18x4xf32, #tpu.memory_space<vmem>>, vector<1x16x16x4xf32>,
    %c0_73 = arith.constant 0 : index
    %c0_74 = arith.constant 0 : index
    %26 = vector.load %arg2[%c0_73, %c0_74] : memref<36x32xbf16, #tpu.memory_space<vmem>>, vector<36x32xbf16>
    %c0_75 = arith.constant 0 : index
    %c0_76 = arith.constant 0 : index
    %27 = vector.load %arg4[%c0_75, %c0_76] : memref<6x32xf32, #tpu.memory_space<vmem>>, vector<1x32xf32>
    %c0_77 = arith.constant 0 : index
    %c0_78 = arith.constant 0 : index
    %c0_79 = arith.constant 0 : index
    %c0_80 = arith.constant 0 : index
    %28 = tpu.strided_load %arg8[%c0_77, %c0_78, %c0_79, %c0_80] {strides = array<i32: 1, 2, 2, 1>} : memref<1x18x18x4xf32, #tpu.memory_space<vmem>>, vector<1x8x8x4xf32>
    %29 = vector.shape_cast %28 : vector<1x8x8x4xf32> to vector<64x4xf32>
    %c0_81 = arith.constant 0 : index
    %c0_82 = arith.constant 0 : index
    %30 = vector.load %arg15[%c0_81, %c0_82] : memref<64x288xf32, #tpu.memory_space<vmem>>, vector<64x4xf32>
    tpu.vector_store %arg15[%c0_81, %c0_82], %29 {strides = array<i32>} : memref<64x288xf32, #tpu.memory_space<vmem>>, vector<64x4xf32>,
    %c0_83 = arith.constant 0 : index
    %c0_84 = arith.constant 0 : index
    %c1_85 = arith.constant 1 : index
    %c0_86 = arith.constant 0 : index
    %31 = tpu.strided_load %arg8[%c0_83, %c0_84, %c1_85, %c0_86] {strides = array<i32: 1, 2, 2, 1>} : memref<1x18x18x4xf32, #tpu.memory_space<vmem>>, vector<1x8x8x4xf32>
    %32 = vector.shape_cast %31 : vector<1x8x8x4xf32> to vector<64x4xf32>
    %c0_87 = arith.constant 0 : index
    %c4 = arith.constant 4 : index
    %33 = vector.load %arg15[%c0_87, %c4] : memref<64x288xf32, #tpu.memory_space<vmem>>, vector<64x4xf32>
    tpu.vector_store %arg15[%c0_87, %c4], %32 {strides = array<i32>} : memref<64x288xf32, #tpu.memory_space<vmem>>, vector<64x4xf32>,
    %c0_88 = arith.constant 0 : index
    %c0_89 = arith.constant 0 : index
    %c2 = arith.constant 2 : index
    %c0_90 = arith.constant 0 : index
    %34 = tpu.strided_load %arg8[%c0_88, %c0_89, %c2, %c0_90] {strides = array<i32: 1, 2, 2, 1>} : memref<1x18x18x4xf32, #tpu.memory_space<vmem>>, vector<1x8x8x4xf32>
    %35 = vector.shape_cast %34 : vector<1x8x8x4xf32> to vector<64x4xf32>
    %c0_91 = arith.constant 0 : index
    %c8 = arith.constant 8 : index
    %36 = vector.load %arg15[%c0_91, %c8] : memref<64x288xf32, #tpu.memory_space<vmem>>, vector<64x4xf32>
    tpu.vector_store %arg15[%c0_91, %c8], %35 {strides = array<i32>} : memref<64x288xf32, #tpu.memory_space<vmem>>, vector<64x4xf32>,
    %c0_92 = arith.constant 0 : index
    %c1_93 = arith.constant 1 : index
    %c0_94 = arith.constant 0 : index
    %c0_95 = arith.constant 0 : index
    %37 = tpu.strided_load %arg8[%c0_92, %c1_93, %c0_94, %c0_95] {strides = array<i32: 1, 2, 2, 1>} : memref<1x18x18x4xf32, #tpu.memory_space<vmem>>, vector<1x8x8x4xf32>
    %38 = vector.shape_cast %37 : vector<1x8x8x4xf32> to vector<64x4xf32>
    %c0_96 = arith.constant 0 : index
    %c12 = arith.constant 12 : index
    %39 = vector.load %arg15[%c0_96, %c12] : memref<64x288xf32, #tpu.memory_space<vmem>>, vector<64x4xf32>
    tpu.vector_store %arg15[%c0_96, %c12], %38 {strides = array<i32>} : memref<64x288xf32, #tpu.memory_space<vmem>>, vector<64x4xf32>,
    %c0_97 = arith.constant 0 : index
    %c1_98 = arith.constant 1 : index
    %c1_99 = arith.constant 1 : index
    %c0_100 = arith.constant 0 : index
    %40 = tpu.strided_load %arg8[%c0_97, %c1_98, %c1_99, %c0_100] {strides = array<i32: 1, 2, 2, 1>} : memref<1x18x18x4xf32, #tpu.memory_space<vmem>>, vector<1x8x8x4xf32>
    %41 = vector.shape_cast %40 : vector<1x8x8x4xf32> to vector<64x4xf32>
    %c0_101 = arith.constant 0 : index
    %c16 = arith.constant 16 : index
    %42 = vector.load %arg15[%c0_101, %c16] : memref<64x288xf32, #tpu.memory_space<vmem>>, vector<64x4xf32>
    tpu.vector_store %arg15[%c0_101, %c16], %41 {strides = array<i32>} : memref<64x288xf32, #tpu.memory_space<vmem>>, vector<64x4xf32>,
    %c0_102 = arith.constant 0 : index
    %c1_103 = arith.constant 1 : index
    %c2_104 = arith.constant 2 : index
    %c0_105 = arith.constant 0 : index
    %43 = tpu.strided_load %arg8[%c0_102, %c1_103, %c2_104, %c0_105] {strides = array<i32: 1, 2, 2, 1>} : memref<1x18x18x4xf32, #tpu.memory_space<vmem>>, vector<1x8x8x4xf32>
    %44 = vector.shape_cast %43 : vector<1x8x8x4xf32> to vector<64x4xf32>
    %c0_106 = arith.constant 0 : index
    %c20 = arith.constant 20 : index
    %45 = vector.load %arg15[%c0_106, %c20] : memref<64x288xf32, #tpu.memory_space<vmem>>, vector<64x4xf32>
    tpu.vector_store %arg15[%c0_106, %c20], %44 {strides = array<i32>} : memref<64x288xf32, #tpu.memory_space<vmem>>, vector<64x4xf32>,
    %c0_107 = arith.constant 0 : index
    %c2_108 = arith.constant 2 : index
    %c0_109 = arith.constant 0 : index
    %c0_110 = arith.constant 0 : index
    %46 = tpu.strided_load %arg8[%c0_107, %c2_108, %c0_109, %c0_110] {strides = array<i32: 1, 2, 2, 1>} : memref<1x18x18x4xf32, #tpu.memory_space<vmem>>, vector<1x8x8x4xf32>
    %47 = vector.shape_cast %46 : vector<1x8x8x4xf32> to vector<64x4xf32>
    %c0_111 = arith.constant 0 : index
    %c24 = arith.constant 24 : index
    %48 = vector.load %arg15[%c0_111, %c24] : memref<64x288xf32, #tpu.memory_space<vmem>>, vector<64x4xf32>
    tpu.vector_store %arg15[%c0_111, %c24], %47 {strides = array<i32>} : memref<64x288xf32, #tpu.memory_space<vmem>>, vector<64x4xf32>,
    %c0_112 = arith.constant 0 : index
    %c2_113 = arith.constant 2 : index
    %c1_114 = arith.constant 1 : index
    %c0_115 = arith.constant 0 : index
    %49 = tpu.strided_load %arg8[%c0_112, %c2_113, %c1_114, %c0_115] {strides = array<i32: 1, 2, 2, 1>} : memref<1x18x18x4xf32, #tpu.memory_space<vmem>>, vector<1x8x8x4xf32>
    %50 = vector.shape_cast %49 : vector<1x8x8x4xf32> to vector<64x4xf32>
    %c0_116 = arith.constant 0 : index
    %c28 = arith.constant 28 : index
    %51 = vector.load %arg15[%c0_116, %c28] : memref<64x288xf32, #tpu.memory_space<vmem>>, vector<64x4xf32>
    tpu.vector_store %arg15[%c0_116, %c28], %50 {strides = array<i32>} : memref<64x288xf32, #tpu.memory_space<vmem>>, vector<64x4xf32>,
    %c0_117 = arith.constant 0 : index
    %c2_118 = arith.constant 2 : index
    %c2_119 = arith.constant 2 : index
    %c0_120 = arith.constant 0 : index
    %52 = tpu.strided_load %arg8[%c0_117, %c2_118, %c2_119, %c0_120] {strides = array<i32: 1, 2, 2, 1>} : memref<1x18x18x4xf32, #tpu.memory_space<vmem>>, vector<1x8x8x4xf32>
    %53 = vector.shape_cast %52 : vector<1x8x8x4xf32> to vector<64x4xf32>
    %c0_121 = arith.constant 0 : index
    %c32 = arith.constant 32 : index
    %54 = vector.load %arg15[%c0_121, %c32] : memref<64x288xf32, #tpu.memory_space<vmem>>, vector<64x4xf32>
    tpu.vector_store %arg15[%c0_121, %c32], %53 {strides = array<i32>} : memref<64x288xf32, #tpu.memory_space<vmem>>, vector<64x4xf32>,
    %c0_122 = arith.constant 0 : index
    %c0_123 = arith.constant 0 : index
    %55 = vector.load %arg15[%c0_122, %c0_123] : memref<64x288xf32, #tpu.memory_space<vmem>>, vector<64x36xf32>
    %56 = arith.truncf %55 : vector<64x36xf32> to vector<64x36xbf16>
    %cst_124 = arith.constant dense<0.000000e+00> : vector<64x32xf32>
    %57 = tpu.matmul %56, %26, %cst_124 {dimension_numbers = #tpu.dot_dimension_numbers<[1], [0], [0], [1], [0, 0, 1, 1], [], []>} : vector<64x36xbf16>, vector<36x32xbf16>, vector<64x32xf32> -> vector<64x32xf32>
    %58 = vector.broadcast %27 : vector<1x32xf32> to vector<64x32xf32>
    %59 = arith.addf %57, %58 : vector<64x32xf32>
    %cst_125 = arith.constant 5.000000e-02 : f32
    %60 = vector.broadcast %cst_125 : f32 to vector<64x32xf32>
    %61 = arith.mulf %60, %59 : vector<64x32xf32>
    %62 = arith.maximumf %59, %61 : vector<64x32xf32>
    %63 = vector.shape_cast %62 : vector<64x32xf32> to vector<1x8x8x32xf32>
    %c0_126 = arith.constant 0 : index
    %c1_127 = arith.constant 1 : index
    %c1_128 = arith.constant 1 : index
    %c0_129 = arith.constant 0 : index
    %64 = vector.load %arg9[%c0_126, %c1_127, %c1_128, %c0_129] : memref<1x10x10x32xf32, #tpu.memory_space<vmem>>, vector<1x8x8x32xf32>
    tpu.vector_store %arg9[%c0_126, %c1_127, %c1_128, %c0_129], %63 {strides = array<i32>} : memref<1x10x10x32xf32, #tpu.memory_space<vmem>>, vector<1x8x8x32xf32>,
    %c0_130 = arith.constant 0 : index
    %c0_131 = arith.constant 0 : index
    %c0_132 = arith.constant 0 : index
    %65 = vector.load %arg3[%c0_130, %c0_131, %c0_132] : memref<3x288x32xbf16, #tpu.memory_space<vmem>>, vector<1x288x32xbf16>
    %66 = vector.shape_cast %65 : vector<1x288x32xbf16> to vector<288x32xbf16>
    %c1_133 = arith.constant 1 : index
    %c0_134 = arith.constant 0 : index
    %67 = vector.load %arg4[%c1_133, %c0_134] : memref<6x32xf32, #tpu.memory_space<vmem>>, vector<1x32xf32>
    %c0_135 = arith.constant 0 : index
    %c0_136 = arith.constant 0 : index
    %c0_137 = arith.constant 0 : index
    %c0_138 = arith.constant 0 : index
    %68 = vector.load %arg9[%c0_135, %c0_136, %c0_137, %c0_138] : memref<1x10x10x32xf32, #tpu.memory_space<vmem>>, vector<1x8x8x32xf32>
    %69 = vector.shape_cast %68 : vector<1x8x8x32xf32> to vector<64x32xf32>
    %c0_139 = arith.constant 0 : index
    %c0_140 = arith.constant 0 : index
    %70 = vector.load %arg15[%c0_139, %c0_140] : memref<64x288xf32, #tpu.memory_space<vmem>>, vector<64x32xf32>
    tpu.vector_store %arg15[%c0_139, %c0_140], %69 {strides = array<i32>} : memref<64x288xf32, #tpu.memory_space<vmem>>, vector<64x32xf32>,
    %c0_141 = arith.constant 0 : index
    %c0_142 = arith.constant 0 : index
    %c1_143 = arith.constant 1 : index
    %c0_144 = arith.constant 0 : index
    %71 = vector.load %arg9[%c0_141, %c0_142, %c1_143, %c0_144] : memref<1x10x10x32xf32, #tpu.memory_space<vmem>>, vector<1x8x8x32xf32>
    %72 = vector.shape_cast %71 : vector<1x8x8x32xf32> to vector<64x32xf32>
    %c0_145 = arith.constant 0 : index
    %c32_146 = arith.constant 32 : index
    %73 = vector.load %arg15[%c0_145, %c32_146] : memref<64x288xf32, #tpu.memory_space<vmem>>, vector<64x32xf32>
    tpu.vector_store %arg15[%c0_145, %c32_146], %72 {strides = array<i32>} : memref<64x288xf32, #tpu.memory_space<vmem>>, vector<64x32xf32>,
    %c0_147 = arith.constant 0 : index
    %c0_148 = arith.constant 0 : index
    %c2_149 = arith.constant 2 : index
    %c0_150 = arith.constant 0 : index
    %74 = vector.load %arg9[%c0_147, %c0_148, %c2_149, %c0_150] : memref<1x10x10x32xf32, #tpu.memory_space<vmem>>, vector<1x8x8x32xf32>
    %75 = vector.shape_cast %74 : vector<1x8x8x32xf32> to vector<64x32xf32>
    %c0_151 = arith.constant 0 : index
    %c64 = arith.constant 64 : index
    %76 = vector.load %arg15[%c0_151, %c64] : memref<64x288xf32, #tpu.memory_space<vmem>>, vector<64x32xf32>
    tpu.vector_store %arg15[%c0_151, %c64], %75 {strides = array<i32>} : memref<64x288xf32, #tpu.memory_space<vmem>>, vector<64x32xf32>,
    %c0_152 = arith.constant 0 : index
    %c1_153 = arith.constant 1 : index
    %c0_154 = arith.constant 0 : index
    %c0_155 = arith.constant 0 : index
    %77 = vector.load %arg9[%c0_152, %c1_153, %c0_154, %c0_155] : memref<1x10x10x32xf32, #tpu.memory_space<vmem>>, vector<1x8x8x32xf32>
    %78 = vector.shape_cast %77 : vector<1x8x8x32xf32> to vector<64x32xf32>
    %c0_156 = arith.constant 0 : index
    %c96 = arith.constant 96 : index
    %79 = vector.load %arg15[%c0_156, %c96] : memref<64x288xf32, #tpu.memory_space<vmem>>, vector<64x32xf32>
    tpu.vector_store %arg15[%c0_156, %c96], %78 {strides = array<i32>} : memref<64x288xf32, #tpu.memory_space<vmem>>, vector<64x32xf32>,
    %c0_157 = arith.constant 0 : index
    %c1_158 = arith.constant 1 : index
    %c1_159 = arith.constant 1 : index
    %c0_160 = arith.constant 0 : index
    %80 = vector.load %arg9[%c0_157, %c1_158, %c1_159, %c0_160] : memref<1x10x10x32xf32, #tpu.memory_space<vmem>>, vector<1x8x8x32xf32>
    %81 = vector.shape_cast %80 : vector<1x8x8x32xf32> to vector<64x32xf32>
    %c0_161 = arith.constant 0 : index
    %c128 = arith.constant 128 : index
    %82 = vector.load %arg15[%c0_161, %c128] : memref<64x288xf32, #tpu.memory_space<vmem>>, vector<64x32xf32>
    tpu.vector_store %arg15[%c0_161, %c128], %81 {strides = array<i32>} : memref<64x288xf32, #tpu.memory_space<vmem>>, vector<64x32xf32>,
    %c0_162 = arith.constant 0 : index
    %c1_163 = arith.constant 1 : index
    %c2_164 = arith.constant 2 : index
    %c0_165 = arith.constant 0 : index
    %83 = vector.load %arg9[%c0_162, %c1_163, %c2_164, %c0_165] : memref<1x10x10x32xf32, #tpu.memory_space<vmem>>, vector<1x8x8x32xf32>
    %84 = vector.shape_cast %83 : vector<1x8x8x32xf32> to vector<64x32xf32>
    %c0_166 = arith.constant 0 : index
    %c160 = arith.constant 160 : index
    %85 = vector.load %arg15[%c0_166, %c160] : memref<64x288xf32, #tpu.memory_space<vmem>>, vector<64x32xf32>
    tpu.vector_store %arg15[%c0_166, %c160], %84 {strides = array<i32>} : memref<64x288xf32, #tpu.memory_space<vmem>>, vector<64x32xf32>,
    %c0_167 = arith.constant 0 : index
    %c2_168 = arith.constant 2 : index
    %c0_169 = arith.constant 0 : index
    %c0_170 = arith.constant 0 : index
    %86 = vector.load %arg9[%c0_167, %c2_168, %c0_169, %c0_170] : memref<1x10x10x32xf32, #tpu.memory_space<vmem>>, vector<1x8x8x32xf32>
    %87 = vector.shape_cast %86 : vector<1x8x8x32xf32> to vector<64x32xf32>
    %c0_171 = arith.constant 0 : index
    %c192 = arith.constant 192 : index
    %88 = vector.load %arg15[%c0_171, %c192] : memref<64x288xf32, #tpu.memory_space<vmem>>, vector<64x32xf32>
    tpu.vector_store %arg15[%c0_171, %c192], %87 {strides = array<i32>} : memref<64x288xf32, #tpu.memory_space<vmem>>, vector<64x32xf32>,
    %c0_172 = arith.constant 0 : index
    %c2_173 = arith.constant 2 : index
    %c1_174 = arith.constant 1 : index
    %c0_175 = arith.constant 0 : index
    %89 = vector.load %arg9[%c0_172, %c2_173, %c1_174, %c0_175] : memref<1x10x10x32xf32, #tpu.memory_space<vmem>>, vector<1x8x8x32xf32>
    %90 = vector.shape_cast %89 : vector<1x8x8x32xf32> to vector<64x32xf32>
    %c0_176 = arith.constant 0 : index
    %c224 = arith.constant 224 : index
    %91 = vector.load %arg15[%c0_176, %c224] : memref<64x288xf32, #tpu.memory_space<vmem>>, vector<64x32xf32>
    tpu.vector_store %arg15[%c0_176, %c224], %90 {strides = array<i32>} : memref<64x288xf32, #tpu.memory_space<vmem>>, vector<64x32xf32>,
    %c0_177 = arith.constant 0 : index
    %c2_178 = arith.constant 2 : index
    %c2_179 = arith.constant 2 : index
    %c0_180 = arith.constant 0 : index
    %92 = vector.load %arg9[%c0_177, %c2_178, %c2_179, %c0_180] : memref<1x10x10x32xf32, #tpu.memory_space<vmem>>, vector<1x8x8x32xf32>
    %93 = vector.shape_cast %92 : vector<1x8x8x32xf32> to vector<64x32xf32>
    %c0_181 = arith.constant 0 : index
    %c256 = arith.constant 256 : index
    %94 = vector.load %arg15[%c0_181, %c256] : memref<64x288xf32, #tpu.memory_space<vmem>>, vector<64x32xf32>
    tpu.vector_store %arg15[%c0_181, %c256], %93 {strides = array<i32>} : memref<64x288xf32, #tpu.memory_space<vmem>>, vector<64x32xf32>,
    %c0_182 = arith.constant 0 : index
    %c0_183 = arith.constant 0 : index
    %95 = vector.load %arg15[%c0_182, %c0_183] : memref<64x288xf32, #tpu.memory_space<vmem>>, vector<64x288xf32>
    %96 = arith.truncf %95 : vector<64x288xf32> to vector<64x288xbf16>
    %cst_184 = arith.constant dense<0.000000e+00> : vector<64x32xf32>
    %97 = tpu.matmul %96, %66, %cst_184 {dimension_numbers = #tpu.dot_dimension_numbers<[1], [0], [0], [1], [0, 0, 1, 1], [], []>} : vector<64x288xbf16>, vector<288x32xbf16>, vector<64x32xf32> -> vector<64x32xf32>
    %98 = vector.broadcast %67 : vector<1x32xf32> to vector<64x32xf32>
    %99 = arith.addf %97, %98 : vector<64x32xf32>
    %cst_185 = arith.constant 5.000000e-02 : f32
    %100 = vector.broadcast %cst_185 : f32 to vector<64x32xf32>
    %101 = arith.mulf %100, %99 : vector<64x32xf32>
    %102 = arith.maximumf %99, %101 : vector<64x32xf32>
    %103 = vector.shape_cast %102 : vector<64x32xf32> to vector<1x8x8x32xf32>
    %c0_186 = arith.constant 0 : index
    %c0_187 = arith.constant 0 : index
    %c0_188 = arith.constant 0 : index
    %c0_189 = arith.constant 0 : index
    %104 = vector.load %arg12[%c0_186, %c0_187, %c0_188, %c0_189] : memref<1x8x8x32xf32, #tpu.memory_space<vmem>>, vector<1x8x8x32xf32>
    tpu.vector_store %arg12[%c0_186, %c0_187, %c0_188, %c0_189], %103 {strides = array<i32>} : memref<1x8x8x32xf32, #tpu.memory_space<vmem>>, vector<1x8x8x32xf32>,
    %c0_190 = arith.constant 0 : index
    %c0_191 = arith.constant 0 : index
    %c0_192 = arith.constant 0 : index
    %c0_193 = arith.constant 0 : index
    %105 = tpu.strided_load %arg12[%c0_190, %c0_191, %c0_192, %c0_193] {strides = array<i32: 1, 2, 2, 1>} : memref<1x8x8x32xf32, #tpu.memory_space<vmem>>, vector<1x4x4x32xf32>
    %c0_194 = arith.constant 0 : index
    %c0_195 = arith.constant 0 : index
    %c1_196 = arith.constant 1 : index
    %c0_197 = arith.constant 0 : index
    %106 = tpu.strided_load %arg12[%c0_194, %c0_195, %c1_196, %c0_197] {strides = array<i32: 1, 2, 2, 1>} : memref<1x8x8x32xf32, #tpu.memory_space<vmem>>, vector<1x4x4x32xf32>
    %c0_198 = arith.constant 0 : index
    %c1_199 = arith.constant 1 : index
    %c0_200 = arith.constant 0 : index
    %c0_201 = arith.constant 0 : index
    %107 = tpu.strided_load %arg12[%c0_198, %c1_199, %c0_200, %c0_201] {strides = array<i32: 1, 2, 2, 1>} : memref<1x8x8x32xf32, #tpu.memory_space<vmem>>, vector<1x4x4x32xf32>
    %c0_202 = arith.constant 0 : index
    %c1_203 = arith.constant 1 : index
    %c1_204 = arith.constant 1 : index
    %c0_205 = arith.constant 0 : index
    %108 = tpu.strided_load %arg12[%c0_202, %c1_203, %c1_204, %c0_205] {strides = array<i32: 1, 2, 2, 1>} : memref<1x8x8x32xf32, #tpu.memory_space<vmem>>, vector<1x4x4x32xf32>
    %109 = arith.maximumf %105, %106 : vector<1x4x4x32xf32>
    %110 = arith.maximumf %107, %108 : vector<1x4x4x32xf32>
    %111 = arith.maximumf %109, %110 : vector<1x4x4x32xf32>
    %c0_206 = arith.constant 0 : index
    %c1_207 = arith.constant 1 : index
    %c1_208 = arith.constant 1 : index
    %c0_209 = arith.constant 0 : index
    %112 = vector.load %arg10[%c0_206, %c1_207, %c1_208, %c0_209] : memref<1x6x6x32xf32, #tpu.memory_space<vmem>>, vector<1x4x4x32xf32>
    tpu.vector_store %arg10[%c0_206, %c1_207, %c1_208, %c0_209], %111 {strides = array<i32>} : memref<1x6x6x32xf32, #tpu.memory_space<vmem>>, vector<1x4x4x32xf32>,
    %c1_210 = arith.constant 1 : index
    %c0_211 = arith.constant 0 : index
    %c0_212 = arith.constant 0 : index
    %113 = vector.load %arg3[%c1_210, %c0_211, %c0_212] : memref<3x288x32xbf16, #tpu.memory_space<vmem>>, vector<1x288x32xbf16>
    %114 = vector.shape_cast %113 : vector<1x288x32xbf16> to vector<288x32xbf16>
    %c2_213 = arith.constant 2 : index
    %c0_214 = arith.constant 0 : index
    %115 = vector.load %arg4[%c2_213, %c0_214] : memref<6x32xf32, #tpu.memory_space<vmem>>, vector<1x32xf32>
    %c0_215 = arith.constant 0 : index
    %c0_216 = arith.constant 0 : index
    %c0_217 = arith.constant 0 : index
    %c0_218 = arith.constant 0 : index
    %116 = vector.load %arg10[%c0_215, %c0_216, %c0_217, %c0_218] : memref<1x6x6x32xf32, #tpu.memory_space<vmem>>, vector<1x4x4x32xf32>
    %117 = vector.shape_cast %116 : vector<1x4x4x32xf32> to vector<16x32xf32>
    %c0_219 = arith.constant 0 : index
    %c0_220 = arith.constant 0 : index
    %118 = vector.load %arg15[%c0_219, %c0_220] : memref<64x288xf32, #tpu.memory_space<vmem>>, vector<16x32xf32>
    tpu.vector_store %arg15[%c0_219, %c0_220], %117 {strides = array<i32>} : memref<64x288xf32, #tpu.memory_space<vmem>>, vector<16x32xf32>,
    %c0_221 = arith.constant 0 : index
    %c0_222 = arith.constant 0 : index
    %c1_223 = arith.constant 1 : index
    %c0_224 = arith.constant 0 : index
    %119 = vector.load %arg10[%c0_221, %c0_222, %c1_223, %c0_224] : memref<1x6x6x32xf32, #tpu.memory_space<vmem>>, vector<1x4x4x32xf32>
    %120 = vector.shape_cast %119 : vector<1x4x4x32xf32> to vector<16x32xf32>
    %c0_225 = arith.constant 0 : index
    %c32_226 = arith.constant 32 : index
    %121 = vector.load %arg15[%c0_225, %c32_226] : memref<64x288xf32, #tpu.memory_space<vmem>>, vector<16x32xf32>
    tpu.vector_store %arg15[%c0_225, %c32_226], %120 {strides = array<i32>} : memref<64x288xf32, #tpu.memory_space<vmem>>, vector<16x32xf32>,
    %c0_227 = arith.constant 0 : index
    %c0_228 = arith.constant 0 : index
    %c2_229 = arith.constant 2 : index
    %c0_230 = arith.constant 0 : index
    %122 = vector.load %arg10[%c0_227, %c0_228, %c2_229, %c0_230] : memref<1x6x6x32xf32, #tpu.memory_space<vmem>>, vector<1x4x4x32xf32>
    %123 = vector.shape_cast %122 : vector<1x4x4x32xf32> to vector<16x32xf32>
    %c0_231 = arith.constant 0 : index
    %c64_232 = arith.constant 64 : index
    %124 = vector.load %arg15[%c0_231, %c64_232] : memref<64x288xf32, #tpu.memory_space<vmem>>, vector<16x32xf32>
    tpu.vector_store %arg15[%c0_231, %c64_232], %123 {strides = array<i32>} : memref<64x288xf32, #tpu.memory_space<vmem>>, vector<16x32xf32>,
    %c0_233 = arith.constant 0 : index
    %c1_234 = arith.constant 1 : index
    %c0_235 = arith.constant 0 : index
    %c0_236 = arith.constant 0 : index
    %125 = vector.load %arg10[%c0_233, %c1_234, %c0_235, %c0_236] : memref<1x6x6x32xf32, #tpu.memory_space<vmem>>, vector<1x4x4x32xf32>
    %126 = vector.shape_cast %125 : vector<1x4x4x32xf32> to vector<16x32xf32>
    %c0_237 = arith.constant 0 : index
    %c96_238 = arith.constant 96 : index
    %127 = vector.load %arg15[%c0_237, %c96_238] : memref<64x288xf32, #tpu.memory_space<vmem>>, vector<16x32xf32>
    tpu.vector_store %arg15[%c0_237, %c96_238], %126 {strides = array<i32>} : memref<64x288xf32, #tpu.memory_space<vmem>>, vector<16x32xf32>,
    %c0_239 = arith.constant 0 : index
    %c1_240 = arith.constant 1 : index
    %c1_241 = arith.constant 1 : index
    %c0_242 = arith.constant 0 : index
    %128 = vector.load %arg10[%c0_239, %c1_240, %c1_241, %c0_242] : memref<1x6x6x32xf32, #tpu.memory_space<vmem>>, vector<1x4x4x32xf32>
    %129 = vector.shape_cast %128 : vector<1x4x4x32xf32> to vector<16x32xf32>
    %c0_243 = arith.constant 0 : index
    %c128_244 = arith.constant 128 : index
    %130 = vector.load %arg15[%c0_243, %c128_244] : memref<64x288xf32, #tpu.memory_space<vmem>>, vector<16x32xf32>
    tpu.vector_store %arg15[%c0_243, %c128_244], %129 {strides = array<i32>} : memref<64x288xf32, #tpu.memory_space<vmem>>, vector<16x32xf32>,
    %c0_245 = arith.constant 0 : index
    %c1_246 = arith.constant 1 : index
    %c2_247 = arith.constant 2 : index
    %c0_248 = arith.constant 0 : index
    %131 = vector.load %arg10[%c0_245, %c1_246, %c2_247, %c0_248] : memref<1x6x6x32xf32, #tpu.memory_space<vmem>>, vector<1x4x4x32xf32>
    %132 = vector.shape_cast %131 : vector<1x4x4x32xf32> to vector<16x32xf32>
    %c0_249 = arith.constant 0 : index
    %c160_250 = arith.constant 160 : index
    %133 = vector.load %arg15[%c0_249, %c160_250] : memref<64x288xf32, #tpu.memory_space<vmem>>, vector<16x32xf32>
    tpu.vector_store %arg15[%c0_249, %c160_250], %132 {strides = array<i32>} : memref<64x288xf32, #tpu.memory_space<vmem>>, vector<16x32xf32>,
    %c0_251 = arith.constant 0 : index
    %c2_252 = arith.constant 2 : index
    %c0_253 = arith.constant 0 : index
    %c0_254 = arith.constant 0 : index
    %134 = vector.load %arg10[%c0_251, %c2_252, %c0_253, %c0_254] : memref<1x6x6x32xf32, #tpu.memory_space<vmem>>, vector<1x4x4x32xf32>
    %135 = vector.shape_cast %134 : vector<1x4x4x32xf32> to vector<16x32xf32>
    %c0_255 = arith.constant 0 : index
    %c192_256 = arith.constant 192 : index
    %136 = vector.load %arg15[%c0_255, %c192_256] : memref<64x288xf32, #tpu.memory_space<vmem>>, vector<16x32xf32>
    tpu.vector_store %arg15[%c0_255, %c192_256], %135 {strides = array<i32>} : memref<64x288xf32, #tpu.memory_space<vmem>>, vector<16x32xf32>,
    %c0_257 = arith.constant 0 : index
    %c2_258 = arith.constant 2 : index
    %c1_259 = arith.constant 1 : index
    %c0_260 = arith.constant 0 : index
    %137 = vector.load %arg10[%c0_257, %c2_258, %c1_259, %c0_260] : memref<1x6x6x32xf32, #tpu.memory_space<vmem>>, vector<1x4x4x32xf32>
    %138 = vector.shape_cast %137 : vector<1x4x4x32xf32> to vector<16x32xf32>
    %c0_261 = arith.constant 0 : index
    %c224_262 = arith.constant 224 : index
    %139 = vector.load %arg15[%c0_261, %c224_262] : memref<64x288xf32, #tpu.memory_space<vmem>>, vector<16x32xf32>
    tpu.vector_store %arg15[%c0_261, %c224_262], %138 {strides = array<i32>} : memref<64x288xf32, #tpu.memory_space<vmem>>, vector<16x32xf32>,
    %c0_263 = arith.constant 0 : index
    %c2_264 = arith.constant 2 : index
    %c2_265 = arith.constant 2 : index
    %c0_266 = arith.constant 0 : index
    %140 = vector.load %arg10[%c0_263, %c2_264, %c2_265, %c0_266] : memref<1x6x6x32xf32, #tpu.memory_space<vmem>>, vector<1x4x4x32xf32>
    %141 = vector.shape_cast %140 : vector<1x4x4x32xf32> to vector<16x32xf32>
    %c0_267 = arith.constant 0 : index
    %c256_268 = arith.constant 256 : index
    %142 = vector.load %arg15[%c0_267, %c256_268] : memref<64x288xf32, #tpu.memory_space<vmem>>, vector<16x32xf32>
    tpu.vector_store %arg15[%c0_267, %c256_268], %141 {strides = array<i32>} : memref<64x288xf32, #tpu.memory_space<vmem>>, vector<16x32xf32>,
    %c0_269 = arith.constant 0 : index
    %c0_270 = arith.constant 0 : index
    %143 = vector.load %arg15[%c0_269, %c0_270] : memref<64x288xf32, #tpu.memory_space<vmem>>, vector<16x288xf32>
    %144 = arith.truncf %143 : vector<16x288xf32> to vector<16x288xbf16>
    %cst_271 = arith.constant dense<0.000000e+00> : vector<16x32xf32>
    %145 = tpu.matmul %144, %114, %cst_271 {dimension_numbers = #tpu.dot_dimension_numbers<[1], [0], [0], [1], [0, 0, 1, 1], [], []>} : vector<16x288xbf16>, vector<288x32xbf16>, vector<16x32xf32> -> vector<16x32xf32>
    %146 = vector.broadcast %115 : vector<1x32xf32> to vector<16x32xf32>
    %147 = arith.addf %145, %146 : vector<16x32xf32>
    %cst_272 = arith.constant 5.000000e-02 : f32
    %148 = vector.broadcast %cst_272 : f32 to vector<16x32xf32>
    %149 = arith.mulf %148, %147 : vector<16x32xf32>
    %150 = arith.maximumf %147, %149 : vector<16x32xf32>
    %151 = vector.shape_cast %150 : vector<16x32xf32> to vector<1x4x4x32xf32>
    %c0_273 = arith.constant 0 : index
    %c0_274 = arith.constant 0 : index
    %c0_275 = arith.constant 0 : index
    %c0_276 = arith.constant 0 : index
    %152 = vector.load %arg13[%c0_273, %c0_274, %c0_275, %c0_276] : memref<1x4x4x32xf32, #tpu.memory_space<vmem>>, vector<1x4x4x32xf32>
    tpu.vector_store %arg13[%c0_273, %c0_274, %c0_275, %c0_276], %151 {strides = array<i32>} : memref<1x4x4x32xf32, #tpu.memory_space<vmem>>, vector<1x4x4x32xf32>,
    %c0_277 = arith.constant 0 : index
    %c0_278 = arith.constant 0 : index
    %c0_279 = arith.constant 0 : index
    %c0_280 = arith.constant 0 : index
    %153 = tpu.strided_load %arg13[%c0_277, %c0_278, %c0_279, %c0_280] {strides = array<i32: 1, 2, 2, 1>} : memref<1x4x4x32xf32, #tpu.memory_space<vmem>>, vector<1x2x2x32xf32>
    %c0_281 = arith.constant 0 : index
    %c0_282 = arith.constant 0 : index
    %c1_283 = arith.constant 1 : index
    %c0_284 = arith.constant 0 : index
    %154 = tpu.strided_load %arg13[%c0_281, %c0_282, %c1_283, %c0_284] {strides = array<i32: 1, 2, 2, 1>} : memref<1x4x4x32xf32, #tpu.memory_space<vmem>>, vector<1x2x2x32xf32>
    %c0_285 = arith.constant 0 : index
    %c1_286 = arith.constant 1 : index
    %c0_287 = arith.constant 0 : index
    %c0_288 = arith.constant 0 : index
    %155 = tpu.strided_load %arg13[%c0_285, %c1_286, %c0_287, %c0_288] {strides = array<i32: 1, 2, 2, 1>} : memref<1x4x4x32xf32, #tpu.memory_space<vmem>>, vector<1x2x2x32xf32>
    %c0_289 = arith.constant 0 : index
    %c1_290 = arith.constant 1 : index
    %c1_291 = arith.constant 1 : index
    %c0_292 = arith.constant 0 : index
    %156 = tpu.strided_load %arg13[%c0_289, %c1_290, %c1_291, %c0_292] {strides = array<i32: 1, 2, 2, 1>} : memref<1x4x4x32xf32, #tpu.memory_space<vmem>>, vector<1x2x2x32xf32>
    %157 = arith.maximumf %153, %154 : vector<1x2x2x32xf32>
    %158 = arith.maximumf %155, %156 : vector<1x2x2x32xf32>
    %159 = arith.maximumf %157, %158 : vector<1x2x2x32xf32>
    %c0_293 = arith.constant 0 : index
    %c1_294 = arith.constant 1 : index
    %c1_295 = arith.constant 1 : index
    %c0_296 = arith.constant 0 : index
    %160 = vector.load %arg11[%c0_293, %c1_294, %c1_295, %c0_296] : memref<1x4x4x32xf32, #tpu.memory_space<vmem>>, vector<1x2x2x32xf32>
    tpu.vector_store %arg11[%c0_293, %c1_294, %c1_295, %c0_296], %159 {strides = array<i32>} : memref<1x4x4x32xf32, #tpu.memory_space<vmem>>, vector<1x2x2x32xf32>,
    %c2_297 = arith.constant 2 : index
    %c0_298 = arith.constant 0 : index
    %c0_299 = arith.constant 0 : index
    %161 = vector.load %arg3[%c2_297, %c0_298, %c0_299] : memref<3x288x32xbf16, #tpu.memory_space<vmem>>, vector<1x288x32xbf16>
    %162 = vector.shape_cast %161 : vector<1x288x32xbf16> to vector<288x32xbf16>
    %c3_300 = arith.constant 3 : index
    %c0_301 = arith.constant 0 : index
    %163 = vector.load %arg4[%c3_300, %c0_301] : memref<6x32xf32, #tpu.memory_space<vmem>>, vector<1x32xf32>
    %c0_302 = arith.constant 0 : index
    %c0_303 = arith.constant 0 : index
    %c0_304 = arith.constant 0 : index
    %c0_305 = arith.constant 0 : index
    %164 = vector.load %arg11[%c0_302, %c0_303, %c0_304, %c0_305] : memref<1x4x4x32xf32, #tpu.memory_space<vmem>>, vector<1x2x2x32xf32>
    %165 = vector.shape_cast %164 : vector<1x2x2x32xf32> to vector<4x32xf32>
    %c0_306 = arith.constant 0 : index
    %c0_307 = arith.constant 0 : index
    %166 = vector.load %arg15[%c0_306, %c0_307] : memref<64x288xf32, #tpu.memory_space<vmem>>, vector<4x32xf32>
    tpu.vector_store %arg15[%c0_306, %c0_307], %165 {strides = array<i32>} : memref<64x288xf32, #tpu.memory_space<vmem>>, vector<4x32xf32>,
    %c0_308 = arith.constant 0 : index
    %c0_309 = arith.constant 0 : index
    %c1_310 = arith.constant 1 : index
    %c0_311 = arith.constant 0 : index
    %167 = vector.load %arg11[%c0_308, %c0_309, %c1_310, %c0_311] : memref<1x4x4x32xf32, #tpu.memory_space<vmem>>, vector<1x2x2x32xf32>
    %168 = vector.shape_cast %167 : vector<1x2x2x32xf32> to vector<4x32xf32>
    %c0_312 = arith.constant 0 : index
    %c32_313 = arith.constant 32 : index
    %169 = vector.load %arg15[%c0_312, %c32_313] : memref<64x288xf32, #tpu.memory_space<vmem>>, vector<4x32xf32>
    tpu.vector_store %arg15[%c0_312, %c32_313], %168 {strides = array<i32>} : memref<64x288xf32, #tpu.memory_space<vmem>>, vector<4x32xf32>,
    %c0_314 = arith.constant 0 : index
    %c0_315 = arith.constant 0 : index
    %c2_316 = arith.constant 2 : index
    %c0_317 = arith.constant 0 : index
    %170 = vector.load %arg11[%c0_314, %c0_315, %c2_316, %c0_317] : memref<1x4x4x32xf32, #tpu.memory_space<vmem>>, vector<1x2x2x32xf32>
    %171 = vector.shape_cast %170 : vector<1x2x2x32xf32> to vector<4x32xf32>
    %c0_318 = arith.constant 0 : index
    %c64_319 = arith.constant 64 : index
    %172 = vector.load %arg15[%c0_318, %c64_319] : memref<64x288xf32, #tpu.memory_space<vmem>>, vector<4x32xf32>
    tpu.vector_store %arg15[%c0_318, %c64_319], %171 {strides = array<i32>} : memref<64x288xf32, #tpu.memory_space<vmem>>, vector<4x32xf32>,
    %c0_320 = arith.constant 0 : index
    %c1_321 = arith.constant 1 : index
    %c0_322 = arith.constant 0 : index
    %c0_323 = arith.constant 0 : index
    %173 = vector.load %arg11[%c0_320, %c1_321, %c0_322, %c0_323] : memref<1x4x4x32xf32, #tpu.memory_space<vmem>>, vector<1x2x2x32xf32>
    %174 = vector.shape_cast %173 : vector<1x2x2x32xf32> to vector<4x32xf32>
    %c0_324 = arith.constant 0 : index
    %c96_325 = arith.constant 96 : index
    %175 = vector.load %arg15[%c0_324, %c96_325] : memref<64x288xf32, #tpu.memory_space<vmem>>, vector<4x32xf32>
    tpu.vector_store %arg15[%c0_324, %c96_325], %174 {strides = array<i32>} : memref<64x288xf32, #tpu.memory_space<vmem>>, vector<4x32xf32>,
    %c0_326 = arith.constant 0 : index
    %c1_327 = arith.constant 1 : index
    %c1_328 = arith.constant 1 : index
    %c0_329 = arith.constant 0 : index
    %176 = vector.load %arg11[%c0_326, %c1_327, %c1_328, %c0_329] : memref<1x4x4x32xf32, #tpu.memory_space<vmem>>, vector<1x2x2x32xf32>
    %177 = vector.shape_cast %176 : vector<1x2x2x32xf32> to vector<4x32xf32>
    %c0_330 = arith.constant 0 : index
    %c128_331 = arith.constant 128 : index
    %178 = vector.load %arg15[%c0_330, %c128_331] : memref<64x288xf32, #tpu.memory_space<vmem>>, vector<4x32xf32>
    tpu.vector_store %arg15[%c0_330, %c128_331], %177 {strides = array<i32>} : memref<64x288xf32, #tpu.memory_space<vmem>>, vector<4x32xf32>,
    %c0_332 = arith.constant 0 : index
    %c1_333 = arith.constant 1 : index
    %c2_334 = arith.constant 2 : index
    %c0_335 = arith.constant 0 : index
    %179 = vector.load %arg11[%c0_332, %c1_333, %c2_334, %c0_335] : memref<1x4x4x32xf32, #tpu.memory_space<vmem>>, vector<1x2x2x32xf32>
    %180 = vector.shape_cast %179 : vector<1x2x2x32xf32> to vector<4x32xf32>
    %c0_336 = arith.constant 0 : index
    %c160_337 = arith.constant 160 : index
    %181 = vector.load %arg15[%c0_336, %c160_337] : memref<64x288xf32, #tpu.memory_space<vmem>>, vector<4x32xf32>
    tpu.vector_store %arg15[%c0_336, %c160_337], %180 {strides = array<i32>} : memref<64x288xf32, #tpu.memory_space<vmem>>, vector<4x32xf32>,
    %c0_338 = arith.constant 0 : index
    %c2_339 = arith.constant 2 : index
    %c0_340 = arith.constant 0 : index
    %c0_341 = arith.constant 0 : index
    %182 = vector.load %arg11[%c0_338, %c2_339, %c0_340, %c0_341] : memref<1x4x4x32xf32, #tpu.memory_space<vmem>>, vector<1x2x2x32xf32>
    %183 = vector.shape_cast %182 : vector<1x2x2x32xf32> to vector<4x32xf32>
    %c0_342 = arith.constant 0 : index
    %c192_343 = arith.constant 192 : index
    %184 = vector.load %arg15[%c0_342, %c192_343] : memref<64x288xf32, #tpu.memory_space<vmem>>, vector<4x32xf32>
    tpu.vector_store %arg15[%c0_342, %c192_343], %183 {strides = array<i32>} : memref<64x288xf32, #tpu.memory_space<vmem>>, vector<4x32xf32>,
    %c0_344 = arith.constant 0 : index
    %c2_345 = arith.constant 2 : index
    %c1_346 = arith.constant 1 : index
    %c0_347 = arith.constant 0 : index
    %185 = vector.load %arg11[%c0_344, %c2_345, %c1_346, %c0_347] : memref<1x4x4x32xf32, #tpu.memory_space<vmem>>, vector<1x2x2x32xf32>
    %186 = vector.shape_cast %185 : vector<1x2x2x32xf32> to vector<4x32xf32>
    %c0_348 = arith.constant 0 : index
    %c224_349 = arith.constant 224 : index
    %187 = vector.load %arg15[%c0_348, %c224_349] : memref<64x288xf32, #tpu.memory_space<vmem>>, vector<4x32xf32>
    tpu.vector_store %arg15[%c0_348, %c224_349], %186 {strides = array<i32>} : memref<64x288xf32, #tpu.memory_space<vmem>>, vector<4x32xf32>,
    %c0_350 = arith.constant 0 : index
    %c2_351 = arith.constant 2 : index
    %c2_352 = arith.constant 2 : index
    %c0_353 = arith.constant 0 : index
    %188 = vector.load %arg11[%c0_350, %c2_351, %c2_352, %c0_353] : memref<1x4x4x32xf32, #tpu.memory_space<vmem>>, vector<1x2x2x32xf32>
    %189 = vector.shape_cast %188 : vector<1x2x2x32xf32> to vector<4x32xf32>
    %c0_354 = arith.constant 0 : index
    %c256_355 = arith.constant 256 : index
    %190 = vector.load %arg15[%c0_354, %c256_355] : memref<64x288xf32, #tpu.memory_space<vmem>>, vector<4x32xf32>
    tpu.vector_store %arg15[%c0_354, %c256_355], %189 {strides = array<i32>} : memref<64x288xf32, #tpu.memory_space<vmem>>, vector<4x32xf32>,
    %c0_356 = arith.constant 0 : index
    %c0_357 = arith.constant 0 : index
    %191 = vector.load %arg15[%c0_356, %c0_357] : memref<64x288xf32, #tpu.memory_space<vmem>>, vector<4x288xf32>
    %192 = arith.truncf %191 : vector<4x288xf32> to vector<4x288xbf16>
    %cst_358 = arith.constant dense<0.000000e+00> : vector<4x32xf32>
    %193 = tpu.matmul %192, %162, %cst_358 {dimension_numbers = #tpu.dot_dimension_numbers<[1], [0], [0], [1], [0, 0, 1, 1], [], []>} : vector<4x288xbf16>, vector<288x32xbf16>, vector<4x32xf32> -> vector<4x32xf32>
    %194 = vector.broadcast %163 : vector<1x32xf32> to vector<4x32xf32>
    %195 = arith.addf %193, %194 : vector<4x32xf32>
    %cst_359 = arith.constant 5.000000e-02 : f32
    %196 = vector.broadcast %cst_359 : f32 to vector<4x32xf32>
    %197 = arith.mulf %196, %195 : vector<4x32xf32>
    %198 = arith.maximumf %195, %197 : vector<4x32xf32>
    %199 = vector.shape_cast %198 : vector<4x32xf32> to vector<1x2x2x32xf32>
    %c0_360 = arith.constant 0 : index
    %c0_361 = arith.constant 0 : index
    %c0_362 = arith.constant 0 : index
    %c0_363 = arith.constant 0 : index
    %200 = vector.load %arg14[%c0_360, %c0_361, %c0_362, %c0_363] : memref<1x2x2x32xf32, #tpu.memory_space<vmem>>, vector<1x2x2x32xf32>
    tpu.vector_store %arg14[%c0_360, %c0_361, %c0_362, %c0_363], %199 {strides = array<i32>} : memref<1x2x2x32xf32, #tpu.memory_space<vmem>>, vector<1x2x2x32xf32>,
    %c0_364 = arith.constant 0 : index
    %c0_365 = arith.constant 0 : index
    %c0_366 = arith.constant 0 : index
    %c0_367 = arith.constant 0 : index
    %201 = tpu.strided_load %arg14[%c0_364, %c0_365, %c0_366, %c0_367] {strides = array<i32: 1, 2, 2, 1>} : memref<1x2x2x32xf32, #tpu.memory_space<vmem>>, vector<1x1x1x32xf32>
    %c0_368 = arith.constant 0 : index
    %c0_369 = arith.constant 0 : index
    %c1_370 = arith.constant 1 : index
    %c0_371 = arith.constant 0 : index
    %202 = tpu.strided_load %arg14[%c0_368, %c0_369, %c1_370, %c0_371] {strides = array<i32: 1, 2, 2, 1>} : memref<1x2x2x32xf32, #tpu.memory_space<vmem>>, vector<1x1x1x32xf32>
    %c0_372 = arith.constant 0 : index
    %c1_373 = arith.constant 1 : index
    %c0_374 = arith.constant 0 : index
    %c0_375 = arith.constant 0 : index
    %203 = tpu.strided_load %arg14[%c0_372, %c1_373, %c0_374, %c0_375] {strides = array<i32: 1, 2, 2, 1>} : memref<1x2x2x32xf32, #tpu.memory_space<vmem>>, vector<1x1x1x32xf32>
    %c0_376 = arith.constant 0 : index
    %c1_377 = arith.constant 1 : index
    %c1_378 = arith.constant 1 : index
    %c0_379 = arith.constant 0 : index
    %204 = tpu.strided_load %arg14[%c0_376, %c1_377, %c1_378, %c0_379] {strides = array<i32: 1, 2, 2, 1>} : memref<1x2x2x32xf32, #tpu.memory_space<vmem>>, vector<1x1x1x32xf32>
    %205 = arith.maximumf %201, %202 : vector<1x1x1x32xf32>
    %206 = arith.maximumf %203, %204 : vector<1x1x1x32xf32>
    %207 = arith.maximumf %205, %206 : vector<1x1x1x32xf32>
    %208 = vector.shape_cast %207 : vector<1x1x1x32xf32> to vector<1x32xf32>
    %c0_380 = arith.constant 0 : index
    %c0_381 = arith.constant 0 : index
    %209 = vector.load %arg5[%c0_380, %c0_381] : memref<32x32xf32, #tpu.memory_space<vmem>>, vector<32x32xf32>
    %cst_382 = arith.constant dense<0.000000e+00> : vector<1x32xf32>
    %210 = tpu.matmul %208, %209, %cst_382 {dimension_numbers = #tpu.dot_dimension_numbers<[1], [0], [0], [1], [0, 0, 1, 1], [], []>} : vector<1x32xf32>, vector<32x32xf32>, vector<1x32xf32> -> vector<1x32xf32>
    %c4_383 = arith.constant 4 : index
    %c0_384 = arith.constant 0 : index
    %211 = vector.load %arg4[%c4_383, %c0_384] : memref<6x32xf32, #tpu.memory_space<vmem>>, vector<1x32xf32>
    %212 = arith.addf %210, %211 : vector<1x32xf32>
    %c0_385 = arith.constant 0 : index
    %c0_386 = arith.constant 0 : index
    %213 = vector.load %arg6[%c0_385, %c0_386] : memref<32x1xf32, #tpu.memory_space<vmem>>, vector<32x1xf32>
    %cst_387 = arith.constant dense<0.000000e+00> : vector<1x1xf32>
    %214 = tpu.matmul %212, %213, %cst_387 {dimension_numbers = #tpu.dot_dimension_numbers<[1], [0], [0], [1], [0, 0, 1, 1], [], []>} : vector<1x32xf32>, vector<32x1xf32>, vector<1x1xf32> -> vector<1x1xf32>
    %c5_388 = arith.constant 5 : index
    %c0_389 = arith.constant 0 : index
    %215 = vector.load %arg4[%c5_388, %c0_389] : memref<6x32xf32, #tpu.memory_space<vmem>>, vector<1x1xf32>
    %216 = arith.addf %214, %215 : vector<1x1xf32>
    %cst_390 = arith.constant 0.000000e+00 : f32
    %217 = vector.broadcast %cst_390 : f32 to vector<1x1xf32>
    %218 = arith.maximumf %216, %217 : vector<1x1xf32>
    %219 = vector.shape_cast %218 : vector<1x1xf32> to vector<1x1x1xf32>
    %c0_391 = arith.constant 0 : index
    %c0_392 = arith.constant 0 : index
    %c0_393 = arith.constant 0 : index
    %220 = vector.load %arg7[%c0_391, %c0_392, %c0_393] : memref<1x1x1xf32, #tpu.memory_space<vmem>>, vector<1x1x1xf32>
    tpu.vector_store %arg7[%c0_391, %c0_392, %c0_393], %219 {strides = array<i32>} : memref<1x1x1xf32, #tpu.memory_space<vmem>>, vector<1x1x1xf32>,
    return
  }
  func.func @transform_0(%arg0: i32) -> (i32, i32, i32, i32) {
    %c0_i32 = arith.constant 0 : i32
    %c0_i32_0 = arith.constant 0 : i32
    %c0_i32_1 = arith.constant 0 : i32
    %c0_i32_2 = arith.constant 0 : i32
    return %arg0, %c0_i32, %c0_i32_0, %c0_i32_1 : i32, i32, i32, i32
  }
  func.func @transform_1(%arg0: i32) -> (i32, i32) {
    %c0_i32 = arith.constant 0 : i32
    %c0_i32_0 = arith.constant 0 : i32
    %c0_i32_1 = arith.constant 0 : i32
    return %c0_i32, %c0_i32_0 : i32, i32
  }
  func.func @transform_2(%arg0: i32) -> (i32, i32, i32) {
    %c0_i32 = arith.constant 0 : i32
    %c0_i32_0 = arith.constant 0 : i32
    %c0_i32_1 = arith.constant 0 : i32
    %c0_i32_2 = arith.constant 0 : i32
    return %c0_i32, %c0_i32_0, %c0_i32_1 : i32, i32, i32
  }
  func.func @transform_3(%arg0: i32) -> (i32, i32) {
    %c0_i32 = arith.constant 0 : i32
    %c0_i32_0 = arith.constant 0 : i32
    %c0_i32_1 = arith.constant 0 : i32
    return %c0_i32, %c0_i32_0 : i32, i32
  }
  func.func @transform_4(%arg0: i32) -> (i32, i32) {
    %c0_i32 = arith.constant 0 : i32
    %c0_i32_0 = arith.constant 0 : i32
    %c0_i32_1 = arith.constant 0 : i32
    return %c0_i32, %c0_i32_0 : i32, i32
  }
  func.func @transform_5(%arg0: i32) -> (i32, i32) {
    %c0_i32 = arith.constant 0 : i32
    %c0_i32_0 = arith.constant 0 : i32
    %c0_i32_1 = arith.constant 0 : i32
    return %c0_i32, %c0_i32_0 : i32, i32
  }
  func.func @transform_6(%arg0: i32) -> (i32, i32, i32) {
    %c0_i32 = arith.constant 0 : i32
    %c0_i32_0 = arith.constant 0 : i32
    %c0_i32_1 = arith.constant 0 : i32
    return %arg0, %c0_i32, %c0_i32_0 : i32, i32, i32
  }
}

</mosaic_0001>

<bundles_post_ra>
// kernel: cnnu_forward.1
= control target key start
LH: loop header
LB: loop body
LE: loop exit
PB: predicated region body
PF: predicated region fallthrough
CT: control target
= control target key end

     0   :  { %s3396_s21 = smov 0   ;;  %s4240_s0 = inlined_call_operand.vmem [shape: f32[2,16,16,4], index: 0, kind: input, shape index: {}]   ;;  %s4241_s1 = inlined_call_operand.vmem [shape: bf16[36,32], index: 1, kind: input, shape index: {}]   ;;  %s4242_s2 = inlined_call_operand.vmem [shape: bf16[3,288,32], index: 2, kind: input, shape index: {}]   ;;  %s4243_s3 = inlined_call_operand.vmem [shape: f32[6,32], index: 3, kind: input, shape index: {}]   ;;  %s4244_s4 = inlined_call_operand.vmem [shape: f32[32,32], index: 4, kind: input, shape index: {}]   ;;  %s4245_s5 = inlined_call_operand.vmem [shape: f32[32,1], index: 5, kind: input, shape index: {}]   ;;  %s4246_s6 = inlined_call_operand.vmem [shape: f32[2,1,1], index: 6, kind: output, shape index: {}]  }
   0x1 LB: > { %s2879_s22 = sadd.s32 4294967295, %s3345_s21   ;;  %p2883_p0 = scmp.ge.s32.totalorder %s3345_s21, 1  ;;  %s3345_s21 = sphi %s3396_s21, %s16_s21  }
   0x2   : > { %p212_p1 = scmp.lt.s32.totalorder %s3345_s21, 3 }
   0x4   : > { %p213_p2 = pnand %p2883_p0, %p212_p1 }
   0x5   : > { %vm249_vm0 = vcmask (!%p213_p2), 31744   ;;  %vm258_vm1 = vcmask (!%p213_p2), 24576   ;;  %p3406_p3 = scmp.lt.s32.totalorder (!%p213_p2), %s2879_s22, 1  ;;  %vm252_vm2 = vcmask (!%p213_p2), 25600   ;;  %v3347_v0 = vmov (!%p213_p2), 0.0   ;;  %s3348_s28 = smov (!%p213_p2), 4  }
   0x6   : > { %216 = sbr.rel (%p213_p2) target bundleno = 2111 (0x83f), region = 44  ;;  %250 = vst.msk [vmem:[#allocation2] sm:$0xff] (!%p213_p2), %vm249_vm0, %v3347_v0  ;;  %251 = vst.msk [vmem:[#allocation2 + $0x8] sm:$0xff] (!%p213_p2), %vm249_vm0, %v3347_v0  ;;  %s3349_s29 = smov (!%p213_p2), 8   ;;  %vm944_vm3 = vcmask (!%p213_p2), 1041408   ;;  %vm493_vm4 = vcmask (!%p213_p2), 64544  }
   0x7   : > { %260 = vst.msk [vmem:[#allocation2 + $0x18] sm:$0x1] (!%p213_p2), %vm258_vm1, %v3347_v0  ;;  %261 = vst.msk [vmem:[#allocation2 + $0x30] sm:$0x1] (!%p213_p2), %vm258_vm1, %v3347_v0  ;;  %s3350_s30 = smov (!%p213_p2), 12   ;;  %s3351_s7 = smov (!%p213_p2), 16  }
   0x8   : > { %262 = vst.msk [vmem:[#allocation2 + $0x48] sm:$0x1] (!%p213_p2), %vm258_vm1, %v3347_v0  ;;  %263 = vst.msk [vmem:[#allocation2 + $0x60] sm:$0x1] (!%p213_p2), %vm258_vm1, %v3347_v0  ;;  %s3352_s8 = smov (!%p213_p2), 20   ;;  %s3353_s9 = smov (!%p213_p2), 24  }
   0x9   : > { %264 = vst.msk [vmem:[#allocation2 + $0x78] sm:$0x1] (!%p213_p2), %vm258_vm1, %v3347_v0  ;;  %265 = vst.msk [vmem:[#allocation2 + $0x90] sm:$0x1] (!%p213_p2), %vm258_vm1, %v3347_v0  ;;  %s3354_s10 = smov (!%p213_p2), 28   ;;  %s3355_s15 = smov (!%p213_p2), 32  }
   0xa   : > { %266 = vst.msk [vmem:[#allocation2 + $0xa8] sm:$0x1] (!%p213_p2), %vm258_vm1, %v3347_v0  ;;  %267 = vst.msk [vmem:[#allocation2 + $0xc0] sm:$0x1] (!%p213_p2), %vm258_vm1, %v3347_v0  ;;  %vm550_vm5 = vcmask (!%p213_p2), 97344   ;;  %vm295_vm6 = vcmask (!%p213_p2), 261120  }
   0xb   : > { %268 = vst.msk [vmem:[#allocation2 + $0xd8] sm:$0x1] (!%p213_p2), %vm258_vm1, %v3347_v0  ;;  %269 = vst.msk [vmem:[#allocation2 + $0xf0] sm:$0x1] (!%p213_p2), %vm258_vm1, %v3347_v0  ;;  %vm606_vm7 = vcmask (!%p213_p2), 130144   ;;  %vm663_vm8 = vcmask (!%p213_p2), 162944  }
   0xc   : > { %270 = vst.msk [vmem:[#allocation2 + $0x108] sm:$0x1] (!%p213_p2), %vm258_vm1, %v3347_v0  ;;  %271 = vst.msk [vmem:[#allocation2 + $0x120] sm:$0x1] (!%p213_p2), %vm258_vm1, %v3347_v0  ;;  %vm720_vm9 = vcmask (!%p213_p2), 195744   ;;  %vm777_vm10 = vcmask (!%p213_p2), 228544  }
   0xd   : > { %272 = vst.msk [vmem:[#allocation2 + $0x138] sm:$0x1] %vm258_vm1, %v3347_v0  ;;  %273 = vst.msk [vmem:[#allocation2 + $0x150] sm:$0x1] %vm258_vm1, %v3347_v0  ;;  %s4249_s22 = smov (!%p3406_p3, %s2879_s22), 1  ;;  %vm834_vm11 = vcmask 261344  }
   0xe   : > { %274 = vst.msk [vmem:[#allocation2 + $0x168] sm:$0x1] %vm258_vm1, %v3347_v0  ;;  %275 = vst.msk [vmem:[#allocation2 + $0x180] sm:$0x1] %vm258_vm1, %v3347_v0  ;;  %s3033_s24 = sshll.u32 %s4249_s22, 8  ;;  %vm891_vm12 = vcmask 294144   ;;  %s247_s17 = scalar_lea.vmem %s4246_s6, %s4249_s22 }
   0xf   : > { %253 = vst.msk [vmem:[#allocation2 + $0x10] sm:$0x3] %vm252_vm2, %v3347_v0  ;;  %s3460_s27 = scalar_lea.vmem %s4240_s0, %s3033_s24  ;;  %v446_v7 = vld [vmem:[#allocation2 + $0x1] ss:$2 sm:$0xff]  ;;  %vm931_vm13 = vcmask 293888   ;;  %vm297_vm14 = vcmask 254976  }
  0x10   : > { %259 = vst.msk [vmem:[#allocation2] sm:$0x1] %vm258_vm1, %v3347_v0  ;;  %v357_v1 = vld [vmem:[%s3460_s27 + $0x30] sm:$0xff]  ;;  %v358_v2 = vld [vmem:[%s3460_s27 + $0x38] sm:$0xff]  ;;  %v355_v9 = vld [vmem:[%s3460_s27 + $0x20] sm:$0xff]  ;;  %469 = vrot.lane.b32.xlu0 %v446_v7, %s3348_s28  ;;  %vm302_vm15 = vcmask 253952  }
  0x11   : > { %v361_v3 = vld [vmem:[%s3460_s27 + $0x50] sm:$0xff]  ;;  %390 = vst.msk [vmem:[#allocation2 + $0x61] sm:$0xff] %vm249_vm0, %v357_v1  ;;  %391 = vst.msk [vmem:[#allocation2 + $0x69] sm:$0xff] %vm249_vm0, %v358_v2  ;;  %v362_v4 = vld [vmem:[%s3460_s27 + $0x58] sm:$0xff]  ;;  %s3356_s18 = smov 64   ;;  %vm1180_vm1 = vcmask 785920  }
  0x12   : > { %394 = vst.msk [vmem:[#allocation2 + $0x91] sm:$0xff] %vm249_vm0, %v361_v3  ;;  %v353_v5 = vld [vmem:[%s3460_s27 + $0x10] sm:$0xff]  ;;  %v354_v6 = vld [vmem:[%s3460_s27 + $0x18] sm:$0xff]  ;;  %395 = vst.msk [vmem:[#allocation2 + $0x99] sm:$0xff] %vm249_vm0, %v362_v4  ;;  %vm1229_vm2 = vcmask 1048320  }
  0x13   : > { %386 = vst.msk [vmem:[#allocation2 + $0x31] sm:$0xff] %vm249_vm0, %v353_v5  ;;  %387 = vst.msk [vmem:[#allocation2 + $0x39] sm:$0xff] %vm249_vm0, %v354_v6  ;;  %v356_v10 = vld [vmem:[%s3460_s27 + $0x28] sm:$0xff]  ;;  %v351_v11 = vld [vmem:[%s3460_s27] sm:$0xff] }
  0x14   : > { %388 = vst.msk [vmem:[#allocation2 + $0x49] sm:$0xff] %vm249_vm0, %v355_v9  ;;  %v352_v12 = vld [vmem:[%s3460_s27 + $0x8] sm:$0xff]  ;;  %389 = vst.msk [vmem:[#allocation2 + $0x51] sm:$0xff] %vm249_vm0, %v356_v10  ;;  %v363_v13 = vld [vmem:[%s3460_s27 + $0x60] sm:$0xff] }
  0x15   : > { %384 = vst.msk [vmem:[#allocation2 + $0x19] sm:$0xff] %vm249_vm0, %v351_v11  ;;  %385 = vst.msk [vmem:[#allocation2 + $0x21] sm:$0xff] %vm249_vm0, %v352_v12  ;;  %v364_v14 = vld [vmem:[%s3460_s27 + $0x68] sm:$0xff]  ;;  %v359_v15 = vld [vmem:[%s3460_s27 + $0x40] sm:$0xff] }
  0x16   : > { %v503_v8 = vld [vmem:[#allocation2 + $0x2] ss:$2 sm:$0xff]  ;;  %396 = vst.msk [vmem:[#allocation2 + $0xa9] sm:$0xff] %vm249_vm0, %v363_v13  ;;  %397 = vst.msk [vmem:[#allocation2 + $0xb1] sm:$0xff] %vm249_vm0, %v364_v14  ;;  %v366_v18 = vld [vmem:[%s3460_s27 + $0x78] sm:$0xff] }
  0x17   : > { %v360_v16 = vld [vmem:[%s3460_s27 + $0x48] sm:$0xff]  ;;  %392 = vst.msk [vmem:[#allocation2 + $0x79] sm:$0xff] %vm249_vm0, %v359_v15  ;;  %v365_v17 = vld [vmem:[%s3460_s27 + $0x70] sm:$0xff]  ;;  %399 = vst.msk [vmem:[#allocation2 + $0xc9] sm:$0xff] %vm249_vm0, %v366_v18  ;;  %526 = vrot.lane.b32.xlu0 %v503_v8, %s3349_s29 }
  0x18   : > { %393 = vst.msk [vmem:[#allocation2 + $0x81] sm:$0xff] %vm249_vm0, %v360_v16  ;;  %398 = vst.msk [vmem:[#allocation2 + $0xc1] sm:$0xff] %vm249_vm0, %v365_v17  ;;  %v369_v19 = vld [vmem:[%s3460_s27 + $0x90] sm:$0xff]  ;;  %v370_v20 = vld [vmem:[%s3460_s27 + $0x98] sm:$0xff] }
  0x19   : > { %v377_v21 = vld [vmem:[%s3460_s27 + $0xd0] sm:$0xff]  ;;  %402 = vst.msk [vmem:[#allocation2 + $0xf1] sm:$0xff] %vm249_vm0, %v369_v19  ;;  %403 = vst.msk [vmem:[#allocation2 + $0xf9] sm:$0xff] %vm249_vm0, %v370_v20  ;;  %v378_v22 = vld [vmem:[%s3460_s27 + $0xd8] sm:$0xff] }
  0x1a   : > { %410 = vst.msk [vmem:[#allocation2 + $0x151] sm:$0xff] %vm249_vm0, %v377_v21  ;;  %v373_v23 = vld [vmem:[%s3460_s27 + $0xb0] sm:$0xff]  ;;  %v374_v24 = vld [vmem:[%s3460_s27 + $0xb8] sm:$0xff]  ;;  %v450_v25 = vld [vmem:[#allocation2 + $0x61] ss:$2 sm:$0xff] }
  0x1b   : > { %411 = vst.msk [vmem:[#allocation2 + $0x159] sm:$0xff] %vm249_vm0, %v378_v22  ;;  %406 = vst.msk [vmem:[#allocation2 + $0x121] sm:$0xff] %vm249_vm0, %v373_v23  ;;  %473 = vrot.lane.b32.xlu1 %v450_v25, %s3348_s28  ;;  %v448_v26 = vld [vmem:[#allocation2 + $0x31] ss:$2 sm:$0xff]  ;;  %v507_v28 = vld [vmem:[#allocation2 + $0x62] ss:$2 sm:$0xff] }
  0x1c   : > { %407 = vst.msk [vmem:[#allocation2 + $0x129] sm:$0xff] %vm249_vm0, %v374_v24  ;;  %v452_v27 = vld [vmem:[#allocation2 + $0x91] ss:$2 sm:$0xff]  ;;  %471 = vrot.lane.b32.xlu0 %v448_v26, %s3348_s28  ;;  %v505_v29 = vld [vmem:[#allocation2 + $0x32] ss:$2 sm:$0xff]  ;;  %v372_v35 = vld [vmem:[%s3460_s27 + $0xa8] sm:$0xff] }
  0x1d   : > { %v559_v30 = vld [vmem:[#allocation2 + $0x18] ss:$2 sm:$0xff]  ;;  %v561_v32 = vld [vmem:[#allocation2 + $0x48] ss:$2 sm:$0xff]  ;;  %405 = vst.msk [vmem:[#allocation2 + $0x111] sm:$0xff] %vm249_vm0, %v372_v35 }
  0x1e   : > { %v509_v31 = vld [vmem:[#allocation2 + $0x92] ss:$2 sm:$0xff]  ;;  %v368_v37 = vld [vmem:[%s3460_s27 + $0x88] sm:$0xff]  ;;  %v616_v42 = vld [vmem:[#allocation2 + $0x19] ss:$2 sm:$0xff]  ;;  %296 = vst.msk [vmem:[#allocation3] sm:$0xff] %vm295_vm6, %v3347_v0 }
  0x1f   : > { %475 = vrot.lane.b32.xlu1 %v452_v27, %s3348_s28  ;;  %v563_v33 = vld [vmem:[#allocation2 + $0x78] ss:$2 sm:$0xff]  ;;  %401 = vst.msk [vmem:[#allocation2 + $0xe1] sm:$0xff] %vm249_vm0, %v368_v37  ;;  %v380_v39 = vld [vmem:[%s3460_s27 + $0xe8] sm:$0xff]  ;;  %v381_v43 = vld [vmem:[%s3460_s27 + $0xf0] sm:$0xff] }
  0x20   : > { %530 = vrot.lane.b32.xlu0 %v507_v28, %s3349_s29  ;;  %v371_v34 = vld [vmem:[%s3460_s27 + $0xa0] sm:$0xff]  ;;  %413 = vst.msk [vmem:[#allocation2 + $0x171] sm:$0xff] %vm249_vm0, %v380_v39  ;;  %v376_v41 = vld [vmem:[%s3460_s27 + $0xc8] sm:$0xff]  ;;  %v382_v44 = vld [vmem:[%s3460_s27 + $0xf8] sm:$0xff] }
  0x21   : > { %404 = vst.msk [vmem:[#allocation2 + $0x109] sm:$0xff] %vm249_vm0, %v371_v34  ;;  %v367_v36 = vld [vmem:[%s3460_s27 + $0x80] sm:$0xff]  ;;  %409 = vst.msk [vmem:[#allocation2 + $0x141] sm:$0xff] %vm249_vm0, %v376_v41  ;;  %v565_v46 = vld [vmem:[#allocation2 + $0xa8] ss:$2 sm:$0xff] }
  0x22   : > { %400 = vst.msk [vmem:[#allocation2 + $0xd9] sm:$0xff] %vm249_vm0, %v367_v36  ;;  %v379_v38 = vld [vmem:[%s3460_s27 + $0xe0] sm:$0xff]  ;;  %414 = vst.msk [vmem:[#allocation2 + $0x181] sm:$0xff] %vm249_vm0, %v381_v43  ;;  %v428_v48 = vld [vmem:[#allocation2 + $0x90] ss:$2 sm:$0xff] }
  0x23   : > { %528 = vrot.lane.b32.xlu1 %v505_v29, %s3349_s29  ;;  %v375_v40 = vld [vmem:[%s3460_s27 + $0xc0] sm:$0xff]  ;;  %412 = vst.msk [vmem:[#allocation2 + $0x169] sm:$0xff] %vm249_vm0, %v379_v38  ;;  %415 = vst.msk [vmem:[#allocation2 + $0x189] sm:$0xff] %vm249_vm0, %v382_v44  ;;  %v424_v49 = vld [vmem:[#allocation2 + $0x30] ss:$2 sm:$0xff] }
  0x24   : > { %582 = vrot.lane.b32.xlu0 %v559_v30, %s3350_s30  ;;  %408 = vst.msk [vmem:[#allocation2 + $0x139] sm:$0xff] %vm249_vm0, %v375_v40  ;;  %v422_v45 = vld [vmem:[#allocation2] ss:$2 sm:$0xff]  ;;  %440 = vst.msk [vmem:[#allocation9 + $0x48] sm:$0xff] %vm249_vm0, %v428_v48  ;;  %v620_v50 = vld [vmem:[#allocation2 + $0x79] ss:$2 sm:$0xff] }
  0x25   : > { %437 = vst.msk [vmem:[#allocation9] sm:$0xff] %vm249_vm0, %v422_v45  ;;  %v426_v47 = vld [vmem:[#allocation2 + $0x60] ss:$2 sm:$0xff]  ;;  %438 = vst.msk [vmem:[#allocation9 + $0x18] sm:$0xff] %vm249_vm0, %v424_v49  ;;  %v618_v51 = vld [vmem:[#allocation2 + $0x49] ss:$2 sm:$0xff] }
  0x26   : > { %439 = vst.msk [vmem:[#allocation9 + $0x30] sm:$0xff] %vm249_vm0, %v426_v47  ;;  %v673_v52 = vld [vmem:[#allocation2 + $0x1a] ss:$2 sm:$0xff]  ;;  %v622_v53 = vld [vmem:[#allocation2 + $0xa9] ss:$2 sm:$0xff] }
  0x27   : > { %532 = vrot.lane.b32.xlu1 %v509_v31, %s3349_s29  ;;  %v677_v54 = vld [vmem:[#allocation2 + $0x7a] ss:$2 sm:$0xff]  ;;  %v675_v55 = vld [vmem:[#allocation2 + $0x4a] ss:$2 sm:$0xff]  ;;  %v787_v61 = vld [vmem:[#allocation2 + $0x31] ss:$2 sm:$0xff] }
  0x28   : > { %586 = vrot.lane.b32.xlu0 %v563_v33, %s3350_s30  ;;  %v730_v56 = vld [vmem:[#allocation2 + $0x30] ss:$2 sm:$0xff]  ;;  %v732_v59 = vld [vmem:[#allocation2 + $0x60] ss:$2 sm:$0xff]  ;;  %v791_v62 = vld [vmem:[#allocation2 + $0x91] ss:$2 sm:$0xff] }
  0x29   : > { %v679_v57 = vld [vmem:[#allocation2 + $0xaa] ss:$2 sm:$0xff]  ;;  %v789_v63 = vld [vmem:[#allocation2 + $0x61] ss:$2 sm:$0xff]  ;;  %v456_v16 = vld [vmem:[#allocation2 + $0xf1] ss:$2 sm:$0xff] }
  0x2a   : > { %v734_v58 = vld [vmem:[#allocation2 + $0x90] ss:$2 sm:$0xff]  ;;  %v736_v60 = vld [vmem:[#allocation2 + $0xc0] ss:$2 sm:$0xff]  ;;  %v793_v3 = vld [vmem:[#allocation2 + $0xc1] ss:$2 sm:$0xff] }
  0x2b   : > { %584 = vrot.lane.b32.xlu1 %v561_v32, %s3350_s30  ;;  %v3246_v1 = vld [vmem:[%s4241_s1] sm:$0xff]   ;;  %v3247_v4 = vld [vmem:[%s4241_s1 + $0x8] sm:$0xff]   ;;  %v432_v5 = vld [vmem:[#allocation2 + $0xf0] ss:$2 sm:$0xff]  ;;  %300 = vst.msk [vmem:[#allocation3 + $0x90] sm:$0xff] %vm295_vm6, %v3347_v0 }
  0x2c   : > { %639 = vrot.lane.b32.xlu0 %v616_v42, %s3351_s7  ;;  %v844_v2 = vld [vmem:[#allocation2 + $0x32] ss:$2 sm:$0xff]  ;;  %3147 = vmatprep.subr.bf16.mxu0 %v3246_v1  ;;  %442 = vst.msk [vmem:[#allocation9 + $0x78] sm:$0xff] %vm249_vm0, %v432_v5  ;;  %v846_v7 = vld [vmem:[#allocation2 + $0x62] ss:$2 sm:$0xff] }
  0x2d   : > { %3148 = vmatpush3.bf16.msra.mxu0 %v3246_v1  ;;  %v430_v6 = vld [vmem:[#allocation2 + $0xc0] ss:$2 sm:$0xff]  ;;  %v3248_v9 = vld [vmem:[%s4241_s1 + $0x10] ss:$0 sps:$4 sm:$0x33]  }
  0x2e   : > { %3149 = vmatprep.subr.bf16.mxu0 %v3247_v4  ;;  %441 = vst.msk [vmem:[#allocation9 + $0x60] sm:$0xff] %vm249_vm0, %v430_v6  ;;  %v848_v8 = vld [vmem:[#allocation2 + $0x92] ss:$2 sm:$0xff]  ;;  %v454_v10 = vld [vmem:[#allocation2 + $0xc1] ss:$2 sm:$0xff]  ;;  %v946_v11 = vsel %vm944_vm3, %v3248_v9, 0 }
  0x2f   : > { %588 = vrot.lane.b32.xlu1 %v565_v46, %s3350_s30  ;;  %v436_v12 = vld [vmem:[#allocation2 + $0x150] ss:$2 sm:$0xff]  ;;  %v434_v13 = vld [vmem:[#allocation2 + $0x120] ss:$2 sm:$0xff]  ;;  %v458_v15 = vld [vmem:[#allocation2 + $0x121] ss:$2 sm:$0xff] }
  0x30   : > { %643 = vrot.lane.b32.xlu0 %v620_v50, %s3351_s7  ;;  %444 = vst.msk [vmem:[#allocation9 + $0xa8] sm:$0xff] %vm249_vm0, %v436_v12  ;;  %443 = vst.msk [vmem:[#allocation9 + $0x90] sm:$0xff] %vm249_vm0, %v434_v13  ;;  %v850_v14 = vld [vmem:[#allocation2 + $0xc2] ss:$2 sm:$0xff]  ;;  %v460_v18 = vld [vmem:[#allocation2 + $0x151] ss:$2 sm:$0xff] }
  0x31   : > { %3150 = vmatpush3.bf16.msra.mxu0 %v3247_v4  ;;  %v511_v17 = vld [vmem:[#allocation2 + $0xc2] ss:$2 sm:$0xff]  ;;  %v513_v20 = vld [vmem:[#allocation2 + $0xf2] ss:$2 sm:$0xff]  ;;  %v624_v25 = vld [vmem:[#allocation2 + $0xd9] ss:$2 sm:$0xff] }
  0x32   : > { %3223 = vmatprep.subr.msk.bf16.mxu0 %vm944_vm3, %v3248_v9  ;;  %v515_v19 = vld [vmem:[#allocation2 + $0x122] ss:$2 sm:$0xff]  ;;  %v517_v22 = vld [vmem:[#allocation2 + $0x152] ss:$2 sm:$0xff]  ;;  %v628_v27 = vld [vmem:[#allocation2 + $0x139] ss:$2 sm:$0xff] }
  0x33   : > { %641 = vrot.lane.b32.xlu1 %v618_v51, %s3351_s7  ;;  %v567_v21 = vld [vmem:[#allocation2 + $0xd8] ss:$2 sm:$0xff]  ;;  %v569_v24 = vld [vmem:[#allocation2 + $0x108] ss:$2 sm:$0xff]  ;;  %v626_v28 = vld [vmem:[#allocation2 + $0x109] ss:$2 sm:$0xff] }
  0x34   : > { %696 = vrot.lane.b32.xlu0 %v673_v52, %s3352_s8  ;;  %v571_v23 = vld [vmem:[#allocation2 + $0x138] ss:$2 sm:$0xff]  ;;  %v573_v26 = vld [vmem:[#allocation2 + $0x168] ss:$2 sm:$0xff]  ;;  %v630_v30 = vld [vmem:[#allocation2 + $0x169] ss:$2 sm:$0xff] }
  0x35   : > { %3152 = vmatpush3.bf16.msra.mxu0 %v946_v11  ;;  %v681_v29 = vld [vmem:[#allocation2 + $0xda] ss:$2 sm:$0xff]  ;;  %v683_v32 = vld [vmem:[#allocation2 + $0x10a] ss:$2 sm:$0xff]  ;;  %v795_v37 = vld [vmem:[#allocation2 + $0xf1] ss:$2 sm:$0xff] }
  0x36   : > { %v685_v31 = vld [vmem:[#allocation2 + $0x13a] ss:$2 sm:$0xff]  ;;  %v687_v34 = vld [vmem:[#allocation2 + $0x16a] ss:$2 sm:$0xff]  ;;  %v799_v39 = vld [vmem:[#allocation2 + $0x151] ss:$2 sm:$0xff] }
  0x37   : > { %645 = vrot.lane.b32.xlu1 %v622_v53, %s3351_s7  ;;  %v738_v33 = vld [vmem:[#allocation2 + $0xf0] ss:$2 sm:$0xff]  ;;  %v740_v36 = vld [vmem:[#allocation2 + $0x120] ss:$2 sm:$0xff]  ;;  %v797_v41 = vld [vmem:[#allocation2 + $0x121] ss:$2 sm:$0xff] }
  0x38   : > { %700 = vrot.lane.b32.xlu0 %v677_v54, %s3352_s8  ;;  %v742_v35 = vld [vmem:[#allocation2 + $0x150] ss:$2 sm:$0xff]  ;;  %v744_v38 = vld [vmem:[#allocation2 + $0x180] ss:$2 sm:$0xff]  ;;  %v801_v44 = vld [vmem:[#allocation2 + $0x181] ss:$2 sm:$0xff] }
  0x39   : > { %v852_v42 = vld [vmem:[#allocation2 + $0xf2] ss:$2 sm:$0xff]  ;;  %v854_v48 = vld [vmem:[#allocation2 + $0x122] ss:$2 sm:$0xff]  ;;  %298 = vst.msk [vmem:[#allocation3 + $0x8] sm:$0x3] %vm297_vm14, %v3347_v0 }
  0x3a   : > { %v856_v46 = vld [vmem:[#allocation2 + $0x152] ss:$2 sm:$0xff]  ;;  %v858_v51 = vld [vmem:[#allocation2 + $0x182] ss:$2 sm:$0xff]  ;;  %301 = vst.msk [vmem:[#allocation3 + $0x98] sm:$0x3] %vm297_vm14, %v3347_v0 }
  0x3b   : > { %698 = vrot.lane.b32.xlu1 %v675_v55, %s3352_s8  ;;  %315 = vst.msk [vmem:[#allocation3 + $0x29] sm:$0x1] %vm302_vm15, %v3347_v0  ;;  %303 = vst.msk [vmem:[#allocation3] sm:$0x1] %vm302_vm15, %v3347_v0  ;;  %vm1131_vm0 = vcmask 523520   ;;  %vm323_vm3 = vcmask 259072  }
  0x3c   : > { %753 = vrot.lane.b32.xlu0 %v730_v56, %s3353_s9  ;;  %304 = vst.msk [vmem:[#allocation3 + $0x10] sm:$0x1] %vm302_vm15, %v3347_v0  ;;  %305 = vst.msk [vmem:[#allocation3 + $0x20] sm:$0x1] %vm302_vm15, %v3347_v0 }
  0x3d   : > { %306 = vst.msk [vmem:[#allocation3 + $0x30] sm:$0x1] %vm302_vm15, %v3347_v0  ;;  %307 = vst.msk [vmem:[#allocation3 + $0x40] sm:$0x1] %vm302_vm15, %v3347_v0 }
  0x3e   : > { %308 = vst.msk [vmem:[#allocation3 + $0x50] sm:$0x1] %vm302_vm15, %v3347_v0  ;;  %309 = vst.msk [vmem:[#allocation3 + $0x60] sm:$0x1] %vm302_vm15, %v3347_v0 }
  0x3f   : > { %702 = vrot.lane.b32.xlu1 %v679_v57, %s3352_s8  ;;  %310 = vst.msk [vmem:[#allocation3 + $0x70] sm:$0x1] %vm302_vm15, %v3347_v0  ;;  %311 = vst.msk [vmem:[#allocation3 + $0x80] sm:$0x1] %vm302_vm15, %v3347_v0 }
  0x40   : > { %757 = vrot.lane.b32.xlu0 %v734_v58, %s3353_s9  ;;  %312 = vst.msk [vmem:[#allocation3 + $0x90] sm:$0x1] %vm302_vm15, %v3347_v0  ;;  %314 = vst.msk [vmem:[#allocation3 + $0x19] sm:$0x1] %vm302_vm15, %v3347_v0 }
  0x41   : > { %316 = vst.msk [vmem:[#allocation3 + $0x39] sm:$0x1] %vm302_vm15, %v3347_v0  ;;  %317 = vst.msk [vmem:[#allocation3 + $0x49] sm:$0x1] %vm302_vm15, %v3347_v0 }
  0x42   : > { %318 = vst.msk [vmem:[#allocation3 + $0x59] sm:$0x1] %vm302_vm15, %v3347_v0  ;;  %319 = vst.msk [vmem:[#allocation3 + $0x69] sm:$0x1] %vm302_vm15, %v3347_v0 }
  0x43   : > { %755 = vrot.lane.b32.xlu1 %v732_v59, %s3353_s9  ;;  %320 = vst.msk [vmem:[#allocation3 + $0x79] sm:$0x1] %vm302_vm15, %v3347_v0  ;;  %321 = vst.msk [vmem:[#allocation3 + $0x89] sm:$0x1] %vm302_vm15, %v3347_v0 }
  0x44   : > { %810 = vrot.lane.b32.xlu0 %v787_v61, %s3354_s10  ;;  %328 = vst.msk [vmem:[#allocation4 + $0x8] sm:$0x1] %vm302_vm15, %v3347_v0  ;;  %329 = vst.msk [vmem:[#allocation4 + $0x10] sm:$0x1] %vm302_vm15, %v3347_v0 }
  0x45   : > { %330 = vst.msk [vmem:[#allocation4 + $0x18] sm:$0x1] %vm302_vm15, %v3347_v0  ;;  %331 = vst.msk [vmem:[#allocation4 + $0x20] sm:$0x1] %vm302_vm15, %v3347_v0 }
  0x46   : > { %334 = vst.msk [vmem:[#allocation4 + $0xd] sm:$0x1] %vm302_vm15, %v3347_v0  ;;  %335 = vst.msk [vmem:[#allocation4 + $0x15] sm:$0x1] %vm302_vm15, %v3347_v0 }
  0x47   : > { %759 = vrot.lane.b32.xlu1 %v736_v60, %s3353_s9  ;;  %336 = vst.msk [vmem:[#allocation4 + $0x1d] sm:$0x1] %vm302_vm15, %v3347_v0  ;;  %337 = vst.msk [vmem:[#allocation4 + $0x25] sm:$0x1] %vm302_vm15, %v3347_v0 }
  0x48   : > { %814 = vrot.lane.b32.xlu0 %v791_v62, %s3354_s10  ;;  %344 = vst.msk [vmem:[#allocation5 + $0x4] sm:$0x1] %vm302_vm15, %v3347_v0  ;;  %345 = vst.msk [vmem:[#allocation5 + $0x8] sm:$0x1] %vm302_vm15, %v3347_v0 }
  0x49   : > { %348 = vst.msk [vmem:[#allocation5 + $0x7] sm:$0x1] %vm302_vm15, %v3347_v0  ;;  %349 = vst.msk [vmem:[#allocation5 + $0xb] sm:$0x1] %vm302_vm15, %v3347_v0 }
  0x4a   : > { %322 = vst.msk [vmem:[#allocation3 + $0x99] sm:$0x1] %vm302_vm15, %v3347_v0  ;;  %313 = vst.msk [vmem:[#allocation3 + $0x9] sm:$0x1] %vm302_vm15, %v3347_v0 }
  0x4b   : > { %812 = vrot.lane.b32.xlu1 %v789_v63, %s3354_s10  ;;  %324 = vst.msk [vmem:[#allocation4] sm:$0x3f] %vm323_vm3, %v3347_v0  ;;  %326 = vst.msk [vmem:[#allocation4 + $0x28] sm:$0x3f] %vm323_vm3, %v3347_v0 }
  0x4c   : > { %867 = vrot.lane.b32.xlu0 %v844_v2, %s3355_s15  ;;  %327 = vst.msk [vmem:[#allocation4] sm:$0x1] %vm302_vm15, %v3347_v0  ;;  %333 = vst.msk [vmem:[#allocation4 + $0x5] sm:$0x1] %vm302_vm15, %v3347_v0 }
  0x4d   : > { %332 = vst.msk [vmem:[#allocation4 + $0x28] sm:$0x1] %vm302_vm15, %v3347_v0  ;;  %338 = vst.msk [vmem:[#allocation4 + $0x2d] sm:$0x1] %vm302_vm15, %v3347_v0 }
  0x4f   : > { %816 = vrot.lane.b32.xlu1 %v793_v3, %s3354_s10 }
  0x50   : > { %871 = vrot.lane.b32.xlu0 %v848_v8, %s3355_s15 }
  0x53   : > { %869 = vrot.lane.b32.xlu1 %v846_v7, %s3355_s15 }
  0x54   : > { %477 = vrot.lane.b32.xlu0 %v454_v10, %s3348_s28 }
  0x57   : > { %873 = vrot.lane.b32.xlu1 %v850_v14, %s3355_s15 }
  0x58   : > { %481 = vrot.lane.b32.xlu0 %v458_v15, %s3348_s28 }
  0x5b   : > { %479 = vrot.lane.b32.xlu1 %v456_v16, %s3348_s28 }
  0x5c   : > { %534 = vrot.lane.b32.xlu0 %v511_v17, %s3349_s29 }
  0x5f   : > { %483 = vrot.lane.b32.xlu1 %v460_v18, %s3348_s28 }
  0x60   : > { %538 = vrot.lane.b32.xlu0 %v515_v19, %s3349_s29 }
  0x63   : > { %536 = vrot.lane.b32.xlu1 %v513_v20, %s3349_s29 }
  0x64   : > { %590 = vrot.lane.b32.xlu0 %v567_v21, %s3350_s30 }
  0x67   : > { %540 = vrot.lane.b32.xlu1 %v517_v22, %s3349_s29 }
  0x68   : > { %594 = vrot.lane.b32.xlu0 %v571_v23, %s3350_s30 }
  0x6b   : > { %592 = vrot.lane.b32.xlu1 %v569_v24, %s3350_s30 }
  0x6c   : > { %647 = vrot.lane.b32.xlu0 %v624_v25, %s3351_s7 }
  0x6f   : > { %596 = vrot.lane.b32.xlu1 %v573_v26, %s3350_s30 }
  0x70   : > { %651 = vrot.lane.b32.xlu0 %v628_v27, %s3351_s7 }
  0x73   : > { %649 = vrot.lane.b32.xlu1 %v626_v28, %s3351_s7 }
  0x74   : > { %704 = vrot.lane.b32.xlu0 %v681_v29, %s3352_s8 }
  0x77   : > { %653 = vrot.lane.b32.xlu1 %v630_v30, %s3351_s7 }
  0x78   : > { %708 = vrot.lane.b32.xlu0 %v685_v31, %s3352_s8 }
  0x7b   : > { %706 = vrot.lane.b32.xlu1 %v683_v32, %s3352_s8 }
  0x7c   : > { %761 = vrot.lane.b32.xlu0 %v738_v33, %s3353_s9 }
  0x7f   : > { %710 = vrot.lane.b32.xlu1 %v687_v34, %s3352_s8 }
  0x80   : > { %765 = vrot.lane.b32.xlu0 %v742_v35, %s3353_s9 }
  0x82   : > { %v470_v40 = vpop.permute.xlu0 %469 }
  0x83   : > { %763 = vrot.lane.b32.xlu1 %v740_v36, %s3353_s9  ;;  %494 = vst.msk [vmem:[#allocation9] sm:$0xff] %vm493_vm4, %v470_v40 }
  0x84   : > { %818 = vrot.lane.b32.xlu0 %v795_v37, %s3354_s10 }
  0x87   : > { %767 = vrot.lane.b32.xlu1 %v744_v38, %s3353_s9  ;;  %s3357_s9 = smov 96  }
  0x88   : > { %822 = vrot.lane.b32.xlu0 %v799_v39, %s3354_s10 }
  0x89   : > { %v527_v43 = vpop.permute.xlu0 %526 }
  0x8a   : > { %551 = vst.msk [vmem:[#allocation9] sm:$0xff] %vm550_vm5, %v527_v43 }
  0x8b   : > { %820 = vrot.lane.b32.xlu1 %v797_v41, %s3354_s10 }
  0x8c   : > { %875 = vrot.lane.b32.xlu0 %v852_v42, %s3355_s15 }
  0x8d   : > { %v474_v45 = vpop.permute.xlu1 %473 }
  0x8e   : > { %496 = vst.msk [vmem:[#allocation9 + $0x30] sm:$0xff] %vm493_vm4, %v474_v45  ;;  %v472_v47 = vpop.permute.xlu0 %471 }
  0x8f   : > { %824 = vrot.lane.b32.xlu1 %v801_v44, %s3354_s10  ;;  %495 = vst.msk [vmem:[#allocation9 + $0x18] sm:$0xff] %vm493_vm4, %v472_v47 }
  0x90   : > { %879 = vrot.lane.b32.xlu0 %v856_v46, %s3355_s15 }
  0x91   : > { %v476_v49 = vpop.permute.xlu1 %475 }
  0x92   : > { %497 = vst.msk [vmem:[#allocation9 + $0x48] sm:$0xff] %vm493_vm4, %v476_v49  ;;  %v531_v50 = vpop.permute.xlu0 %530 }
  0x93   : > { %877 = vrot.lane.b32.xlu1 %v854_v48, %s3355_s15  ;;  %553 = vst.msk [vmem:[#allocation9 + $0x30] sm:$0xff] %vm550_vm5, %v531_v50 }
  0x95   : > { %v529_v52 = vpop.permute.xlu1 %528 }
  0x96   : > { %552 = vst.msk [vmem:[#allocation9 + $0x18] sm:$0xff] %vm550_vm5, %v529_v52  ;;  %v583_v53 = vpop.permute.xlu0 %582 }
  0x97   : > { %881 = vrot.lane.b32.xlu1 %v858_v51, %s3355_s15  ;;  %607 = vst.msk [vmem:[#allocation9] sm:$0xff] %vm606_vm7, %v583_v53 }
  0x99   : > { %v533_v54 = vpop.permute.xlu1 %532 }
  0x9a   : > { %554 = vst.msk [vmem:[#allocation9 + $0x48] sm:$0xff] %vm550_vm5, %v533_v54  ;;  %v587_v55 = vpop.permute.xlu0 %586 }
  0x9b   : > { %609 = vst.msk [vmem:[#allocation9 + $0x30] sm:$0xff] %vm606_vm7, %v587_v55 }
  0x9d   : > { %v585_v56 = vpop.permute.xlu1 %584 }
  0x9e   : > { %608 = vst.msk [vmem:[#allocation9 + $0x18] sm:$0xff] %vm606_vm7, %v585_v56  ;;  %v640_v57 = vpop.permute.xlu0 %639 }
  0x9f   : > { %664 = vst.msk [vmem:[#allocation9] sm:$0xff] %vm663_vm8, %v640_v57 }
  0xa1   : > { %v589_v58 = vpop.permute.xlu1 %588 }
  0xa2   : > { %610 = vst.msk [vmem:[#allocation9 + $0x48] sm:$0xff] %vm606_vm7, %v589_v58  ;;  %v644_v59 = vpop.permute.xlu0 %643 }
  0xa3   : > { %666 = vst.msk [vmem:[#allocation9 + $0x30] sm:$0xff] %vm663_vm8, %v644_v59  ;;  %v1091_v59 = vld [vmem:[#allocation3 + $0x1] sm:$0xff] }
  0xa4   : > { %1107 = vrot.lane.b32.xlu0 %v1091_v59, %s3355_s15 }
  0xa5   : > { %v642_v60 = vpop.permute.xlu1 %641 }
  0xa6   : > { %665 = vst.msk [vmem:[#allocation9 + $0x18] sm:$0xff] %vm663_vm8, %v642_v60  ;;  %v697_v61 = vpop.permute.xlu0 %696  ;;  %v1310_v60 = vld [vmem:[#allocation3 + $0x90] sm:$0xff] }
  0xa7   : > { %721 = vst.msk [vmem:[#allocation9] sm:$0xff] %vm720_vm9, %v697_v61  ;;  %v1140_v61 = vld [vmem:[#allocation3 + $0x2] sm:$0xff]  ;;  %1333 = vrot.lane.b32.xlu1 %v1310_v60, %s3356_s18 }
  0xa8   : > { %1156 = vrot.lane.b32.xlu0 %v1140_v61, %s3356_s18 }
  0xa9   : > { %v646_v62 = vpop.permute.xlu1 %645 }
  0xaa   : > { %667 = vst.msk [vmem:[#allocation9 + $0x48] sm:$0xff] %vm663_vm8, %v646_v62  ;;  %v701_v63 = vpop.permute.xlu0 %700  ;;  %v3249_v62 = vld [vmem:[%s4242_s2 + $0x80] sm:$0xff]  }
  0xab   : > { %723 = vst.msk [vmem:[#allocation9 + $0x30] sm:$0xff] %vm720_vm9, %v701_v63  ;;  %v1406_v63 = vld [vmem:[#allocation3 + $0x92] sm:$0xff]  ;;  %3161 = vmatprep.subr.bf16.mxu0 %v3249_v62 }
  0xac   : > { %1414 = vst.msk [vmem:[#allocation9 + $0xb8] sm:$0xff] %vm295_vm6, %v1406_v63 }
  0xad   : > { %v699_v1 = vpop.permute.xlu1 %698 }
  0xae   : > { %722 = vst.msk [vmem:[#allocation9 + $0x18] sm:$0xff] %vm720_vm9, %v699_v1  ;;  %v754_v2 = vpop.permute.xlu0 %753  ;;  %v3250_v1 = vld [vmem:[%s4242_s2 + $0x88] sm:$0xff]  }
  0xaf   : > { %778 = vst.msk [vmem:[#allocation9] sm:$0xff] %vm777_vm10, %v754_v2  ;;  %v1075_v2 = vld [vmem:[#allocation3] sm:$0xff] }
  0xb1   : > { %v703_v3 = vpop.permute.xlu1 %702 }
  0xb2   : > { %724 = vst.msk [vmem:[#allocation9 + $0x48] sm:$0xff] %vm720_vm9, %v703_v3  ;;  %v758_v4 = vpop.permute.xlu0 %757 }
  0xb3   : > { %780 = vst.msk [vmem:[#allocation9 + $0x30] sm:$0xff] %vm777_vm10, %v758_v4 }
  0xb5   : > { %v756_v5 = vpop.permute.xlu1 %755 }
  0xb6   : > { %779 = vst.msk [vmem:[#allocation9 + $0x18] sm:$0xff] %vm777_vm10, %v756_v5  ;;  %v811_v6 = vpop.permute.xlu0 %810  ;;  %v3762_v5 = vld [vmem:[%s4243_s3] ss:$0 sm:$0xff] }
  0xb7   : > { %835 = vst.msk [vmem:[#allocation9] sm:$0xff] %vm834_vm11, %v811_v6 }
  0xb9   : > { %v760_v7 = vpop.permute.xlu1 %759 }
  0xba   : > { %781 = vst.msk [vmem:[#allocation9 + $0x48] sm:$0xff] %vm777_vm10, %v760_v7  ;;  %v815_v8 = vpop.permute.xlu0 %814 }
  0xbb   : > { %837 = vst.msk [vmem:[#allocation9 + $0x30] sm:$0xff] %vm834_vm11, %v815_v8 }
  0xbd   : > { %v813_v9 = vpop.permute.xlu1 %812 }
  0xbe   : > { %836 = vst.msk [vmem:[#allocation9 + $0x18] sm:$0xff] %vm834_vm11, %v813_v9  ;;  %v868_v10 = vpop.permute.xlu0 %867 }
  0xbf   : > { %892 = vst.msk [vmem:[#allocation9] sm:$0xff] %vm891_vm12, %v868_v10 }
  0xc1   : > { %v817_v11 = vpop.permute.xlu1 %816 }
  0xc2   : > { %838 = vst.msk [vmem:[#allocation9 + $0x48] sm:$0xff] %vm834_vm11, %v817_v11  ;;  %v872_v12 = vpop.permute.xlu0 %871 }
  0xc3   : > { %894 = vst.msk [vmem:[#allocation9 + $0x30] sm:$0xff] %vm891_vm12, %v872_v12 }
  0xc5   : > { %v870_v13 = vpop.permute.xlu1 %869 }
  0xc6   : > { %893 = vst.msk [vmem:[#allocation9 + $0x18] sm:$0xff] %vm891_vm12, %v870_v13  ;;  %v478_v14 = vpop.permute.xlu0 %477  ;;  %v900_v16 = vld [vmem:[#allocation9] sm:$0xff] }
  0xc7   : > { %498 = vst.msk [vmem:[#allocation9 + $0x60] sm:$0xff] %vm493_vm4, %v478_v14 }
  0xc8   : > { %1083 = vst.msk [vmem:[#allocation9] sm:$0xff] %vm295_vm6, %v1075_v2 }
  0xc9   : > { %v874_v15 = vpop.permute.xlu1 %873 }
  0xca   : > { %895 = vst.msk [vmem:[#allocation9 + $0x48] sm:$0xff] %vm891_vm12, %v874_v15  ;;  %v482_v17 = vpop.permute.xlu0 %481  ;;  %v902_v21 = vld [vmem:[#allocation9 + $0x30] sm:$0xff] }
  0xcb   : > { %500 = vst.msk [vmem:[#allocation9 + $0x90] sm:$0xff] %vm493_vm4, %v482_v17 }
  0xcd   : > { %v480_v18 = vpop.permute.xlu1 %479  ;;  %v901_v19 = vld [vmem:[#allocation9 + $0x18] sm:$0xff] }
  0xce   : > { %499 = vst.msk [vmem:[#allocation9 + $0x78] sm:$0xff] %vm493_vm4, %v480_v18  ;;  %v908_v20 = vpack.c.bf16 %v901_v19, %v900_v16  ;;  %v535_v22 = vpop.permute.xlu0 %534 }
  0xcf   : > { %555 = vst.msk [vmem:[#allocation9 + $0x60] sm:$0xff] %vm550_vm5, %v535_v22 }
  0xd0   : > { %3153 = vmatprep.mubr.msk.bf16.mxu0 %vm931_vm13, %v908_v20 }
  0xd1   : > { %v484_v23 = vpop.permute.xlu1 %483  ;;  %v903_v24 = vld [vmem:[#allocation9 + $0x48] sm:$0xff] }
  0xd2   : > { %501 = vst.msk [vmem:[#allocation9 + $0xa8] sm:$0xff] %vm493_vm4, %v484_v23  ;;  %v909_v25 = vpack.c.bf16 %v903_v24, %v902_v21  ;;  %v539_v26 = vpop.permute.xlu0 %538  ;;  %vm339_vm4 = vcmask 257024  }
  0xd3   : > { %557 = vst.msk [vmem:[#allocation9 + $0x90] sm:$0xff] %vm550_vm5, %v539_v26 }
  0xd4   : > { %3154 = vmatmul.mubr.msk.bf16.vlgmr.msra.gmra.mrb[0].mxu0 %vm931_vm13, %v909_v25  ;;  %340 = vst.msk [vmem:[#allocation5] sm:$0xf] %vm339_vm4, %v3347_v0  ;;  %342 = vst.msk [vmem:[#allocation5 + $0xc] sm:$0xf] %vm339_vm4, %v3347_v0 }
  0xd5   : > { %v537_v27 = vpop.permute.xlu1 %536  ;;  %3162 = vmatpush3.bf16.msra.mxu0 %v3249_v62  ;;  %343 = vst.msk [vmem:[#allocation5] sm:$0x1] %vm302_vm15, %v3347_v0  ;;  %346 = vst.msk [vmem:[#allocation5 + $0xc] sm:$0x1] %vm302_vm15, %v3347_v0 }
  0xd6   : > { %556 = vst.msk [vmem:[#allocation9 + $0x78] sm:$0xff] %vm550_vm5, %v537_v27  ;;  %v591_v28 = vpop.permute.xlu0 %590  ;;  %3163 = vmatprep.subr.bf16.mxu0 %v3250_v1 }
  0xd7   : > { %611 = vst.msk [vmem:[#allocation9 + $0x60] sm:$0xff] %vm606_vm7, %v591_v28 }
  0xd8   : > { %347 = vst.msk [vmem:[#allocation5 + $0x3] sm:$0x1] %vm302_vm15, %v3347_v0  ;;  %350 = vst.msk [vmem:[#allocation5 + $0xf] sm:$0x1] %vm302_vm15, %v3347_v0 }
  0xd9   : > { %v541_v29 = vpop.permute.xlu1 %540  ;;  %3164 = vmatpush3.bf16.msra.mxu0 %v3250_v1 }
  0xda   : > { %558 = vst.msk [vmem:[#allocation9 + $0xa8] sm:$0xff] %vm550_vm5, %v541_v29  ;;  %v595_v30 = vpop.permute.xlu0 %594  ;;  %vm3358_vm5 = vmmov 0  }
  0xdb   : > { %613 = vst.msk [vmem:[#allocation9 + $0x90] sm:$0xff] %vm606_vm7, %v595_v30 }
  0xdd   : > { %v593_v31 = vpop.permute.xlu1 %592 }
  0xde   : > { %612 = vst.msk [vmem:[#allocation9 + $0x78] sm:$0xff] %vm606_vm7, %v593_v31  ;;  %v648_v32 = vpop.permute.xlu0 %647 }
  0xdf   : > { %668 = vst.msk [vmem:[#allocation9 + $0x60] sm:$0xff] %vm663_vm8, %v648_v32 }
  0xe1   : > { %v597_v33 = vpop.permute.xlu1 %596 }
  0xe2   : > { %614 = vst.msk [vmem:[#allocation9 + $0xa8] sm:$0xff] %vm606_vm7, %v597_v33  ;;  %v652_v34 = vpop.permute.xlu0 %651  ;;  %v3251_v33 = vld [vmem:[%s4242_s2 + $0x40] sm:$0xff]   ;;  %vm2277_vm7 = vcmask 519424  }
  0xe3   : > { %670 = vst.msk [vmem:[#allocation9 + $0x90] sm:$0xff] %vm663_vm8, %v652_v34  ;;  %v3252_v34 = vld [vmem:[%s4242_s2] sm:$0xff]   ;;  %3041 = vmatprep.subr.bf16.mxu1 %v3251_v33 }
  0xe4   : > { %3042 = vmatpush3.bf16.msra.mxu1 %v3252_v34 }
  0xe5   : > { %v650_v35 = vpop.permute.xlu1 %649 }
  0xe6   : > { %669 = vst.msk [vmem:[#allocation9 + $0x78] sm:$0xff] %vm663_vm8, %v650_v35  ;;  %v705_v36 = vpop.permute.xlu0 %704  ;;  %v3253_v35 = vld [vmem:[%s4242_s2 + $0x48] sm:$0xff]  }
  0xe7   : > { %725 = vst.msk [vmem:[#allocation9 + $0x60] sm:$0xff] %vm720_vm9, %v705_v36  ;;  %v3254_v36 = vld [vmem:[%s4242_s2 + $0x8] sm:$0xff]   ;;  %3043 = vmatprep.subr.bf16.mxu1 %v3253_v35 }
  0xe8   : > { %3044 = vmatpush3.bf16.msra.mxu1 %v3254_v36 }
  0xe9   : > { %v654_v37 = vpop.permute.xlu1 %653 }
  0xea   : > { %671 = vst.msk [vmem:[#allocation9 + $0xa8] sm:$0xff] %vm663_vm8, %v654_v37  ;;  %v709_v38 = vpop.permute.xlu0 %708  ;;  %vm2294_vm8 = vcmask 781824  }
  0xeb   : > { %727 = vst.msk [vmem:[#allocation9 + $0x90] sm:$0xff] %vm720_vm9, %v709_v38  ;;  %v3255_v38 = vld [vmem:[%s4242_s2 + $0x50] sm:$0xff]  }
  0xec   : > { %3045 = vmatprep.subr.bf16.mxu1 %v3255_v38 }
  0xed   : > { %v707_v39 = vpop.permute.xlu1 %706 }
  0xee   : > { %726 = vst.msk [vmem:[#allocation9 + $0x78] sm:$0xff] %vm720_vm9, %v707_v39  ;;  %v762_v40 = vpop.permute.xlu0 %761 }
  0xef   : > { %782 = vst.msk [vmem:[#allocation9 + $0x60] sm:$0xff] %vm777_vm10, %v762_v40 }
  0xf1   : > { %v711_v41 = vpop.permute.xlu1 %710 }
  0xf2   : > { %728 = vst.msk [vmem:[#allocation9 + $0xa8] sm:$0xff] %vm720_vm9, %v711_v41  ;;  %v766_v42 = vpop.permute.xlu0 %765  ;;  %v3256_v41 = vld [vmem:[%s4242_s2 + $0x10] sm:$0xff]   ;;  %vm2311_vm9 = vcmask 1044224  }
  0xf3   : > { %784 = vst.msk [vmem:[#allocation9 + $0x90] sm:$0xff] %vm777_vm10, %v766_v42  ;;  %3046 = vmatpush3.bf16.msra.mxu1 %v3256_v41 }
  0xf5   : > { %v764_v43 = vpop.permute.xlu1 %763 }
  0xf6   : > { %783 = vst.msk [vmem:[#allocation9 + $0x78] sm:$0xff] %vm777_vm10, %v764_v43  ;;  %v819_v44 = vpop.permute.xlu0 %818  ;;  %v3257_v43 = vld [vmem:[%s4242_s2 + $0x58] sm:$0xff]  }
  0xf7   : > { %839 = vst.msk [vmem:[#allocation9 + $0x60] sm:$0xff] %vm834_vm11, %v819_v44  ;;  %v3258_v44 = vld [vmem:[%s4242_s2 + $0x18] sm:$0xff]   ;;  %3047 = vmatprep.subr.bf16.mxu1 %v3257_v43 }
  0xf8   : > { %3048 = vmatpush3.bf16.msra.mxu1 %v3258_v44 }
  0xf9   : > { %v768_v45 = vpop.permute.xlu1 %767 }
  0xfa   : > { %785 = vst.msk [vmem:[#allocation9 + $0xa8] sm:$0xff] %vm777_vm10, %v768_v45  ;;  %v823_v46 = vpop.permute.xlu0 %822  ;;  %v3259_v45 = vld [vmem:[%s4242_s2 + $0x60] sm:$0xff]   ;;  %vm2773_vm10 = vcmask 0  }
  0xfb   : > { %841 = vst.msk [vmem:[#allocation9 + $0x90] sm:$0xff] %vm834_vm11, %v823_v46  ;;  %v3260_v46 = vld [vmem:[%s4242_s2 + $0x20] sm:$0xff]   ;;  %3049 = vmatprep.subr.bf16.mxu1 %v3259_v45 }
  0xfc   : > { %3050 = vmatpush3.bf16.msra.mxu1 %v3260_v46 }
  0xfd   : > { %v821_v47 = vpop.permute.xlu1 %820 }
  0xfe   : > { %840 = vst.msk [vmem:[#allocation9 + $0x78] sm:$0xff] %vm834_vm11, %v821_v47  ;;  %v876_v48 = vpop.permute.xlu0 %875  ;;  %v3261_v47 = vld [vmem:[%s4242_s2 + $0x68] sm:$0xff]  }
  0xff   : > { %896 = vst.msk [vmem:[#allocation9 + $0x60] sm:$0xff] %vm891_vm12, %v876_v48  ;;  %v3262_v48 = vld [vmem:[%s4242_s2 + $0x28] sm:$0xff]   ;;  %3051 = vmatprep.subr.bf16.mxu1 %v3261_v47 }
 0x100   : > { %3052 = vmatpush3.bf16.msra.mxu1 %v3262_v48 }
 0x101   : > { %v825_v49 = vpop.permute.xlu1 %824 }
 0x102   : > { %842 = vst.msk [vmem:[#allocation9 + $0xa8] sm:$0xff] %vm834_vm11, %v825_v49  ;;  %v880_v50 = vpop.permute.xlu0 %879  ;;  %v3263_v49 = vld [vmem:[%s4242_s2 + $0x70] sm:$0xff]  }
 0x103   : > { %898 = vst.msk [vmem:[#allocation9 + $0x90] sm:$0xff] %vm891_vm12, %v880_v50  ;;  %v3264_v50 = vld [vmem:[%s4242_s2 + $0x30] sm:$0xff]   ;;  %3053 = vmatprep.subr.bf16.mxu1 %v3263_v49 }
 0x104   : > { %3054 = vmatpush3.bf16.msra.mxu1 %v3264_v50 }
 0x105   : > { %v878_v51 = vpop.permute.xlu1 %877 }
 0x106   : > { %897 = vst.msk [vmem:[#allocation9 + $0x78] sm:$0xff] %vm891_vm12, %v878_v51  ;;  %v904_v53 = vld [vmem:[#allocation9 + $0x60] sm:$0xff]  ;;  %v3265_v51 = vld [vmem:[%s4242_s2 + $0x78] sm:$0xff]  }
 0x107   : > { %3055 = vmatprep.subr.bf16.mxu1 %v3265_v51 }
 0x109   : > { %v882_v52 = vpop.permute.xlu1 %881 }
 0x10a   : > { %899 = vst.msk [vmem:[#allocation9 + $0xa8] sm:$0xff] %vm891_vm12, %v882_v52  ;;  %v906_v56 = vld [vmem:[#allocation9 + $0x90] sm:$0xff] }
 0x10b   : > { %v3266_v52 = vld [vmem:[%s4242_s2 + $0x38] sm:$0xff]  }
 0x10c   : > { %3056 = vmatpush3.bf16.msra.mxu1 %v3266_v52 }
 0x10d   : > { %v905_v54 = vld [vmem:[#allocation9 + $0x78] sm:$0xff]  ;;  %3173 = vmatprep.subr.bf16.mxu1 %v3347_v0 }
 0x10e   : > { %v910_v55 = vpack.c.bf16 %v905_v54, %v904_v53 }
 0x110   : > { %3157 = vmatprep.mubr.msk.bf16.mxu0 %vm931_vm13, %v910_v55 }
 0x111   : > { %v907_v57 = vld [vmem:[#allocation9 + $0xa8] sm:$0xff] }
 0x112   : > { %v911_v58 = vpack.c.bf16 %v907_v57, %v906_v56 }
 0x114   : > { %3158 = vmatmul.mubr.msk.bf16.gmra.mrb[4].mxu0 %vm931_vm13, %v911_v58 }
 0x116   : > { %v1108_v3 = vpop.permute.xlu0 %1107 }
 0x117   : > { %1132 = vst.msk [vmem:[#allocation9] sm:$0xff] %vm1131_vm0, %v1108_v3 }
 0x11a   : > { %v1157_v4 = vpop.permute.xlu0 %1156 }
 0x11b   : > { %1181 = vst.msk [vmem:[#allocation9] sm:$0xff] %vm1180_vm1, %v1157_v4 }
 0x1a7   : > { %v3155_v6 = vpop.f32.mrb[0].mxu0 }
 0x1a8   : > { %v991_v7 = vadd.f32 %v3155_v6, %v3762_v5  ;;  %v982_v8 = vpop.f32.mrb[1].mxu0 }
 0x1a9   : > { %v983_v9 = vadd.f32 %v3762_v5, %v982_v8  ;;  %v3156_v10 = vpop.f32.mrb[2].mxu0 }
 0x1aa   : > { %v1015_v11 = vmul.f32 0.05, %v991_v7  ;;  %v994_v12 = vadd.f32 %v3156_v10, %v3762_v5  ;;  %v985_v13 = vpop.f32.mrb[3].mxu0 }
 0x1ab   : > { %v1013_v14 = vmul.f32 0.05, %v983_v9  ;;  %v986_v15 = vadd.f32 %v3762_v5, %v985_v13 }
 0x1ac   : > { %v1023_v16 = vmax.f32 %v991_v7, %v1015_v11  ;;  %v1016_v17 = vmul.f32 0.05, %v994_v12 }
 0x1ad   : > { %v1021_v18 = vmax.f32 %v983_v9, %v1013_v14  ;;  %v1014_v19 = vmul.f32 0.05, %v986_v15 }
 0x1ae   : > { %1032 = vst.msk [vmem:[#allocation3 + $0x31] sm:$0xff] %vm295_vm6, %v1023_v16  ;;  %v1024_v20 = vmax.f32 %v994_v12, %v1016_v17 }
 0x1af   : > { %1030 = vst.msk [vmem:[#allocation3 + $0x11] sm:$0xff] %vm295_vm6, %v1021_v18  ;;  %v1022_v21 = vmax.f32 %v986_v15, %v1014_v19 }
 0x1b0   : > { %1033 = vst.msk [vmem:[#allocation3 + $0x41] sm:$0xff] %vm295_vm6, %v1024_v20 }
 0x1b1   : > { %1031 = vst.msk [vmem:[#allocation3 + $0x21] sm:$0xff] %vm295_vm6, %v1022_v21 }
 0x1b5   : > { %v1304_v22 = vld [vmem:[#allocation3 + $0x30] sm:$0xff] }
 0x1b6   : > { %v1256_v23 = vld [vmem:[#allocation3 + $0x32] sm:$0xff]  ;;  %1321 = vrot.lane.b32.xlu1 %v1304_v22, %s3356_s18  ;;  %1086 = vst.msk [vmem:[#allocation9 + $0x48] sm:$0xff] %vm295_vm6, %v1304_v22 }
 0x1b7   : > { %v1352_v24 = vld [vmem:[#allocation3 + $0x31] sm:$0xff]  ;;  %1274 = vrot.lane.b32.xlu0 %v1256_v23, %s3355_s15  ;;  %1408 = vst.msk [vmem:[#allocation9 + $0x28] sm:$0xff] %vm295_vm6, %v1256_v23  ;;  %v1305_v27 = vld [vmem:[#allocation3 + $0x40] sm:$0xff] }
 0x1b8   : > { %v1189_v25 = vld [vmem:[#allocation3 + $0x10] sm:$0xff]  ;;  %1248 = vst.msk [vmem:[#allocation9 + $0x38] sm:$0xff] %vm295_vm6, %v1352_v24  ;;  %v1353_v28 = vld [vmem:[#allocation3 + $0x41] sm:$0xff]  ;;  %1087 = vst.msk [vmem:[#allocation9 + $0x60] sm:$0xff] %vm295_vm6, %v1305_v27 }
 0x1b9   : > { %v1092_v26 = vld [vmem:[#allocation3 + $0x11] sm:$0xff]  ;;  %v1257_v29 = vld [vmem:[#allocation3 + $0x42] sm:$0xff]  ;;  %1084 = vst.msk [vmem:[#allocation9 + $0x18] sm:$0xff] %vm295_vm6, %v1189_v25  ;;  %1249 = vst.msk [vmem:[#allocation9 + $0x50] sm:$0xff] %vm295_vm6, %v1353_v28 }
 0x1ba   : > { %1246 = vst.msk [vmem:[#allocation9 + $0x8] sm:$0xff] %vm295_vm6, %v1092_v26  ;;  %v3780_v30 = vld [vmem:[#allocation3 + $0x22] sm:$0xff]  ;;  %1409 = vst.msk [vmem:[#allocation9 + $0x40] sm:$0xff] %vm295_vm6, %v1257_v29  ;;  %1369 = vrot.lane.b32.xlu1 %v1352_v24, %s3357_s9  ;;  %v1254_v37 = vld [vmem:[#allocation3 + $0x12] sm:$0xff] }
 0x1bb   : > { %v3782_v31 = vld [vmem:[#allocation3 + $0x20] sm:$0xff]  ;;  %1407 = vst.msk [vmem:[#allocation9 + $0x10] sm:$0xff] %vm295_vm6, %v3780_v30  ;;  %1209 = vrot.lane.b32.xlu0 %v1304_v22, %s3357_s9 }
 0x1bc   : > { %v3784_v32 = vld [vmem:[#allocation3 + $0x21] sm:$0xff]  ;;  %1085 = vst.msk [vmem:[#allocation9 + $0x30] sm:$0xff] %vm295_vm6, %v3782_v31 }
 0x1bd   : > { %1247 = vst.msk [vmem:[#allocation9 + $0x20] sm:$0xff] %vm295_vm6, %v3784_v32 }
 0x1be   : > { %1113 = vrot.lane.b32.xlu1 %v1352_v24, %s3355_s15  ;;  %v1420_v40 = vld [vmem:[#allocation9 + $0x28] sm:$0xff] }
 0x1bf   : > { %1270 = vrot.lane.b32.xlu0 %v1254_v37, %s3355_s15 }
 0x1c1   : > { %v1423_v17 = vld [vmem:[#allocation9 + $0x40] sm:$0xff] }
 0x1c2   : > { %v1417_v39 = vld [vmem:[#allocation9 + $0x10] sm:$0xff]  ;;  %1162 = vrot.lane.b32.xlu1 %v1256_v23, %s3356_s18 }
 0x1c3   : > { %v1441_v42 = vpack.c.bf16 %v1420_v40, %v1417_v39  ;;  %1205 = vrot.lane.b32.xlu0 %v1189_v25, %s3357_s9  ;;  %v1438_v25 = vld [vmem:[#allocation9 + $0xb8] sm:$0xff] }
 0x1c5   : > { %3165 = vmatprep.mubr.msk.bf16.mxu0 %vm295_vm6, %v1441_v42 }
 0x1c6   : > { %1109 = vrot.lane.b32.xlu1 %v1092_v26, %s3355_s15 }
 0x1c7   : > { %1323 = vrot.lane.b32.xlu0 %v1305_v27, %s3356_s18 }
 0x1ca   : > { %1158 = vrot.lane.b32.xlu1 %v1254_v37, %s3356_s18 }
 0x1cb   : > { %1371 = vrot.lane.b32.xlu0 %v1353_v28, %s3357_s9 }
 0x1ce   : > { %1276 = vrot.lane.b32.xlu1 %v1257_v29, %s3355_s15 }
 0x1cf   : > { %1115 = vrot.lane.b32.xlu0 %v1353_v28, %s3355_s15  ;;  %v3915_v28 = vpop.permute.xlu1 %1333 }
 0x1d2   : > { %1211 = vrot.lane.b32.xlu1 %v1305_v27, %s3357_s9  ;;  %v1358_v27 = vld [vmem:[#allocation3 + $0x91] sm:$0xff] }
 0x1d3   : > { %1164 = vrot.lane.b32.xlu0 %v1257_v29, %s3356_s18 }
 0x1d6   : > { %1272 = vrot.lane.b32.xlu1 %v3780_v30, %s3355_s15 }
 0x1d7   : > { %1319 = vrot.lane.b32.xlu0 %v3782_v31, %s3356_s18 }
 0x1da   : > { %1207 = vrot.lane.b32.xlu1 %v3782_v31, %s3357_s9 }
 0x1db   : > { %1367 = vrot.lane.b32.xlu0 %v3784_v32, %s3357_s9 }
 0x1df   : > { %1111 = vrot.lane.b32.xlu0 %v3784_v32, %s3355_s15 }
 0x1e3   : > { %1160 = vrot.lane.b32.xlu0 %v3780_v30, %s3356_s18 }
 0x1e7   : > { %v3159_v53 = vpop.f32.mrb[4].mxu0 }
 0x1e8   : > { %v1007_v54 = vadd.f32 %v3159_v53, %v3762_v5  ;;  %v998_v55 = vpop.f32.mrb[5].mxu0 }
 0x1e9   : > { %v999_v56 = vadd.f32 %v3762_v5, %v998_v55  ;;  %v3160_v57 = vpop.f32.mrb[6].mxu0 }
 0x1ea   : > { %v1019_v58 = vmul.f32 0.05, %v1007_v54  ;;  %v1010_v59 = vadd.f32 %v3160_v57, %v3762_v5  ;;  %v1001_v60 = vpop.f32.mrb[7].mxu0 }
 0x1eb   : > { %v1017_v61 = vmul.f32 0.05, %v999_v56  ;;  %v1002_v62 = vadd.f32 %v3762_v5, %v1001_v60 }
 0x1ec   : > { %v1027_v63 = vmax.f32 %v1007_v54, %v1019_v58  ;;  %v1020_v1 = vmul.f32 0.05, %v1010_v59 }
 0x1ed   : > { %v1025_v2 = vmax.f32 %v999_v56, %v1017_v61  ;;  %v1018_v3 = vmul.f32 0.05, %v1002_v62 }
 0x1ee   : > { %1036 = vst.msk [vmem:[#allocation3 + $0x71] sm:$0xff] %vm295_vm6, %v1027_v63  ;;  %v1028_v4 = vmax.f32 %v1010_v59, %v1020_v1 }
 0x1ef   : > { %1034 = vst.msk [vmem:[#allocation3 + $0x51] sm:$0xff] %vm295_vm6, %v1025_v2  ;;  %v1026_v6 = vmax.f32 %v1002_v62, %v1018_v3 }
 0x1f0   : > { %1037 = vst.msk [vmem:[#allocation3 + $0x81] sm:$0xff] %vm295_vm6, %v1028_v4 }
 0x1f1   : > { %1035 = vst.msk [vmem:[#allocation3 + $0x61] sm:$0xff] %vm295_vm6, %v1026_v6 }
 0x1f5   : > { %v1308_v7 = vld [vmem:[#allocation3 + $0x70] sm:$0xff] }
 0x1f6   : > { %v1260_v8 = vld [vmem:[#allocation3 + $0x72] sm:$0xff]  ;;  %1329 = vrot.lane.b32.xlu1 %v1308_v7, %s3356_s18  ;;  %1090 = vst.msk [vmem:[#allocation9 + $0xa8] sm:$0xff] %vm295_vm6, %v1308_v7 }
 0x1f7   : > { %v1356_v9 = vld [vmem:[#allocation3 + $0x71] sm:$0xff]  ;;  %1282 = vrot.lane.b32.xlu0 %v1260_v8, %s3355_s15  ;;  %1412 = vst.msk [vmem:[#allocation9 + $0x88] sm:$0xff] %vm295_vm6, %v1260_v8  ;;  %v1405_v12 = vld [vmem:[#allocation3 + $0x82] sm:$0xff] }
 0x1f8   : > { %v1258_v5 = vld [vmem:[#allocation3 + $0x52] sm:$0xff]  ;;  %1252 = vst.msk [vmem:[#allocation9 + $0x98] sm:$0xff] %vm295_vm6, %v1356_v9  ;;  %v1357_v13 = vld [vmem:[#allocation3 + $0x81] sm:$0xff]  ;;  %1413 = vst.msk [vmem:[#allocation9 + $0xa0] sm:$0xff] %vm295_vm6, %v1405_v12 }
 0x1f9   : > { %v1193_v10 = vld [vmem:[#allocation3 + $0x50] sm:$0xff]  ;;  %1410 = vst.msk [vmem:[#allocation9 + $0x58] sm:$0xff] %vm295_vm6, %v1258_v5  ;;  %v1403_v14 = vld [vmem:[#allocation3 + $0x62] sm:$0xff]  ;;  %1253 = vst.msk [vmem:[#allocation9 + $0xb0] sm:$0xff] %vm295_vm6, %v1357_v13 }
 0x1fa   : > { %v1354_v11 = vld [vmem:[#allocation3 + $0x51] sm:$0xff]  ;;  %1088 = vst.msk [vmem:[#allocation9 + $0x78] sm:$0xff] %vm295_vm6, %v1193_v10  ;;  %v1307_v15 = vld [vmem:[#allocation3 + $0x60] sm:$0xff]  ;;  %1411 = vst.msk [vmem:[#allocation9 + $0x70] sm:$0xff] %vm295_vm6, %v1403_v14  ;;  %1377 = vrot.lane.b32.xlu1 %v1356_v9, %s3357_s9 }
 0x1fb   : > { %1250 = vst.msk [vmem:[#allocation9 + $0x68] sm:$0xff] %vm295_vm6, %v1354_v11  ;;  %v1355_v16 = vld [vmem:[#allocation3 + $0x61] sm:$0xff]  ;;  %1089 = vst.msk [vmem:[#allocation9 + $0x90] sm:$0xff] %vm295_vm6, %v1307_v15  ;;  %1278 = vrot.lane.b32.xlu0 %v1258_v5, %s3355_s15 }
 0x1fc   : > { %1251 = vst.msk [vmem:[#allocation9 + $0x80] sm:$0xff] %vm295_vm6, %v1355_v16  ;;  %v1309_v22 = vld [vmem:[#allocation3 + $0x80] sm:$0xff] }
 0x1fe   : > { %1121 = vrot.lane.b32.xlu1 %v1356_v9, %s3355_s15  ;;  %v1432_v21 = vld [vmem:[#allocation9 + $0x88] sm:$0xff] }
 0x1ff   : > { %1213 = vrot.lane.b32.xlu0 %v1193_v10, %s3357_s9  ;;  %v1435_v24 = vld [vmem:[#allocation9 + $0xa0] sm:$0xff] }
 0x200   : > { %v1426_v18 = vld [vmem:[#allocation9 + $0x58] sm:$0xff]  ;;  %v1450_v26 = vpack.c.bf16 %v1438_v25, %v1435_v24 }
 0x201   : > { %v1444_v19 = vpack.c.bf16 %v1426_v18, %v1423_v17  ;;  %v1429_v20 = vld [vmem:[#allocation9 + $0x70] sm:$0xff] }
 0x202   : > { %v1447_v23 = vpack.c.bf16 %v1432_v21, %v1429_v20  ;;  %1170 = vrot.lane.b32.xlu1 %v1260_v8, %s3356_s18 }
 0x203   : > { %3166 = vmatmul.mubr.msk.bf16.vlgmr.msra.gmra.mrb[8].mxu0 %vm295_vm6, %v1444_v19  ;;  %1331 = vrot.lane.b32.xlu0 %v1309_v22, %s3356_s18 }
 0x204   : > { %3169 = vmatprep.mubr.msk.bf16.mxu0 %vm295_vm6, %v1447_v23 }
 0x206   : > { %1325 = vrot.lane.b32.xlu1 %v1193_v10, %s3356_s18 }
 0x207   : > { %1379 = vrot.lane.b32.xlu0 %v1357_v13, %s3357_s9 }
 0x20a   : > { %1373 = vrot.lane.b32.xlu1 %v1354_v11, %s3357_s9 }
 0x20b   : > { %3170 = vmatmul.mubr.msk.bf16.gmra.mrb[12].mxu0 %vm295_vm6, %v1450_v26  ;;  %1327 = vrot.lane.b32.xlu0 %v1307_v15, %s3356_s18 }
 0x20e   : > { %1117 = vrot.lane.b32.xlu1 %v1354_v11, %s3355_s15 }
 0x20f   : > { %1375 = vrot.lane.b32.xlu0 %v1355_v16, %s3357_s9 }
 0x212   : > { %1166 = vrot.lane.b32.xlu1 %v1258_v5, %s3356_s18 }
 0x213   : > { %1119 = vrot.lane.b32.xlu0 %v1355_v16, %s3355_s15 }
 0x216   : > { %1284 = vrot.lane.b32.xlu1 %v1405_v12, %s3355_s15 }
 0x217   : > { %1168 = vrot.lane.b32.xlu0 %v1403_v14, %s3356_s18 }
 0x21a   : > { %1280 = vrot.lane.b32.xlu1 %v1403_v14, %s3355_s15 }
 0x21b   : > { %1217 = vrot.lane.b32.xlu0 %v1308_v7, %s3357_s9 }
 0x21e   : > { %1215 = vrot.lane.b32.xlu1 %v1307_v15, %s3357_s9 }
 0x222   : > { %1381 = vrot.lane.b32.xlu1 %v1358_v27, %s3357_s9 }
 0x226   : > { %1219 = vrot.lane.b32.xlu1 %v1309_v22, %s3357_s9 }
 0x228   : > { %v1322_v29 = vpop.permute.xlu1 %1321 }
 0x229   : > { %v1275_v30 = vpop.permute.xlu0 %1274 }
 0x22a   : > { %1296 = vst.msk [vmem:[#allocation9 + $0x38] sm:$0xff] %vm1131_vm0, %v1275_v30 }
 0x22c   : > { %v1370_v31 = vpop.permute.xlu1 %1369 }
 0x22d   : > { %v1210_v32 = vpop.permute.xlu0 %1209 }
 0x230   : > { %v1114_v33 = vpop.permute.xlu1 %1113 }
 0x231   : > { %v1271_v34 = vpop.permute.xlu0 %1270  ;;  %1135 = vst.msk [vmem:[#allocation9 + $0x48] sm:$0xff] %vm1131_vm0, %v1114_v33 }
 0x232   : > { %1294 = vst.msk [vmem:[#allocation9 + $0x8] sm:$0xff] %vm1131_vm0, %v1271_v34 }
 0x234   : > { %v1163_v35 = vpop.permute.xlu1 %1162 }
 0x235   : > { %v1206_v36 = vpop.permute.xlu0 %1205  ;;  %1184 = vst.msk [vmem:[#allocation9 + $0x48] sm:$0xff] %vm1180_vm1, %v1163_v35 }
 0x236   : > { %1230 = vst.msk [vmem:[#allocation9] sm:$0xff] %vm1229_vm2, %v1206_v36 }
 0x238   : > { %v1110_v37 = vpop.permute.xlu1 %1109 }
 0x239   : > { %v1324_v38 = vpop.permute.xlu0 %1323  ;;  %1133 = vst.msk [vmem:[#allocation9 + $0x18] sm:$0xff] %vm1131_vm0, %v1110_v37 }
 0x23a   : > { %1345 = vst.msk [vmem:[#allocation9 + $0x38] sm:$0xff] %vm1180_vm1, %v1324_v38 }
 0x23c   : > { %v1159_v39 = vpop.permute.xlu1 %1158 }
 0x23d   : > { %v1372_v40 = vpop.permute.xlu0 %1371  ;;  %1182 = vst.msk [vmem:[#allocation9 + $0x18] sm:$0xff] %vm1180_vm1, %v1159_v39  ;;  %v1415_v50 = vld [vmem:[#allocation9] sm:$0xff] }
 0x23e   : > { %1393 = vst.msk [vmem:[#allocation9 + $0x38] sm:$0xff] %vm1229_vm2, %v1372_v40 }
 0x240   : > { %v1277_v41 = vpop.permute.xlu1 %1276 }
 0x241   : > { %v1116_v42 = vpop.permute.xlu0 %1115  ;;  %1297 = vst.msk [vmem:[#allocation9 + $0x50] sm:$0xff] %vm1131_vm0, %v1277_v41 }
 0x242   : > { %1136 = vst.msk [vmem:[#allocation9 + $0x60] sm:$0xff] %vm1131_vm0, %v1116_v42 }
 0x244   : > { %v1212_v43 = vpop.permute.xlu1 %1211 }
 0x245   : > { %v1165_v44 = vpop.permute.xlu0 %1164  ;;  %1233 = vst.msk [vmem:[#allocation9 + $0x48] sm:$0xff] %vm1229_vm2, %v1212_v43  ;;  %v1422_v11 = vld [vmem:[#allocation9 + $0x38] sm:$0xff]  ;;  %v3276_v43 = vld [vmem:[%s4242_s2 + $0x110] sm:$0xff]  }
 0x246   : > { %1185 = vst.msk [vmem:[#allocation9 + $0x60] sm:$0xff] %vm1180_vm1, %v1165_v44  ;;  %v3278_v44 = vld [vmem:[%s4242_s2 + $0x118] sm:$0xff]  }
 0x248   : > { %v1273_v45 = vpop.permute.xlu1 %1272 }
 0x249   : > { %v1320_v46 = vpop.permute.xlu0 %1319  ;;  %1295 = vst.msk [vmem:[#allocation9 + $0x20] sm:$0xff] %vm1131_vm0, %v1273_v45 }
 0x24a   : > { %1343 = vst.msk [vmem:[#allocation9 + $0x8] sm:$0xff] %vm1180_vm1, %v1320_v46  ;;  %1344 = vst.msk [vmem:[#allocation9 + $0x20] sm:$0xff] %vm1180_vm1, %v1322_v29  ;;  %v4008_v46 = vld [vmem:[%s4243_s3 + $0x1] ss:$0 sm:$0xff] }
 0x24b   : > { %1392 = vst.msk [vmem:[#allocation9 + $0x20] sm:$0xff] %vm1229_vm2, %v1370_v31 }
 0x24c   : > { %v1208_v47 = vpop.permute.xlu1 %1207  ;;  %v1424_v14 = vld [vmem:[#allocation9 + $0x48] sm:$0xff] }
 0x24d   : > { %v1368_v48 = vpop.permute.xlu0 %1367  ;;  %1231 = vst.msk [vmem:[#allocation9 + $0x18] sm:$0xff] %vm1229_vm2, %v1208_v47 }
 0x24e   : > { %1391 = vst.msk [vmem:[#allocation9 + $0x8] sm:$0xff] %vm1229_vm2, %v1368_v48 }
 0x251   : > { %v1112_v49 = vpop.permute.xlu0 %1111 }
 0x252   : > { %1134 = vst.msk [vmem:[#allocation9 + $0x30] sm:$0xff] %vm1131_vm0, %v1112_v49  ;;  %v1419_v53 = vld [vmem:[#allocation9 + $0x20] sm:$0xff] }
 0x254   : > { %v1418_v54 = vld [vmem:[#allocation9 + $0x18] sm:$0xff] }
 0x255   : > { %v1161_v51 = vpop.permute.xlu0 %1160  ;;  %v1416_v52 = vld [vmem:[#allocation9 + $0x8] sm:$0xff]  ;;  %v1439_v56 = vpack.c.bf16 %v1418_v54, %v1415_v50 }
 0x256   : > { %1183 = vst.msk [vmem:[#allocation9 + $0x30] sm:$0xff] %vm1180_vm1, %v1161_v51  ;;  %v1440_v55 = vpack.c.bf16 %v1419_v53, %v1416_v52 }
 0x257   : > { %1232 = vst.msk [vmem:[#allocation9 + $0x30] sm:$0xff] %vm1229_vm2, %v1210_v32 }
 0x258   : > { %1607 = vmatprep.mubr.bf16.mxu1 %v1440_v55 }
 0x259   : > { %1608 = vmatmul.mubr.bf16.vlgmr.msra.gmra.mrb[0].mxu1 %v1439_v56 }
 0x25a   : > { %3174 = vmatpush3.bf16.msra.mxu1 %v3276_v43 }
 0x25b   : > { %3175 = vmatprep.subr.bf16.mxu1 %v3347_v0 }
 0x25e   : > { %v1421_v9 = vld [vmem:[#allocation9 + $0x30] sm:$0xff]  ;;  %3176 = vmatpush3.bf16.msra.mxu1 %v3278_v44 }
 0x25f   : > { %v1442_v15 = vpack.c.bf16 %v1424_v14, %v1421_v9  ;;  %3181 = vmatprep.subr.bf16.mxu1 %v3347_v0 }
 0x268   : > { %v1330_v57 = vpop.permute.xlu1 %1329 }
 0x269   : > { %v1283_v58 = vpop.permute.xlu0 %1282 }
 0x26a   : > { %1300 = vst.msk [vmem:[#allocation9 + $0x98] sm:$0xff] %vm1131_vm0, %v1283_v58 }
 0x26c   : > { %v1378_v59 = vpop.permute.xlu1 %1377 }
 0x26d   : > { %v1279_v60 = vpop.permute.xlu0 %1278 }
 0x26e   : > { %1298 = vst.msk [vmem:[#allocation9 + $0x68] sm:$0xff] %vm1131_vm0, %v1279_v60 }
 0x270   : > { %v1122_v61 = vpop.permute.xlu1 %1121 }
 0x271   : > { %v1214_v62 = vpop.permute.xlu0 %1213  ;;  %1139 = vst.msk [vmem:[#allocation9 + $0xa8] sm:$0xff] %vm1131_vm0, %v1122_v61 }
 0x272   : > { %1234 = vst.msk [vmem:[#allocation9 + $0x60] sm:$0xff] %vm1229_vm2, %v1214_v62 }
 0x274   : > { %v1171_v63 = vpop.permute.xlu1 %1170 }
 0x275   : > { %v1332_v1 = vpop.permute.xlu0 %1331  ;;  %1188 = vst.msk [vmem:[#allocation9 + $0xa8] sm:$0xff] %vm1180_vm1, %v1171_v63 }
 0x276   : > { %1349 = vst.msk [vmem:[#allocation9 + $0x98] sm:$0xff] %vm1180_vm1, %v1332_v1 }
 0x278   : > { %v1326_v2 = vpop.permute.xlu1 %1325 }
 0x279   : > { %v1380_v3 = vpop.permute.xlu0 %1379  ;;  %1346 = vst.msk [vmem:[#allocation9 + $0x50] sm:$0xff] %vm1180_vm1, %v1326_v2  ;;  %v1427_v26 = vld [vmem:[#allocation9 + $0x60] sm:$0xff] }
 0x27a   : > { %1397 = vst.msk [vmem:[#allocation9 + $0x98] sm:$0xff] %vm1229_vm2, %v1380_v3 }
 0x27c   : > { %v1374_v4 = vpop.permute.xlu1 %1373 }
 0x27d   : > { %v1328_v6 = vpop.permute.xlu0 %1327  ;;  %1394 = vst.msk [vmem:[#allocation9 + $0x50] sm:$0xff] %vm1229_vm2, %v1374_v4 }
 0x27e   : > { %1347 = vst.msk [vmem:[#allocation9 + $0x68] sm:$0xff] %vm1180_vm1, %v1328_v6 }
 0x280   : > { %v1118_v7 = vpop.permute.xlu1 %1117 }
 0x281   : > { %v1376_v8 = vpop.permute.xlu0 %1375  ;;  %1137 = vst.msk [vmem:[#allocation9 + $0x78] sm:$0xff] %vm1131_vm0, %v1118_v7  ;;  %v1434_v29 = vld [vmem:[#allocation9 + $0x98] sm:$0xff] }
 0x282   : > { %1395 = vst.msk [vmem:[#allocation9 + $0x68] sm:$0xff] %vm1229_vm2, %v1376_v8 }
 0x284   : > { %v1167_v5 = vpop.permute.xlu1 %1166  ;;  %v1425_v12 = vld [vmem:[#allocation9 + $0x50] sm:$0xff] }
 0x285   : > { %v1120_v10 = vpop.permute.xlu0 %1119  ;;  %1186 = vst.msk [vmem:[#allocation9 + $0x78] sm:$0xff] %vm1180_vm1, %v1167_v5  ;;  %v1443_v13 = vpack.c.bf16 %v1425_v12, %v1422_v11 }
 0x286   : > { %1138 = vst.msk [vmem:[#allocation9 + $0x90] sm:$0xff] %vm1131_vm0, %v1120_v10 }
 0x287   : > { %1615 = vmatprep.mubr.bf16.mxu1 %v1443_v13 }
 0x288   : > { %v1285_v16 = vpop.permute.xlu1 %1284  ;;  %1616 = vmatmul.mubr.bf16.gmra.mrb[4].mxu1 %v1442_v15 }
 0x289   : > { %v1169_v17 = vpop.permute.xlu0 %1168  ;;  %1301 = vst.msk [vmem:[#allocation9 + $0xb0] sm:$0xff] %vm1131_vm0, %v1285_v16  ;;  %v1428_v22 = vld [vmem:[#allocation9 + $0x68] sm:$0xff] }
 0x28a   : > { %1187 = vst.msk [vmem:[#allocation9 + $0x90] sm:$0xff] %vm1180_vm1, %v1169_v17  ;;  %1350 = vst.msk [vmem:[#allocation9 + $0xb0] sm:$0xff] %vm1180_vm1, %v3915_v28 }
 0x28c   : > { %v1281_v18 = vpop.permute.xlu1 %1280 }
 0x28d   : > { %v1218_v19 = vpop.permute.xlu0 %1217  ;;  %1299 = vst.msk [vmem:[#allocation9 + $0x80] sm:$0xff] %vm1131_vm0, %v1281_v18 }
 0x28e   : > { %1236 = vst.msk [vmem:[#allocation9 + $0x90] sm:$0xff] %vm1229_vm2, %v1218_v19 }
 0x28f   : > { %1348 = vst.msk [vmem:[#allocation9 + $0x80] sm:$0xff] %vm1180_vm1, %v1330_v57 }
 0x290   : > { %1396 = vst.msk [vmem:[#allocation9 + $0x80] sm:$0xff] %vm1229_vm2, %v1378_v59  ;;  %v1216_v20 = vpop.permute.xlu1 %1215 }
 0x291   : > { %1235 = vst.msk [vmem:[#allocation9 + $0x78] sm:$0xff] %vm1229_vm2, %v1216_v20 }
 0x294   : > { %v1382_v21 = vpop.permute.xlu1 %1381 }
 0x295   : > { %1398 = vst.msk [vmem:[#allocation9 + $0xb0] sm:$0xff] %vm1229_vm2, %v1382_v21  ;;  %v1433_v32 = vld [vmem:[#allocation9 + $0x90] sm:$0xff] }
 0x297   : > { %v1431_v23 = vld [vmem:[#allocation9 + $0x80] sm:$0xff] }
 0x298   : > { %v1446_v24 = vpack.c.bf16 %v1431_v23, %v1428_v22  ;;  %v1220_v25 = vpop.permute.xlu1 %1219  ;;  %v1430_v27 = vld [vmem:[#allocation9 + $0x78] sm:$0xff] }
 0x299   : > { %1237 = vst.msk [vmem:[#allocation9 + $0xa8] sm:$0xff] %vm1229_vm2, %v1220_v25  ;;  %v1445_v28 = vpack.c.bf16 %v1430_v27, %v1427_v26 }
 0x29a   : > { %1623 = vmatprep.mubr.bf16.mxu1 %v1446_v24 }
 0x29b   : > { %1624 = vmatmul.mubr.bf16.gmra.mrb[8].mxu1 %v1445_v28 }
 0x29c   : > { %v1437_v30 = vld [vmem:[#allocation9 + $0xb0] sm:$0xff] }
 0x29d   : > { %v1449_v31 = vpack.c.bf16 %v1437_v30, %v1434_v29  ;;  %v3285_v29 = vld [vmem:[%s4242_s2 + $0xd0] sm:$0xff]  }
 0x29e   : > { %v3286_v30 = vld [vmem:[%s4242_s2 + $0x90] sm:$0xff]   ;;  %3087 = vmatprep.subr.bf16.mxu0 %v3285_v29  ;;  %v3297_v29 = vld [vmem:[%s4242_s2 + $0xf8] sm:$0xff]  }
 0x29f   : > { %1631 = vmatprep.mubr.bf16.mxu1 %v1449_v31  ;;  %3088 = vmatpush3.bf16.msra.mxu0 %v3286_v30  ;;  %v3298_v30 = vld [vmem:[%s4242_s2 + $0xb8] sm:$0xff]  }
 0x2a0   : > { %v1436_v33 = vld [vmem:[#allocation9 + $0xa8] sm:$0xff] }
 0x2a1   : > { %v1448_v34 = vpack.c.bf16 %v1436_v33, %v1433_v32 }
 0x2a3   : > { %1632 = vmatmul.mubr.bf16.gmra.mrb[12].mxu1 %v1448_v34 }
 0x2a4   : > { %3177 = vmatprep.mubr.msk.bf16.mxu1 %vm3358_vm5, %v3347_v0 }
 0x2d6   : > { %v3167_v35 = vpop.f32.mrb[8].mxu0 }
 0x2d7   : > { %v1674_v36 = vpop.f32.mrb[9].mxu0 }
 0x2d8   : > { %v3168_v37 = vpop.f32.mrb[10].mxu0 }
 0x2d9   : > { %v1677_v38 = vpop.f32.mrb[11].mxu0 }
 0x2de   : > { %v3987_v39 = vpop.f32.mrb[12].mxu0 }
 0x2df   : > { %v3989_v40 = vpop.f32.mrb[13].mxu0 }
 0x2e0   : > { %v3991_v41 = vpop.f32.mrb[14].mxu0 }
 0x2e1   : > { %v3993_v42 = vpop.f32.mrb[15].mxu0 }
 0x32c   : > { %v3057_v45 = vpop.f32.mrb[0].mxu1 }
 0x32d   : > { %v3058_v47 = vpop.f32.mrb[1].mxu1 }
 0x32e   : > { %v3059_v48 = vadd.f32 %v3058_v47, %v3057_v45  ;;  %v3060_v49 = vpop.f32.mrb[2].mxu1 }
 0x32f   : > { %v3061_v50 = vpop.f32.mrb[3].mxu1 }
 0x330   : > { %v1610_v51 = vadd.f32 %v3059_v48, %v4008_v46  ;;  %v3062_v52 = vadd.f32 %v3061_v50, %v3060_v49 }
 0x332   : > { %v1675_v53 = vadd.f32 %v1674_v36, %v1610_v51  ;;  %v1613_v54 = vadd.f32 %v3062_v52, %v4008_v46 }
 0x334   : > { %v1705_v55 = vmul.f32 0.05, %v1675_v53  ;;  %v1678_v56 = vadd.f32 %v1677_v38, %v1613_v54 }
 0x336   : > { %v1713_v57 = vmax.f32 %v1675_v53, %v1705_v55  ;;  %v1706_v58 = vmul.f32 0.05, %v1678_v56 }
 0x338   : > { %1721 = vst.msk [vmem:[#allocation6] sm:$0xff] %vm295_vm6, %v1713_v57  ;;  %v1714_v59 = vmax.f32 %v1678_v56, %v1706_v58 }
 0x33a   : > { %1722 = vst.msk [vmem:[#allocation6 + $0x8] sm:$0xff] %vm295_vm6, %v1714_v59 }
 0x33f   : > { %v1729_v60 = vld [vmem:[#allocation6] ss:$2 sm:$0xf]  ;;  %v1737_v61 = vld [vmem:[#allocation6 + $0x1] ss:$2 sm:$0xf] }
 0x340   : > { %v1760_v1 = vmax.f32 %v1729_v60, %v1737_v61 }
 0x341   : > { %v1745_v62 = vld [vmem:[#allocation6 + $0x8] ss:$2 sm:$0xf]  ;;  %v1753_v63 = vld [vmem:[#allocation6 + $0x9] ss:$2 sm:$0xf] }
 0x342   : > { %v1764_v2 = vmax.f32 %v1745_v62, %v1753_v63 }
 0x344   : > { %v1768_v3 = vmax.f32 %v1760_v1, %v1764_v2 }
 0x346   : > { %1773 = vst.msk [vmem:[#allocation4 + $0x9] sm:$0xf] %vm339_vm4, %v1768_v3 }
 0x34d   : > { %v3267_v4 = vld [vmem:[#allocation4 + $0x1] ss:$8 sps:$4 sm:$0xff]  }
 0x34e   : > { %1839 = vrot.lane.b32.xlu0 %v3267_v4, %s3355_s15  ;;  %v3283_v6 = vld [vmem:[#allocation4] ss:$8 sps:$4 sm:$0xff]  }
 0x34f   : > { %v3268_v7 = vld [vmem:[#allocation4 + $0x2] ss:$8 sps:$4 sm:$0xff]   ;;  %1827 = vst.msk [vmem:[#allocation9] sm:$0xff] %vm295_vm6, %v3283_v6 }
 0x350   : > { %v3289_v4 = vld [vmem:[%s4242_s2 + $0x98] sm:$0xff]  }
 0x352   : > { %1857 = vrot.lane.b32.xlu0 %v3268_v7, %s3356_s18 }
 0x35b   : > { %v3063_v8 = vpop.f32.mrb[4].mxu1 }
 0x35c   : > { %v3064_v9 = vpop.f32.mrb[5].mxu1 }
 0x35d   : > { %v3065_v5 = vadd.f32 %v3064_v9, %v3063_v8  ;;  %v3066_v10 = vpop.f32.mrb[6].mxu1 }
 0x35e   : > { %v3067_v11 = vpop.f32.mrb[7].mxu1 }
 0x35f   : > { %v1618_v12 = vadd.f32 %v3065_v5, %v4008_v46  ;;  %v3068_v13 = vadd.f32 %v3067_v11, %v3066_v10 }
 0x361   : > { %v1683_v14 = vadd.f32 %v3167_v35, %v1618_v12  ;;  %v1621_v15 = vadd.f32 %v3068_v13, %v4008_v46  ;;  %v3290_v12 = vld [vmem:[%s4242_s2 + $0xe0] sm:$0xff]  }
 0x362   : > { %v3291_v13 = vld [vmem:[%s4242_s2 + $0xa0] sm:$0xff]  }
 0x363   : > { %v1707_v16 = vmul.f32 0.05, %v1683_v14  ;;  %v1686_v17 = vadd.f32 %v3168_v37, %v1621_v15  ;;  %v3293_v15 = vld [vmem:[%s4242_s2 + $0xe8] sm:$0xff]  }
 0x365   : > { %v1715_v18 = vmax.f32 %v1683_v14, %v1707_v16  ;;  %v1708_v19 = vmul.f32 0.05, %v1686_v17  ;;  %v3294_v16 = vld [vmem:[%s4242_s2 + $0xa8] sm:$0xff]  }
 0x367   : > { %1723 = vst.msk [vmem:[#allocation6 + $0x10] sm:$0xff] %vm295_vm6, %v1715_v18  ;;  %v1716_v20 = vmax.f32 %v1686_v17, %v1708_v19 }
 0x369   : > { %1724 = vst.msk [vmem:[#allocation6 + $0x18] sm:$0xff] %vm295_vm6, %v1716_v20 }
 0x36e   : > { %v1731_v21 = vld [vmem:[#allocation6 + $0x10] ss:$2 sm:$0xf]  ;;  %v1739_v22 = vld [vmem:[#allocation6 + $0x11] ss:$2 sm:$0xf] }
 0x36f   : > { %v3069_v23 = vpop.f32.mrb[8].mxu1  ;;  %v1761_v26 = vmax.f32 %v1731_v21, %v1739_v22 }
 0x370   : > { %v1747_v24 = vld [vmem:[#allocation6 + $0x18] ss:$2 sm:$0xf]  ;;  %v1755_v25 = vld [vmem:[#allocation6 + $0x19] ss:$2 sm:$0xf] }
 0x371   : > { %v1765_v27 = vmax.f32 %v1747_v24, %v1755_v25  ;;  %v3070_v28 = vpop.f32.mrb[9].mxu1  ;;  %v3296_v24 = vld [vmem:[%s4242_s2 + $0xb0] sm:$0xff]  }
 0x372   : > { %v3071_v31 = vadd.f32 %v3070_v28, %v3069_v23  ;;  %v3072_v32 = vpop.f32.mrb[10].mxu1  ;;  %v3295_v23 = vld [vmem:[%s4242_s2 + $0xf0] sm:$0xff]  }
 0x373   : > { %v3073_v33 = vpop.f32.mrb[11].mxu1  ;;  %v1769_v34 = vmax.f32 %v1761_v26, %v1765_v27 }
 0x374   : > { %v1626_v35 = vadd.f32 %v3071_v31, %v4008_v46  ;;  %v3074_v36 = vadd.f32 %v3073_v33, %v3072_v32  ;;  %v3299_v31 = vld [vmem:[%s4242_s2 + $0x100] sm:$0xff]  }
 0x375   : > { %1774 = vst.msk [vmem:[#allocation4 + $0x11] sm:$0xf] %vm339_vm4, %v1769_v34  ;;  %v3300_v33 = vld [vmem:[%s4242_s2 + $0xc0] sm:$0xff]   ;;  %v3301_v34 = vld [vmem:[%s4242_s2 + $0x108] sm:$0xff]  }
 0x376   : > { %v1691_v37 = vadd.f32 %v3989_v40, %v1626_v35  ;;  %v1629_v38 = vadd.f32 %v3074_v36, %v4008_v46  ;;  %v3075_v43 = vpop.f32.mrb[12].mxu1 }
 0x377   : > { %v3076_v44 = vpop.f32.mrb[13].mxu1 }
 0x378   : > { %v1709_v45 = vmul.f32 0.05, %v1691_v37  ;;  %v1694_v47 = vadd.f32 %v3993_v42, %v1629_v38  ;;  %v3077_v48 = vadd.f32 %v3076_v44, %v3075_v43  ;;  %v3078_v49 = vpop.f32.mrb[14].mxu1  ;;  %v3302_v38 = vld [vmem:[%s4242_s2 + $0xc8] sm:$0xff]  }
 0x379   : > { %v3079_v50 = vpop.f32.mrb[15].mxu1 }
 0x37a   : > { %v1717_v51 = vmax.f32 %v1691_v37, %v1709_v45  ;;  %v1710_v52 = vmul.f32 0.05, %v1694_v47  ;;  %v1634_v53 = vadd.f32 %v3077_v48, %v4008_v46  ;;  %v3080_v54 = vadd.f32 %v3079_v50, %v3078_v49 }
 0x37c   : > { %1725 = vst.msk [vmem:[#allocation6 + $0x20] sm:$0xff] %vm295_vm6, %v1717_v51  ;;  %v1718_v55 = vmax.f32 %v1694_v47, %v1710_v52  ;;  %v1699_v40 = vadd.f32 %v3987_v39, %v1634_v53  ;;  %v1637_v56 = vadd.f32 %v3080_v54, %v4008_v46  ;;  %v3269_v57 = vld [vmem:[#allocation4 + $0xa] ss:$8 sps:$4 sm:$0xff]  }
 0x37d   : > { %1907 = vrot.lane.b32.xlu0 %v3269_v57, %s3355_s15  ;;  %v3284_v59 = vld [vmem:[#allocation4 + $0x9] ss:$8 sps:$4 sm:$0xff]  }
 0x37e   : > { %1726 = vst.msk [vmem:[#allocation6 + $0x28] sm:$0xff] %vm295_vm6, %v1718_v55  ;;  %v1711_v58 = vmul.f32 0.05, %v1699_v40  ;;  %v1702_v42 = vadd.f32 %v3991_v41, %v1637_v56  ;;  %1895 = vst.msk [vmem:[#allocation9 + $0x8] sm:$0xff] %vm295_vm6, %v3284_v59  ;;  %v3288_v41 = vld [vmem:[%s4242_s2 + $0xd8] sm:$0xff]  }
 0x37f   : > { %3089 = vmatprep.subr.bf16.mxu0 %v3288_v41  ;;  %v3274_v25 = vld [vmem:[#allocation4 + $0x8] ss:$8 sps:$4 sm:$0xff]  }
 0x380   : > { %v1719_v60 = vmax.f32 %v1699_v40, %v1711_v58  ;;  %v1712_v61 = vmul.f32 0.05, %v1702_v42  ;;  %3090 = vmatpush3.bf16.msra.mxu0 %v3289_v4  ;;  %v3313_v41 = vld [vmem:[%s4242_s2 + $0x120] sm:$0xff]   ;;  %v3314_v4 = vld [vmem:[%s4242_s2 + $0x168] sm:$0xff]  }
 0x381   : > { %3091 = vmatprep.subr.bf16.mxu0 %v3290_v12 }
 0x382   : > { %1727 = vst.msk [vmem:[#allocation6 + $0x30] sm:$0xff] %vm295_vm6, %v1719_v60  ;;  %v1720_v62 = vmax.f32 %v1702_v42, %v1712_v61 }
 0x383   : > { %v1733_v63 = vld [vmem:[#allocation6 + $0x20] ss:$2 sm:$0xf]  ;;  %v1741_v39 = vld [vmem:[#allocation6 + $0x21] ss:$2 sm:$0xf] }
 0x384   : > { %1728 = vst.msk [vmem:[#allocation6 + $0x38] sm:$0xff] %vm295_vm6, %v1720_v62  ;;  %v1762_v2 = vmax.f32 %v1733_v63, %v1741_v39  ;;  %3092 = vmatpush3.bf16.msra.mxu0 %v3291_v13 }
 0x385   : > { %v1749_v46 = vld [vmem:[#allocation6 + $0x28] ss:$2 sm:$0xf]  ;;  %v1757_v1 = vld [vmem:[#allocation6 + $0x29] ss:$2 sm:$0xf]  ;;  %3093 = vmatprep.subr.bf16.mxu0 %v3293_v15 }
 0x386   : > { %v1766_v3 = vmax.f32 %v1749_v46, %v1757_v1  ;;  %v3306_v1 = vld [vmem:[%s4242_s2 + $0x1a0] sm:$0xff]  }
 0x388   : > { %v1770_v6 = vmax.f32 %v1762_v2, %v1766_v3  ;;  %3094 = vmatpush3.bf16.msra.mxu0 %v3294_v16  ;;  %v3309_v2 = vld [vmem:[%s4242_s2 + $0x1a8] sm:$0xff]   ;;  %v3312_v3 = vld [vmem:[%s4242_s2 + $0x160] sm:$0xff]  }
 0x389   : > { %v1735_v7 = vld [vmem:[#allocation6 + $0x30] ss:$2 sm:$0xf]  ;;  %v1743_v8 = vld [vmem:[#allocation6 + $0x31] ss:$2 sm:$0xf]  ;;  %3095 = vmatprep.subr.bf16.mxu0 %v3295_v23 }
 0x38a   : > { %1775 = vst.msk [vmem:[#allocation4 + $0x19] sm:$0xf] %vm339_vm4, %v1770_v6  ;;  %v1763_v10 = vmax.f32 %v1735_v7, %v1743_v8  ;;  %v3315_v6 = vld [vmem:[%s4242_s2 + $0x128] sm:$0xff]   ;;  %v3316_v7 = vld [vmem:[%s4242_s2 + $0x170] sm:$0xff]  }
 0x38b   : > { %v1751_v9 = vld [vmem:[#allocation6 + $0x38] ss:$2 sm:$0xf]  ;;  %v1759_v5 = vld [vmem:[#allocation6 + $0x39] ss:$2 sm:$0xf] }
 0x38c   : > { %v1767_v11 = vmax.f32 %v1751_v9, %v1759_v5  ;;  %3096 = vmatpush3.bf16.msra.mxu0 %v3296_v24  ;;  %v3317_v8 = vld [vmem:[%s4242_s2 + $0x130] sm:$0xff]   ;;  %v2953_v5 = vld [vmem:[%s4243_s3 + $0x2] ss:$0 sm:$0xff] }
 0x38d   : > { %3097 = vmatprep.subr.bf16.mxu0 %v3297_v29 }
 0x38e   : > { %v1771_v14 = vmax.f32 %v1763_v10, %v1767_v11 }
 0x390   : > { %1776 = vst.msk [vmem:[#allocation4 + $0x21] sm:$0xf] %vm339_vm4, %v1771_v14  ;;  %3098 = vmatpush3.bf16.msra.mxu0 %v3298_v30 }
 0x391   : > { %v3270_v17 = vld [vmem:[#allocation4 + $0x10] ss:$8 sps:$4 sm:$0xff]   ;;  %3099 = vmatprep.subr.bf16.mxu0 %v3299_v31 }
 0x392   : > { %v3271_v18 = vld [vmem:[#allocation4 + $0x11] ss:$8 sps:$4 sm:$0xff]   ;;  %1926 = vrot.lane.b32.xlu0 %v3270_v17, %s3356_s18 }
 0x393   : > { %v3272_v19 = vld [vmem:[#allocation4 + $0x11] ss:$8 sps:$4 sm:$0xff]   ;;  %1841 = vrot.lane.b32.xlu1 %v3271_v18, %s3355_s15 }
 0x394   : > { %v3280_v20 = vld [vmem:[#allocation4 + $0x12] ss:$8 sps:$4 sm:$0xff]   ;;  %3100 = vmatpush3.bf16.msra.mxu0 %v3300_v33 }
 0x395   : > { %v3287_v21 = vld [vmem:[#allocation4 + $0x10] ss:$8 sps:$4 sm:$0xff]   ;;  %1964 = vst.msk [vmem:[#allocation9 + $0x10] sm:$0xff] %vm295_vm6, %v3280_v20  ;;  %3101 = vmatprep.subr.bf16.mxu0 %v3301_v34 }
 0x396   : > { %v3273_v22 = vld [vmem:[#allocation4 + $0x12] ss:$8 sps:$4 sm:$0xff]   ;;  %1944 = vrot.lane.b32.xlu0 %v3272_v19, %s3357_s9  ;;  %1828 = vst.msk [vmem:[#allocation9 + $0x18] sm:$0xff] %vm295_vm6, %v3287_v21 }
 0x397   : > { %1859 = vrot.lane.b32.xlu1 %v3273_v22, %s3356_s18  ;;  %v3275_v26 = vld [vmem:[#allocation4 + $0x1a] ss:$8 sps:$4 sm:$0xff]  }
 0x398   : > { %v3281_v27 = vld [vmem:[#allocation4 + $0x22] ss:$8 sps:$4 sm:$0xff]   ;;  %3102 = vmatpush3.bf16.msra.mxu0 %v3302_v38 }
 0x399   : > { %v3292_v28 = vld [vmem:[#allocation4 + $0x19] ss:$8 sps:$4 sm:$0xff]   ;;  %1965 = vst.msk [vmem:[#allocation9 + $0x28] sm:$0xff] %vm295_vm6, %v3281_v27  ;;  %3112 = vmatprep.subr.bf16.mxu0 %v3312_v3 }
 0x39a   : > { %1875 = vrot.lane.b32.xlu0 %v3274_v25, %s3357_s9  ;;  %1896 = vst.msk [vmem:[#allocation9 + $0x20] sm:$0xff] %vm295_vm6, %v3292_v28  ;;  %v3277_v32 = vld [vmem:[#allocation4 + $0x20] ss:$8 sps:$4 sm:$0xff]  }
 0x39b   : > { %1909 = vrot.lane.b32.xlu1 %v3275_v26, %s3355_s15  ;;  %v3279_v35 = vld [vmem:[#allocation4 + $0x21] ss:$8 sps:$4 sm:$0xff]  }
 0x39c   : > { %v1968_v36 = vld [vmem:[#allocation9 + $0x10] sm:$0xff]  ;;  %v3282_v44 = vld [vmem:[#allocation4 + $0x18] ss:$8 sps:$4 sm:$0xff]  }
 0x39f   : > { %1928 = vrot.lane.b32.xlu1 %v3277_v32, %s3356_s18 }
 0x3a0   : > { %v1971_v37 = vld [vmem:[#allocation9 + $0x28] sm:$0xff] }
 0x3a1   : > { %v1974_v43 = vpack.c.bf16 %v1971_v37, %v1968_v36  ;;  %v2256_v37 = vlaneseq }
 0x3a3   : > { %1946 = vrot.lane.b32.xlu1 %v3279_v35, %s3357_s9  ;;  %3178 = vmatmul.mubr.msk.bf16.vlgmr.msra.gmra.mrb[16].mxu1 %vm295_vm6, %v1974_v43  ;;  %v3359_v35 = vmov 1983009808  }
 0x3a4   : > { %3185 = vmatprep.mubr.msk.bf16.mxu1 %vm3358_vm5, %v3347_v0  ;;  %3182 = vmatpush3.bf16.msra.mxu1 %v3306_v1  ;;  %v2254_v36 = vunpack.c.l.s4 %v3359_v35  ;;  %v3329_v1 = vld [vmem:[%s4242_s2 + $0x158] sm:$0xff]  }
 0x3a5   : > { %3183 = vmatprep.subr.bf16.mxu1 %v3347_v0 }
 0x3a7   : > { %1877 = vrot.lane.b32.xlu1 %v3282_v44, %s3357_s9 }
 0x3a8   : > { %3184 = vmatpush3.bf16.msra.mxu1 %v3309_v2 }
 0x3c0   : > { %v1840_v45 = vpop.permute.xlu0 %1839 }
 0x3c1   : > { %1845 = vst.msk [vmem:[#allocation9] sm:$0xff] %vm1131_vm0, %v1840_v45  ;;  %v3319_v45 = vld [vmem:[%s4242_s2 + $0x178] sm:$0xff]  }
 0x3c4   : > { %v1858_v47 = vpop.permute.xlu0 %1857 }
 0x3c5   : > { %1863 = vst.msk [vmem:[#allocation9] sm:$0xff] %vm1180_vm1, %v1858_v47 }
 0x3ef   : > { %v1908_v48 = vpop.permute.xlu0 %1907 }
 0x3f0   : > { %1913 = vst.msk [vmem:[#allocation9 + $0x8] sm:$0xff] %vm1131_vm0, %v1908_v48  ;;  %v3321_v48 = vld [vmem:[%s4242_s2 + $0x138] sm:$0xff]  }
 0x404   : > { %v1927_v49 = vpop.permute.xlu0 %1926 }
 0x405   : > { %v1842_v50 = vpop.permute.xlu1 %1841  ;;  %1932 = vst.msk [vmem:[#allocation9 + $0x8] sm:$0xff] %vm1180_vm1, %v1927_v49  ;;  %v2255_v49 = vunpack.c.0.s8 %v2254_v36 }
 0x406   : > { %1846 = vst.msk [vmem:[#allocation9 + $0x18] sm:$0xff] %vm1131_vm0, %v1842_v50  ;;  %v2257_v50 = vshrl.u32 %v2256_v37, 7 }
 0x408   : > { %v1945_v51 = vpop.permute.xlu0 %1944 }
 0x409   : > { %v1860_v52 = vpop.permute.xlu1 %1859  ;;  %1950 = vst.msk [vmem:[#allocation9 + $0x8] sm:$0xff] %vm1229_vm2, %v1945_v51  ;;  %v3322_v51 = vld [vmem:[%s4242_s2 + $0x180] sm:$0xff]  }
 0x40a   : > { %1864 = vst.msk [vmem:[#allocation9 + $0x18] sm:$0xff] %vm1180_vm1, %v1860_v52  ;;  %v3323_v52 = vld [vmem:[%s4242_s2 + $0x140] sm:$0xff]  }
 0x40c   : > { %v1876_v53 = vpop.permute.xlu0 %1875 }
 0x40d   : > { %v1910_v54 = vpop.permute.xlu1 %1909  ;;  %1881 = vst.msk [vmem:[#allocation9] sm:$0xff] %vm1229_vm2, %v1876_v53  ;;  %v4161_v53 = vsub.s32 %v2255_v49, %v2257_v50 }
 0x40e   : > { %1914 = vst.msk [vmem:[#allocation9 + $0x20] sm:$0xff] %vm1131_vm0, %v1910_v54  ;;  %v3324_v54 = vld [vmem:[%s4242_s2 + $0x188] sm:$0xff]  }
 0x410   : > { %v1967_v57 = vld [vmem:[#allocation9 + $0x8] sm:$0xff] }
 0x411   : > { %v1929_v55 = vpop.permute.xlu1 %1928 }
 0x412   : > { %1933 = vst.msk [vmem:[#allocation9 + $0x20] sm:$0xff] %vm1180_vm1, %v1929_v55 }
 0x414   : > { %v1966_v59 = vld [vmem:[#allocation9] sm:$0xff] }
 0x415   : > { %v1947_v40 = vpop.permute.xlu1 %1946 }
 0x416   : > { %1951 = vst.msk [vmem:[#allocation9 + $0x20] sm:$0xff] %vm1229_vm2, %v1947_v40 }
 0x419   : > { %v1878_v56 = vpop.permute.xlu1 %1877 }
 0x41a   : > { %1882 = vst.msk [vmem:[#allocation9 + $0x18] sm:$0xff] %vm1229_vm2, %v1878_v56 }
 0x41d   : > { %v1970_v58 = vld [vmem:[#allocation9 + $0x20] sm:$0xff] }
 0x41e   : > { %v1973_v42 = vpack.c.bf16 %v1970_v58, %v1967_v57 }
 0x420   : > { %2122 = vmatprep.mubr.bf16.mxu0 %v1973_v42 }
 0x421   : > { %v1969_v60 = vld [vmem:[#allocation9 + $0x18] sm:$0xff] }
 0x422   : > { %v1972_v61 = vpack.c.bf16 %v1969_v60, %v1966_v59 }
 0x424   : > { %2123 = vmatmul.mubr.bf16.vlgmr.msra.gmra.mrb[16].mxu0 %v1972_v61  ;;  %v3325_v61 = vld [vmem:[%s4242_s2 + $0x148] sm:$0xff]  }
 0x425   : > { %3113 = vmatpush3.bf16.msra.mxu0 %v3313_v41 }
 0x426   : > { %3114 = vmatprep.subr.bf16.mxu0 %v3314_v4 }
 0x429   : > { %3115 = vmatpush3.bf16.msra.mxu0 %v3315_v6 }
 0x42a   : > { %3116 = vmatprep.subr.bf16.mxu0 %v3316_v7 }
 0x42d   : > { %3117 = vmatpush3.bf16.msra.mxu0 %v3317_v8 }
 0x42e   : > { %3118 = vmatprep.subr.bf16.mxu0 %v3319_v45 }
 0x431   : > { %3119 = vmatpush3.bf16.msra.mxu0 %v3321_v48 }
 0x432   : > { %3120 = vmatprep.subr.bf16.mxu0 %v3322_v51  ;;  %v2696_v51 = vld [vmem:[%s4245_s5 + $0x10] sm:$0xff] }
 0x435   : > { %3121 = vmatpush3.bf16.msra.mxu0 %v3323_v52  ;;  %v2697_v52 = vld [vmem:[%s4245_s5 + $0x18] sm:$0xff] }
 0x436   : > { %3122 = vmatprep.subr.bf16.mxu0 %v3324_v54  ;;  %v2620_v54 = vld [vmem:[%s4243_s3 + $0x4] sm:$0x1] }
 0x439   : > { %3123 = vmatpush3.bf16.msra.mxu0 %v3325_v61 }
 0x476   : > { %v2165_v62 = vpop.f32.mrb[16].mxu1 }
 0x477   : > { %v3179_v63 = vpop.f32.mrb[17].mxu1 }
 0x478   : > { %v2168_v39 = vpop.f32.mrb[18].mxu1 }
 0x479   : > { %v3180_v46 = vpop.f32.mrb[19].mxu1 }
 0x47a   : > { %v3328_v46 = vld [vmem:[%s4242_s2 + $0x198] sm:$0xff]  }
 0x4f7   : > { %v3103_v9 = vpop.f32.mrb[16].mxu0 }
 0x4f8   : > { %v3104_v10 = vpop.f32.mrb[17].mxu0 }
 0x4f9   : > { %v3105_v11 = vadd.f32 %v3104_v10, %v3103_v9  ;;  %v3106_v12 = vpop.f32.mrb[18].mxu0 }
 0x4fa   : > { %v3107_v13 = vpop.f32.mrb[19].mxu0 }
 0x4fb   : > { %v2125_v14 = vadd.f32 %v3105_v11, %v2953_v5  ;;  %v3108_v15 = vadd.f32 %v3107_v13, %v3106_v12 }
 0x4fd   : > { %v2166_v16 = vadd.f32 %v2165_v62, %v2125_v14  ;;  %v2128_v17 = vadd.f32 %v3108_v15, %v2953_v5  ;;  %v3326_v62 = vld [vmem:[%s4242_s2 + $0x190] sm:$0xff]  }
 0x4fe   : > { %3124 = vmatprep.subr.bf16.mxu0 %v3326_v62 }
 0x4ff   : > { %v2172_v18 = vmul.f32 0.05, %v2166_v16  ;;  %v2169_v19 = vadd.f32 %v2168_v39, %v2128_v17  ;;  %v3327_v39 = vld [vmem:[%s4242_s2 + $0x150] sm:$0xff]   ;;  %v2616_v17 = vld [vmem:[%s4244_s4] sm:$0xff] }
 0x500   : > { %3125 = vmatpush3.bf16.msra.mxu0 %v3327_v39 }
 0x501   : > { %v2174_v20 = vmax.f32 %v2166_v16, %v2172_v18  ;;  %v2173_v21 = vmul.f32 0.05, %v2169_v19  ;;  %3126 = vmatprep.subr.bf16.mxu0 %v3328_v46  ;;  %v2617_v18 = vld [vmem:[%s4244_s4 + $0x8] sm:$0xff] }
 0x503   : > { %v2178_v22 = vcombine.high %v2174_v20, %v2174_v20  ;;  %2182 = vst.msk [vmem:[#allocation7] sm:$0xf] %vm339_vm4, %v2174_v20  ;;  %v2175_v23 = vmax.f32 %v2169_v19, %v2173_v21  ;;  %v2618_v19 = vld [vmem:[%s4244_s4 + $0x10] sm:$0xff]  ;;  %v3360_v20 = vmov 0.0|0.0   ;;  %v3212_v21 = vpack.c.bf16 %v2617_v18, %v2616_v17 }
 0x504   : > { %3127 = vmatpush3.bf16.msra.mxu0 %v3329_v1  ;;  %3211 = vmatprep.subr.bf16.mxu1 %v3360_v20 }
 0x505   : > { %2183 = vst.msk [vmem:[#allocation7 + $0x4] sm:$0xf] %vm339_vm4, %v2178_v22  ;;  %v2179_v24 = vcombine.high %v2175_v23, %v2175_v23  ;;  %2184 = vst.msk [vmem:[#allocation7 + $0x8] sm:$0xf] %vm339_vm4, %v2175_v23  ;;  %v2619_v22 = vld [vmem:[%s4244_s4 + $0x18] sm:$0xff] }
 0x506   : > { %v3215_v23 = vpack.c.bf16 %v2619_v22, %v2618_v19 }
 0x507   : > { %2185 = vst.msk [vmem:[#allocation7 + $0xc] sm:$0xf] %vm339_vm4, %v2179_v24 }
 0x50a   : > { %v2186_v25 = vld [vmem:[#allocation7] ss:$2 sm:$0x3]  ;;  %v2190_v26 = vld [vmem:[#allocation7 + $0x1] ss:$2 sm:$0x3] }
 0x50b   : > { %v2201_v29 = vmax.f32 %v2186_v25, %v2190_v26  ;;  %v3009_v25 = vld [vmem:[%s4243_s3 + $0x3] ss:$0 sm:$0xff] }
 0x50c   : > { %v2194_v27 = vld [vmem:[#allocation7 + $0x4] ss:$2 sm:$0x3]  ;;  %v2198_v28 = vld [vmem:[#allocation7 + $0x5] ss:$2 sm:$0x3] }
 0x50d   : > { %v2203_v30 = vmax.f32 %v2194_v27, %v2198_v28  ;;  %v2188_v31 = vld [vmem:[#allocation7 + $0x8] ss:$2 sm:$0x3]  ;;  %v2192_v32 = vld [vmem:[#allocation7 + $0x9] ss:$2 sm:$0x3] }
 0x50e   : > { %v2196_v33 = vld [vmem:[#allocation7 + $0xc] ss:$2 sm:$0x3]  ;;  %v2200_v34 = vld [vmem:[#allocation7 + $0xd] ss:$2 sm:$0x3]  ;;  %v2202_v43 = vmax.f32 %v2188_v31, %v2192_v32 }
 0x50f   : > { %v2205_v38 = vmax.f32 %v2201_v29, %v2203_v30  ;;  %v2204_v44 = vmax.f32 %v2196_v33, %v2200_v34 }
 0x511   : > { %2208 = vst.msk [vmem:[#allocation5 + $0x5] sm:$0x3] %vm297_vm14, %v2205_v38  ;;  %v2206_v47 = vmax.f32 %v2202_v43, %v2204_v44  ;;  %v2694_v38 = vld [vmem:[%s4245_s5] sm:$0xff]  ;;  %v2695_v43 = vld [vmem:[%s4245_s5 + $0x8] sm:$0xff] }
 0x512   : > { %v3218_v49 = vpack.c.bf16 %v2695_v43, %v2694_v38 }
 0x513   : > { %2209 = vst.msk [vmem:[#allocation5 + $0x9] sm:$0x3] %vm297_vm14, %v2206_v47 }
 0x518   : > { %v3330_v55 = vld.sshfl [vmem:[#allocation5 + $0x1] sm:$0xf pattern:$0x76325410] }
 0x519   : > { %v3332_v40 = vld.sshfl [vmem:[#allocation5 + $0x2] sm:$0xf pattern:$0x76325410]  ;;  %2274 = vrot.lane.b32.xlu1 %v3330_v55, %s3355_s15 }
 0x51a   : > { %v3331_v56 = vld.sshfl [vmem:[#allocation5 + $0x6] sm:$0xf pattern:$0x76325410] }
 0x51b   : > { %v3335_v57 = vld.sshfl [vmem:[#allocation5 + $0x8] sm:$0xf pattern:$0x76325410]  ;;  %2339 = vrot.lane.b32.xlu0 %v3331_v56, %s3355_s15 }
 0x51c   : > { %v3337_v58 = vld.sshfl [vmem:[#allocation5 + $0x4] sm:$0xf pattern:$0x76325410] }
 0x51d   : > { %v3333_v42 = vld.sshfl [vmem:[#allocation5 + $0xa] sm:$0xf pattern:$0x76325410]  ;;  %2291 = vrot.lane.b32.xlu1 %v3332_v40, %s3356_s18 }
 0x51e   : > { %v3334_v59 = vld.sshfl [vmem:[#allocation5] sm:$0xf pattern:$0x76325410]  ;;  %2389 = vst.msk [vmem:[#allocation9 + $0x10] sm:$0xf] %vm339_vm4, %v3333_v42 }
 0x51f   : > { %v3336_v60 = vld.sshfl [vmem:[#allocation5 + $0x5] sm:$0xf pattern:$0x76325410]  ;;  %2261 = vst.msk [vmem:[#allocation9] sm:$0xf] %vm339_vm4, %v3334_v59  ;;  %2356 = vrot.lane.b32.xlu0 %v3335_v57, %s3356_s18 }
 0x520   : > { %v3338_v63 = vld.sshfl [vmem:[#allocation5 + $0x9] sm:$0xf pattern:$0x76325410]  ;;  %2326 = vst.msk [vmem:[#allocation9 + $0x8] sm:$0xf] %vm339_vm4, %v3336_v60 }
 0x521   : > { %2308 = vrot.lane.b32.xlu1 %v3337_v58, %s3357_s9 }
 0x523   : > { %2372 = vrot.lane.b32.xlu0 %v3338_v63, %s3357_s9 }
 0x525   : > { %v2392_v2 = vld [vmem:[#allocation9 + $0x10] sm:$0xf] }
 0x526   : > { %v2395_v3 = vpack.c.bf16 %v2392_v2, %v2392_v2 }
 0x528   : > { %3186 = vmatmul.mubr.msk.bf16.vlgmr.msra.gmra.mrb[20].mxu1 %vm295_vm6, %v2395_v3 }
 0x529   : > { %3197 = vmatprep.mubr.msk.f32.mxu1 %vm3358_vm5, %v3347_v0  ;;  %3213 = vmatpush3.bf16.msra.mxu1 %v3212_v21 }
 0x52a   : > { %3214 = vmatprep.subr.bf16.mxu1 %v3360_v20 }
 0x52d   : > { %3216 = vmatpush3.bf16.msra.mxu1 %v3215_v23 }
 0x52e   : > { %3217 = vmatprep.subr.bf16.mxu1 %v3360_v20 }
 0x58b   : > { %v2275_v41 = vpop.permute.xlu1 %2274 }
 0x58c   : > { %2278 = vst.msk [vmem:[#allocation9] sm:$0xf] %vm2277_vm7, %v2275_v41 }
 0x58d   : > { %v2340_v4 = vpop.permute.xlu0 %2339 }
 0x58e   : > { %2342 = vst.msk [vmem:[#allocation9 + $0x8] sm:$0xf] %vm2277_vm7, %v2340_v4 }
 0x58f   : > { %v2292_v6 = vpop.permute.xlu1 %2291 }
 0x590   : > { %2295 = vst.msk [vmem:[#allocation9] sm:$0xf] %vm2294_vm8, %v2292_v6 }
 0x591   : > { %v2357_v7 = vpop.permute.xlu0 %2356 }
 0x592   : > { %2359 = vst.msk [vmem:[#allocation9 + $0x8] sm:$0xf] %vm2294_vm8, %v2357_v7 }
 0x593   : > { %v2309_v8 = vpop.permute.xlu1 %2308 }
 0x594   : > { %2312 = vst.msk [vmem:[#allocation9] sm:$0xf] %vm2311_vm9, %v2309_v8 }
 0x595   : > { %v2373_v9 = vpop.permute.xlu0 %2372 }
 0x596   : > { %2375 = vst.msk [vmem:[#allocation9 + $0x8] sm:$0xf] %vm2311_vm9, %v2373_v9 }
 0x59b   : > { %v2390_v5 = vld [vmem:[#allocation9] sm:$0xf] }
 0x59c   : > { %v2393_v12 = vpack.c.bf16 %v2390_v5, %v2390_v5 }
 0x59d   : > { %v2391_v10 = vld [vmem:[#allocation9 + $0x8] sm:$0xf] }
 0x59e   : > { %v2394_v11 = vpack.c.bf16 %v2391_v10, %v2391_v10 }
 0x5a0   : > { %2543 = vmatprep.mubr.bf16.mxu0 %v2394_v11 }
 0x5a1   : > { %2544 = vmatmul.mubr.bf16.vlgmr.msra.gmra.mrb[20].mxu0 %v2393_v12 }
 0x5fb   : > { %v2585_v13 = vpop.f32.mrb[20].mxu1 }
 0x5fc   : > { %v3187_v14 = vpop.f32.mrb[21].mxu1 }
 0x5fd   : > { %v2588_v15 = vpop.f32.mrb[22].mxu1 }
 0x5fe   : > { %v3188_v16 = vpop.f32.mrb[23].mxu1 }
 0x674   : > { %v3128_v24 = vpop.f32.mrb[20].mxu0 }
 0x675   : > { %v3129_v26 = vpop.f32.mrb[21].mxu0 }
 0x676   : > { %v3130_v27 = vadd.f32 %v3129_v26, %v3128_v24  ;;  %v3131_v28 = vpop.f32.mrb[22].mxu0 }
 0x677   : > { %v3132_v29 = vpop.f32.mrb[23].mxu0 }
 0x678   : > { %v2546_v30 = vadd.f32 %v3130_v27, %v3009_v25 }
 0x67a   : > { %v2586_v31 = vadd.f32 %v2585_v13, %v2546_v30 }
 0x67c   : > { %v2591_v32 = vmul.f32 0.05, %v2586_v31 }
 0x67e   : > { %v2592_v33 = vmax.f32 %v2586_v31, %v2591_v32 }
 0x680   : > { %v2600_v34 = vrot.slane %v2592_v33, %v4161_v53  ;;  %v3221_v53 = vpack.c.bf16 %v2697_v52, %v2696_v51 }
 0x682   : > { %v2601_v35 = vcombine.high %v2600_v34, %v2600_v34  ;;  %2604 = vst.msk [vmem:[#allocation8] sm:$0x3] %vm297_vm14, %v2600_v34 }
 0x684   : > { %2605 = vst.msk [vmem:[#allocation8 + $0x2] sm:$0x3] %vm297_vm14, %v2601_v35 }
 0x689   : > { %v2606_v36 = vld [vmem:[#allocation8] ss:$2 sm:$0x1]  ;;  %v2608_v37 = vld [vmem:[#allocation8 + $0x1] ss:$2 sm:$0x1] }
 0x68a   : > { %v2613_v47 = vmax.f32 %v2606_v36, %v2608_v37 }
 0x68b   : > { %v2610_v44 = vld [vmem:[#allocation8 + $0x2] ss:$2 sm:$0x1]  ;;  %v2612_v45 = vld [vmem:[#allocation8 + $0x3] ss:$2 sm:$0x1] }
 0x68c   : > { %v2614_v48 = vmax.f32 %v2610_v44, %v2612_v45 }
 0x68e   : > { %v2615_v50 = vmax.f32 %v2613_v47, %v2614_v48 }
 0x690   : > { %3198 = vmatmul.mubr.msk.f32.vlgmr.msra.gmra.mrb[24].mxu1 %vm295_vm6, %v2615_v50 }
 0x691   : > { %3219 = vmatpush3.bf16.msra.mxu1 %v3218_v49  ;;  %3208 = vmatprep.mubr.msk.f32.mxu1 %vm3358_vm5, %v3347_v0  ;;  %v2698_v0 = vld [vmem:[%s4243_s3 + $0x5] sm:$0x1] }
 0x692   : > { %3220 = vmatprep.subr.bf16.mxu1 %v3360_v20 }
 0x695   : > { %3222 = vmatpush3.bf16.msra.mxu1 %v3221_v53 }
 0x763   : > { %v2690_v55 = vpop.f32.mrb[24].mxu1 }
 0x764   : > { %v2691_v40 = vadd.f32 %v2690_v55, %v2620_v54  ;;  %v3199_v56 = vpop.f32.mrb[25].mxu1 }
 0x766   : > { %3209 = vmatmul.mubr.msk.f32.vlgmr.msra.gmra.mrb[26].mxu1 %vm295_vm6, %v2691_v40 }
 0x839   : > { %v2768_v57 = vpop.f32.mrb[26].mxu1 }
 0x83a   : > { %v2769_v58 = vadd.f32 %v2768_v57, %v2698_v0  ;;  %v3210_v42 = vpop.f32.mrb[27].mxu1 }
 0x83c   : > { %v2772_v59 = vmax.f32 %v2769_v58, 0.0 }
 0x83e   : > { %2774 = vst.msk [vmem:[%s247_s17] sm:$0x1] %vm2773_vm10, %v2772_v59 }
 0x83f PF: > { %s16_s21 = sadd.s32 1, %s3345_s21  }
 0x840   : > { %p13_p4 = scmp.ge.s32.totalorder %s16_s21, 4  }
 0x842   :  { %15 = sbr.rel (!%p13_p4) target bundleno = 1 (0x1), region = 182 }

</bundles_post_ra>
